<compile_context>
chip_gen: v6e
topology: v6e:2x2x1
jax: 0.10.0
libtpu: 0.0.40
codegen_flags: <defaults>
</compile_context>

<pallas_src>
import math

import jax
import jax.numpy as jnp
from jax.experimental import pallas as pl
from jax.experimental.pallas import tpu as pltpu

# ---------------- model dimensions -------------------------------------------
B = 2            # batch
L = 8            # max_seq_len
D = 128          # embed_dim (hidden)
H = 4            # attention heads
DH = D // H      # head dim
P = 3            # polarities_dim
VOCAB = 64

_F32 = jnp.float32
_BF16 = jnp.bfloat16


# ---------------- spec helper -------------------------------------------------
def _full_spec(shape):
    """Whole-array block (gridless call)."""
    return pl.BlockSpec(shape, lambda: (0,) * len(shape))


# ---------------- in-kernel multi-head self-attention ------------------------
def _mha(qkv):
    """Multi-head self-attention (no output projection; scale pre-folded).

    qkv: (NB, L, 3*D) f32 with q|k|v packed along the last axis.
    Returns the merged (NB, L, D) context in f32.  Per-head contexts stay in
    vregs and are merged with one lane concatenate (no VMEM scratch).
    """
    q = qkv[:, :, 0:D]
    k = qkv[:, :, D:2 * D]
    v = qkv[:, :, 2 * D:3 * D]
    ctxs = []
    for h in range(H):                                  # static loop over heads
        sl = slice(h * DH, (h + 1) * DH)
        qh, kh, vh = q[:, :, sl], k[:, :, sl], v[:, :, sl]
        # scores: contract head dims directly (no explicit transpose)
        s = jax.lax.dot_general(qh, kh, (((2,), (2,)), ((0,), (0,))),
                                preferred_element_type=_F32)        # (NB, L, L)
        s = s - jnp.max(s, axis=-1, keepdims=True)
        p = jnp.exp(s)
        p = p * pl.reciprocal(jnp.sum(p, axis=-1, keepdims=True), approx=True)
        ctxs.append(jax.lax.dot_general(p, vh, (((2,), (1,)), ((0,), (0,))),
                                        preferred_element_type=_F32))
    return jnp.concatenate(ctxs, axis=-1)                           # (NB, L, D)


# ---------------- fused forward kernel ----------------------------------------
def fused_forward_kernel(ids_ref, spc_ref, lcf_ref, left_ref, right_ref,
                         emb_ref,
                         wqkv_loc_ref, bqkv_loc_ref,
                         w3h_ref, b3h_ref,
                         wpost_ref, bpost_ref,
                         wqkv_pe_ref, bqkv_pe_ref,
                         wpool_ref, bpool_ref,
                         wdense_ref, bdense_ref,
                         out_ref):
    # ---- embedding lookup fused in-kernel: one-hot @ table on the MXU -------
    ids = ids_ref[...]                                          # (B*L, 1) int32
    vocab_iota = jax.lax.broadcasted_iota(jnp.int32, (B * L, VOCAB), 1)
    onehot = jnp.where(ids == vocab_iota, 1.0, 0.0).astype(_BF16)
    g = jnp.dot(onehot, emb_ref[...], preferred_element_type=_F32)  # (16, D) f32

    # ---- mask multiplies (f32 VPU) -------------------------------------------
    mg = g * spc_ref[...]                        # masked_global_context_features
    x_lcf = g * lcf_ref[...]
    x_left = mg * left_ref[...]
    x_right = mg * right_ref[...]

    # ---- packed QKV projections for the three local-context encoders --------
    qkv_groups = []
    for gi, xg in enumerate((x_lcf, x_left, x_right)):
        qkv_g = (jnp.dot(xg.astype(_BF16), wqkv_loc_ref[gi],
                         preferred_element_type=_F32)
                 + bqkv_loc_ref[gi])                            # (16, 3D) f32
        qkv_groups.append(qkv_g.reshape(B, L, 3 * D))
    qkv = jnp.concatenate(qkv_groups, axis=0)                   # (3B, L, 3D)

    ctx = jnp.tanh(_mha(qkv))                                   # (3B, L, D) f32
    ctx3 = ctx.reshape(3, B * L, D)

    # ---- linear_window_3h over concat(lcf, left, right) ---------------------
    w3h = w3h_ref[...]                                          # (3D, D) bf16
    sent = (jnp.dot(ctx3[0].astype(_BF16), w3h[0:D],
                    preferred_element_type=_F32)
            + jnp.dot(ctx3[1].astype(_BF16), w3h[D:2 * D],
                      preferred_element_type=_F32)
            + jnp.dot(ctx3[2].astype(_BF16), w3h[2 * D:3 * D],
                      preferred_element_type=_F32)
            + b3h_ref[...])                                     # (16, D) f32

    # ---- post_linear over concat(global, sent) --------------------------------
    wpost = wpost_ref[...]                                      # (2D, D) bf16
    sent = (jnp.dot(g.astype(_BF16), wpost[0:D], preferred_element_type=_F32)
            + jnp.dot(sent.astype(_BF16), wpost[D:2 * D],
                      preferred_element_type=_F32)
            + bpost_ref[...])                                   # (16, D) f32

    # ---- post_encoder_ (dropout is identity at inference) --------------------
    qkv_pe = (jnp.dot(sent.astype(_BF16), wqkv_pe_ref[...],
                      preferred_element_type=_F32)
              + bqkv_pe_ref[...]).reshape(B, L, 3 * D)
    sent3 = jnp.tanh(_mha(qkv_pe))                              # (B, L, D) f32

    # ---- BertPooler (token 0) + padded dense head -----------------------------
    x0 = sent3[:, 0, :]                                         # (B, D)
    pooled = jnp.tanh(jnp.dot(x0.astype(_BF16), wpool_ref[...],
                              preferred_element_type=_F32) + bpool_ref[...])
    logits = (jnp.dot(pooled.astype(_BF16), wdense_ref[...],
                      preferred_element_type=_F32) + bdense_ref[...])  # (B, D)

    # single lane-dense output slab: pooled | padded logits
    out_ref[...] = jnp.concatenate([pooled, logits], axis=-1).astype(out_ref.dtype)


# ---------------- pallas_call wrapper -----------------------------------------
def fused_forward(ids, spc, lcf, left, right, p):
    in_arrays = (ids, spc, lcf, left, right,
                 p["embedding"],
                 p["wqkv_loc"], p["bqkv_loc"],
                 p["w3h"], p["b3h"],
                 p["w_post"], p["b_post"],
                 p["wqkv_pe"], p["bqkv_pe"],
                 p["w_pool"], p["b_pool"],
                 p["w_dense_pad"], p["b_dense_pad"])
    in_specs = [_full_spec(a.shape) for a in in_arrays]
    return pl.pallas_call(
        fused_forward_kernel,
        in_specs=in_specs,
        out_specs=_full_spec((B, 2 * D)),
        out_shape=jax.ShapeDtypeStruct((B, 2 * D), _F32),
        compiler_params=pltpu.CompilerParams(vmem_limit_bytes=32 * 1024 * 1024),
        cost_estimate=pl.CostEstimate(flops=10_000_000,
                                      transcendentals=12_000,
                                      bytes_accessed=700_000),
    )(*in_arrays)


# ---------------- full forward -------------------------------------------------
@jax.jit
def fast_lsa_t_forward(text_bert_indices, spc_mask_vec, lcf_vec,
                       left_lcf_vec, right_lcf_vec, params):
    # TODO(synk): real bert4global is a full BERT; a deterministic embedding
    #             lookup stands in, and runs *inside* the Pallas kernel.
    ids = text_bert_indices.astype(jnp.int32).reshape(B * L, 1)
    spc = spc_mask_vec.astype(_F32).reshape(B * L, 1)
    lcf = lcf_vec.astype(_F32).reshape(B * L, 1)
    left = left_lcf_vec.astype(_F32).reshape(B * L, 1)
    right = right_lcf_vec.astype(_F32).reshape(B * L, 1)
    out = fused_forward(ids, spc, lcf, left, right, params)
    return {"logits": out[:, D:D + P], "hidden_state": out[:, 0:D]}


# ---------------- deterministic parameter construction -------------------------
def _init_linear(key, fan_in, fan_out):
    wk, bk = jax.random.split(key)
    w = jax.random.normal(wk, (fan_in, fan_out), _F32) * 0.02
    b = jax.random.normal(bk, (1, fan_out), _F32) * 0.02
    return w, b


def _init_encoder_qkv(key):
    """Packed QKV weights (D, 3D) / (1, 3D); attention scale folded into Q."""
    kq, kk, kv = jax.random.split(key, 3)
    wq, bq = _init_linear(kq, D, D)
    wk_, bk_ = _init_linear(kk, D, D)
    wv, bv = _init_linear(kv, D, D)
    scale = 1.0 / math.sqrt(DH)
    wq = wq * scale
    bq = bq * scale
    return (jnp.concatenate([wq, wk_, wv], axis=1),
            jnp.concatenate([bq, bk_, bv], axis=1))


def make_params(key):
    ks = jax.random.split(key, 10)
    w_lcf, b_lcf = _init_encoder_qkv(ks[1])       # self.encoder
    w_left, b_left = _init_encoder_qkv(ks[2])     # self.encoder_left
    w_right, b_right = _init_encoder_qkv(ks[3])   # self.encoder_right
    wqkv_pe, bqkv_pe = _init_encoder_qkv(ks[4])   # self.post_encoder_
    w3h, b3h = _init_linear(ks[5], 3 * D, D)
    wpost, bpost = _init_linear(ks[6], 2 * D, D)
    wpool, bpool = _init_linear(ks[7], D, D)
    wdense, bdense = _init_linear(ks[8], D, P)
    # lane-dense padded dense head (P=3 -> 128 lanes), sliced back in wrapper
    wdense_pad = jnp.zeros((D, D), _F32).at[:, :P].set(wdense)
    bdense_pad = jnp.zeros((1, D), _F32).at[:, :P].set(bdense)
    return {
        # bf16 weights (HBM traffic halved); biases stay f32 (added to f32 acc)
        "embedding": (jax.random.normal(ks[0], (VOCAB, D), _F32) * 0.02).astype(_BF16),
        "wqkv_loc": jnp.stack([w_lcf, w_left, w_right], axis=0).astype(_BF16),  # (3,D,3D)
        "bqkv_loc": jnp.stack([b_lcf, b_left, b_right], axis=0),                # (3,1,3D)
        "wqkv_pe": wqkv_pe.astype(_BF16), "bqkv_pe": bqkv_pe,
        "w3h": w3h.astype(_BF16), "b3h": b3h,
        "w_post": wpost.astype(_BF16), "b_post": bpost,
        "w_pool": wpool.astype(_BF16), "b_pool": bpool,
        "w_dense_pad": wdense_pad.astype(_BF16), "b_dense_pad": bdense_pad,
    }


if __name__ == "__main__":
    root = jax.random.PRNGKey(0)
    k_params, k_ids, k_spc, k_lcf, k_left, k_right = jax.random.split(root, 6)

    params = make_params(k_params)

    text_bert_indices = jax.random.randint(k_ids, (B, L), 0, VOCAB, jnp.int32)
    spc_mask_vec = jax.random.uniform(k_spc, (B, L), _F32)
    lcf_vec = jax.random.uniform(k_lcf, (B, L), _F32)
    left_lcf_vec = jax.random.uniform(k_left, (B, L), _F32)
    right_lcf_vec = jax.random.uniform(k_right, (B, L), _F32)

    out = fast_lsa_t_forward(text_bert_indices, spc_mask_vec, lcf_vec,
                             left_lcf_vec, right_lcf_vec, params)
    jax.block_until_ready(out)

    assert out["logits"].shape == (B, P)
    assert out["hidden_state"].shape == (B, D)
    assert bool(jnp.all(jnp.isfinite(out["logits"])))
    assert bool(jnp.all(jnp.isfinite(out["hidden_state"])))
    print("KERNEL_OK")
</pallas_src>

<mosaic_0001>
module attributes {stable_mosaic.version = 11 : i64} {
  func.func @fused_forward_kernel(%arg0: memref<16x1xi32, #tpu.memory_space<vmem>>, %arg1: memref<16x1xf32, #tpu.memory_space<vmem>>, %arg2: memref<16x1xf32, #tpu.memory_space<vmem>>, %arg3: memref<16x1xf32, #tpu.memory_space<vmem>>, %arg4: memref<16x1xf32, #tpu.memory_space<vmem>>, %arg5: memref<64x128xbf16, #tpu.memory_space<vmem>>, %arg6: memref<3x128x384xbf16, #tpu.memory_space<vmem>>, %arg7: memref<3x1x384xf32, #tpu.memory_space<vmem>>, %arg8: memref<384x128xbf16, #tpu.memory_space<vmem>>, %arg9: memref<1x128xf32, #tpu.memory_space<vmem>>, %arg10: memref<256x128xbf16, #tpu.memory_space<vmem>>, %arg11: memref<1x128xf32, #tpu.memory_space<vmem>>, %arg12: memref<128x384xbf16, #tpu.memory_space<vmem>>, %arg13: memref<1x384xf32, #tpu.memory_space<vmem>>, %arg14: memref<128x128xbf16, #tpu.memory_space<vmem>>, %arg15: memref<1x128xf32, #tpu.memory_space<vmem>>, %arg16: memref<128x128xbf16, #tpu.memory_space<vmem>>, %arg17: memref<1x128xf32, #tpu.memory_space<vmem>>, %arg18: memref<2x256xf32, #tpu.memory_space<vmem>>) attributes {dimension_semantics = [], scalar_prefetch = 0 : i64, scratch_operands = 0 : i64, tpu.core_type = #tpu.core_type<tc>} {
    %c0 = arith.constant 0 : index
    %c0_0 = arith.constant 0 : index
    %0 = vector.load %arg0[%c0, %c0_0] : memref<16x1xi32, #tpu.memory_space<vmem>>, vector<16x1xi32>
    %1 = tpu.iota {dimensions = array<i32: 1>} : vector<16x64xi32>
    %2 = vector.broadcast %0 : vector<16x1xi32> to vector<16x64xi32>
    %3 = arith.cmpi eq, %2, %1 : vector<16x64xi32>
    %cst = arith.constant 1.000000e+00 : f32
    %cst_1 = arith.constant 0.000000e+00 : f32
    %4 = vector.broadcast %cst : f32 to vector<16x64xf32>
    %5 = vector.broadcast %cst_1 : f32 to vector<16x64xf32>
    %6 = arith.select %3, %4, %5 : vector<16x64xi1>, vector<16x64xf32>
    %7 = arith.truncf %6 : vector<16x64xf32> to vector<16x64xbf16>
    %c0_2 = arith.constant 0 : index
    %c0_3 = arith.constant 0 : index
    %8 = vector.load %arg5[%c0_2, %c0_3] : memref<64x128xbf16, #tpu.memory_space<vmem>>, vector<64x128xbf16>
    %cst_4 = arith.constant dense<0.000000e+00> : vector<16x128xf32>
    %9 = tpu.matmul %7, %8, %cst_4 {dimension_numbers = #tpu.dot_dimension_numbers<[1], [0], [0], [1], [0, 0, 1, 1], [], []>} : vector<16x64xbf16>, vector<64x128xbf16>, vector<16x128xf32> -> vector<16x128xf32>
    %c0_5 = arith.constant 0 : index
    %c0_6 = arith.constant 0 : index
    %10 = vector.load %arg1[%c0_5, %c0_6] : memref<16x1xf32, #tpu.memory_space<vmem>>, vector<16x1xf32>
    %11 = vector.broadcast %10 : vector<16x1xf32> to vector<16x128xf32>
    %12 = arith.mulf %9, %11 : vector<16x128xf32>
    %c0_7 = arith.constant 0 : index
    %c0_8 = arith.constant 0 : index
    %13 = vector.load %arg2[%c0_7, %c0_8] : memref<16x1xf32, #tpu.memory_space<vmem>>, vector<16x1xf32>
    %14 = vector.broadcast %13 : vector<16x1xf32> to vector<16x128xf32>
    %15 = arith.mulf %9, %14 : vector<16x128xf32>
    %c0_9 = arith.constant 0 : index
    %c0_10 = arith.constant 0 : index
    %16 = vector.load %arg3[%c0_9, %c0_10] : memref<16x1xf32, #tpu.memory_space<vmem>>, vector<16x1xf32>
    %17 = vector.broadcast %16 : vector<16x1xf32> to vector<16x128xf32>
    %18 = arith.mulf %12, %17 : vector<16x128xf32>
    %c0_11 = arith.constant 0 : index
    %c0_12 = arith.constant 0 : index
    %19 = vector.load %arg4[%c0_11, %c0_12] : memref<16x1xf32, #tpu.memory_space<vmem>>, vector<16x1xf32>
    %20 = vector.broadcast %19 : vector<16x1xf32> to vector<16x128xf32>
    %21 = arith.mulf %12, %20 : vector<16x128xf32>
    %22 = arith.truncf %15 : vector<16x128xf32> to vector<16x128xbf16>
    %c0_13 = arith.constant 0 : index
    %c0_14 = arith.constant 0 : index
    %c0_15 = arith.constant 0 : index
    %23 = vector.load %arg6[%c0_13, %c0_14, %c0_15] : memref<3x128x384xbf16, #tpu.memory_space<vmem>>, vector<1x128x384xbf16>
    %24 = vector.shape_cast %23 : vector<1x128x384xbf16> to vector<128x384xbf16>
    %cst_16 = arith.constant dense<0.000000e+00> : vector<16x384xf32>
    %25 = tpu.matmul %22, %24, %cst_16 {dimension_numbers = #tpu.dot_dimension_numbers<[1], [0], [0], [1], [0, 0, 1, 1], [], []>} : vector<16x128xbf16>, vector<128x384xbf16>, vector<16x384xf32> -> vector<16x384xf32>
    %c0_17 = arith.constant 0 : index
    %c0_18 = arith.constant 0 : index
    %c0_19 = arith.constant 0 : index
    %26 = vector.load %arg7[%c0_17, %c0_18, %c0_19] : memref<3x1x384xf32, #tpu.memory_space<vmem>>, vector<1x1x384xf32>
    %27 = vector.shape_cast %26 : vector<1x1x384xf32> to vector<1x384xf32>
    %28 = vector.broadcast %27 : vector<1x384xf32> to vector<16x384xf32>
    %29 = arith.addf %25, %28 : vector<16x384xf32>
    %30 = vector.shape_cast %29 : vector<16x384xf32> to vector<2x8x384xf32>
    %31 = arith.truncf %18 : vector<16x128xf32> to vector<16x128xbf16>
    %c1 = arith.constant 1 : index
    %c0_20 = arith.constant 0 : index
    %c0_21 = arith.constant 0 : index
    %32 = vector.load %arg6[%c1, %c0_20, %c0_21] : memref<3x128x384xbf16, #tpu.memory_space<vmem>>, vector<1x128x384xbf16>
    %33 = vector.shape_cast %32 : vector<1x128x384xbf16> to vector<128x384xbf16>
    %cst_22 = arith.constant dense<0.000000e+00> : vector<16x384xf32>
    %34 = tpu.matmul %31, %33, %cst_22 {dimension_numbers = #tpu.dot_dimension_numbers<[1], [0], [0], [1], [0, 0, 1, 1], [], []>} : vector<16x128xbf16>, vector<128x384xbf16>, vector<16x384xf32> -> vector<16x384xf32>
    %c1_23 = arith.constant 1 : index
    %c0_24 = arith.constant 0 : index
    %c0_25 = arith.constant 0 : index
    %35 = vector.load %arg7[%c1_23, %c0_24, %c0_25] : memref<3x1x384xf32, #tpu.memory_space<vmem>>, vector<1x1x384xf32>
    %36 = vector.shape_cast %35 : vector<1x1x384xf32> to vector<1x384xf32>
    %37 = vector.broadcast %36 : vector<1x384xf32> to vector<16x384xf32>
    %38 = arith.addf %34, %37 : vector<16x384xf32>
    %39 = vector.shape_cast %38 : vector<16x384xf32> to vector<2x8x384xf32>
    %40 = arith.truncf %21 : vector<16x128xf32> to vector<16x128xbf16>
    %c2 = arith.constant 2 : index
    %c0_26 = arith.constant 0 : index
    %c0_27 = arith.constant 0 : index
    %41 = vector.load %arg6[%c2, %c0_26, %c0_27] : memref<3x128x384xbf16, #tpu.memory_space<vmem>>, vector<1x128x384xbf16>
    %42 = vector.shape_cast %41 : vector<1x128x384xbf16> to vector<128x384xbf16>
    %cst_28 = arith.constant dense<0.000000e+00> : vector<16x384xf32>
    %43 = tpu.matmul %40, %42, %cst_28 {dimension_numbers = #tpu.dot_dimension_numbers<[1], [0], [0], [1], [0, 0, 1, 1], [], []>} : vector<16x128xbf16>, vector<128x384xbf16>, vector<16x384xf32> -> vector<16x384xf32>
    %c2_29 = arith.constant 2 : index
    %c0_30 = arith.constant 0 : index
    %c0_31 = arith.constant 0 : index
    %44 = vector.load %arg7[%c2_29, %c0_30, %c0_31] : memref<3x1x384xf32, #tpu.memory_space<vmem>>, vector<1x1x384xf32>
    %45 = vector.shape_cast %44 : vector<1x1x384xf32> to vector<1x384xf32>
    %46 = vector.broadcast %45 : vector<1x384xf32> to vector<16x384xf32>
    %47 = arith.addf %43, %46 : vector<16x384xf32>
    %48 = vector.shape_cast %47 : vector<16x384xf32> to vector<2x8x384xf32>
    %49 = tpu.concatenate %30, %39, %48 in 0 : vector<2x8x384xf32>, vector<2x8x384xf32>, vector<2x8x384xf32> -> vector<6x8x384xf32>
    %50 = vector.extract_strided_slice %49 {offsets = [0, 0, 0], sizes = [6, 8, 128], strides = [1, 1, 1]} : vector<6x8x384xf32> to vector<6x8x128xf32>
    %51 = vector.extract_strided_slice %49 {offsets = [0, 0, 128], sizes = [6, 8, 128], strides = [1, 1, 1]} : vector<6x8x384xf32> to vector<6x8x128xf32>
    %52 = vector.extract_strided_slice %49 {offsets = [0, 0, 256], sizes = [6, 8, 128], strides = [1, 1, 1]} : vector<6x8x384xf32> to vector<6x8x128xf32>
    %53 = vector.extract_strided_slice %50 {offsets = [0, 0, 0], sizes = [6, 8, 32], strides = [1, 1, 1]} : vector<6x8x128xf32> to vector<6x8x32xf32>
    %54 = vector.extract_strided_slice %51 {offsets = [0, 0, 0], sizes = [6, 8, 32], strides = [1, 1, 1]} : vector<6x8x128xf32> to vector<6x8x32xf32>
    %55 = vector.extract_strided_slice %52 {offsets = [0, 0, 0], sizes = [6, 8, 32], strides = [1, 1, 1]} : vector<6x8x128xf32> to vector<6x8x32xf32>
    %cst_32 = arith.constant dense<0.000000e+00> : vector<6x8x8xf32>
    %56 = tpu.matmul %53, %54, %cst_32 {dimension_numbers = #tpu.dot_dimension_numbers<[2], [2], [1], [1], [0, 0, 0, 1, 1, 1], [0], [0]>} : vector<6x8x32xf32>, vector<6x8x32xf32>, vector<6x8x8xf32> -> vector<6x8x8xf32>
    %cst_33 = arith.constant dense<0xFF800000> : vector<6x8xf32>
    %57 = vector.multi_reduction <maximumf>, %56, %cst_33 [2] : vector<6x8x8xf32> to vector<6x8xf32>
    %58 = vector.shape_cast %57 : vector<6x8xf32> to vector<6x8x1xf32>
    %59 = vector.broadcast %58 : vector<6x8x1xf32> to vector<6x8x8xf32>
    %60 = arith.subf %56, %59 : vector<6x8x8xf32>
    %61 = math.exp %60 : vector<6x8x8xf32>
    %cst_34 = arith.constant dense<0.000000e+00> : vector<6x8xf32>
    %62 = vector.multi_reduction <add>, %61, %cst_34 [2] : vector<6x8x8xf32> to vector<6x8xf32>
    %63 = vector.shape_cast %62 : vector<6x8xf32> to vector<6x8x1xf32>
    %64 = tpu.reciprocal %63 {approx = true} : vector<6x8x1xf32> -> vector<6x8x1xf32>
    %65 = vector.broadcast %64 : vector<6x8x1xf32> to vector<6x8x8xf32>
    %66 = arith.mulf %61, %65 : vector<6x8x8xf32>
    %cst_35 = arith.constant dense<0.000000e+00> : vector<6x8x32xf32>
    %67 = tpu.matmul %66, %55, %cst_35 {dimension_numbers = #tpu.dot_dimension_numbers<[2], [1], [1], [2], [0, 0, 0, 1, 1, 2], [0], [0]>} : vector<6x8x8xf32>, vector<6x8x32xf32>, vector<6x8x32xf32> -> vector<6x8x32xf32>
    %68 = vector.extract_strided_slice %50 {offsets = [0, 0, 32], sizes = [6, 8, 32], strides = [1, 1, 1]} : vector<6x8x128xf32> to vector<6x8x32xf32>
    %69 = vector.extract_strided_slice %51 {offsets = [0, 0, 32], sizes = [6, 8, 32], strides = [1, 1, 1]} : vector<6x8x128xf32> to vector<6x8x32xf32>
    %70 = vector.extract_strided_slice %52 {offsets = [0, 0, 32], sizes = [6, 8, 32], strides = [1, 1, 1]} : vector<6x8x128xf32> to vector<6x8x32xf32>
    %cst_36 = arith.constant dense<0.000000e+00> : vector<6x8x8xf32>
    %71 = tpu.matmul %68, %69, %cst_36 {dimension_numbers = #tpu.dot_dimension_numbers<[2], [2], [1], [1], [0, 0, 0, 1, 1, 1], [0], [0]>} : vector<6x8x32xf32>, vector<6x8x32xf32>, vector<6x8x8xf32> -> vector<6x8x8xf32>
    %cst_37 = arith.constant dense<0xFF800000> : vector<6x8xf32>
    %72 = vector.multi_reduction <maximumf>, %71, %cst_37 [2] : vector<6x8x8xf32> to vector<6x8xf32>
    %73 = vector.shape_cast %72 : vector<6x8xf32> to vector<6x8x1xf32>
    %74 = vector.broadcast %73 : vector<6x8x1xf32> to vector<6x8x8xf32>
    %75 = arith.subf %71, %74 : vector<6x8x8xf32>
    %76 = math.exp %75 : vector<6x8x8xf32>
    %cst_38 = arith.constant dense<0.000000e+00> : vector<6x8xf32>
    %77 = vector.multi_reduction <add>, %76, %cst_38 [2] : vector<6x8x8xf32> to vector<6x8xf32>
    %78 = vector.shape_cast %77 : vector<6x8xf32> to vector<6x8x1xf32>
    %79 = tpu.reciprocal %78 {approx = true} : vector<6x8x1xf32> -> vector<6x8x1xf32>
    %80 = vector.broadcast %79 : vector<6x8x1xf32> to vector<6x8x8xf32>
    %81 = arith.mulf %76, %80 : vector<6x8x8xf32>
    %cst_39 = arith.constant dense<0.000000e+00> : vector<6x8x32xf32>
    %82 = tpu.matmul %81, %70, %cst_39 {dimension_numbers = #tpu.dot_dimension_numbers<[2], [1], [1], [2], [0, 0, 0, 1, 1, 2], [0], [0]>} : vector<6x8x8xf32>, vector<6x8x32xf32>, vector<6x8x32xf32> -> vector<6x8x32xf32>
    %83 = vector.extract_strided_slice %50 {offsets = [0, 0, 64], sizes = [6, 8, 32], strides = [1, 1, 1]} : vector<6x8x128xf32> to vector<6x8x32xf32>
    %84 = vector.extract_strided_slice %51 {offsets = [0, 0, 64], sizes = [6, 8, 32], strides = [1, 1, 1]} : vector<6x8x128xf32> to vector<6x8x32xf32>
    %85 = vector.extract_strided_slice %52 {offsets = [0, 0, 64], sizes = [6, 8, 32], strides = [1, 1, 1]} : vector<6x8x128xf32> to vector<6x8x32xf32>
    %cst_40 = arith.constant dense<0.000000e+00> : vector<6x8x8xf32>
    %86 = tpu.matmul %83, %84, %cst_40 {dimension_numbers = #tpu.dot_dimension_numbers<[2], [2], [1], [1], [0, 0, 0, 1, 1, 1], [0], [0]>} : vector<6x8x32xf32>, vector<6x8x32xf32>, vector<6x8x8xf32> -> vector<6x8x8xf32>
    %cst_41 = arith.constant dense<0xFF800000> : vector<6x8xf32>
    %87 = vector.multi_reduction <maximumf>, %86, %cst_41 [2] : vector<6x8x8xf32> to vector<6x8xf32>
    %88 = vector.shape_cast %87 : vector<6x8xf32> to vector<6x8x1xf32>
    %89 = vector.broadcast %88 : vector<6x8x1xf32> to vector<6x8x8xf32>
    %90 = arith.subf %86, %89 : vector<6x8x8xf32>
    %91 = math.exp %90 : vector<6x8x8xf32>
    %cst_42 = arith.constant dense<0.000000e+00> : vector<6x8xf32>
    %92 = vector.multi_reduction <add>, %91, %cst_42 [2] : vector<6x8x8xf32> to vector<6x8xf32>
    %93 = vector.shape_cast %92 : vector<6x8xf32> to vector<6x8x1xf32>
    %94 = tpu.reciprocal %93 {approx = true} : vector<6x8x1xf32> -> vector<6x8x1xf32>
    %95 = vector.broadcast %94 : vector<6x8x1xf32> to vector<6x8x8xf32>
    %96 = arith.mulf %91, %95 : vector<6x8x8xf32>
    %cst_43 = arith.constant dense<0.000000e+00> : vector<6x8x32xf32>
    %97 = tpu.matmul %96, %85, %cst_43 {dimension_numbers = #tpu.dot_dimension_numbers<[2], [1], [1], [2], [0, 0, 0, 1, 1, 2], [0], [0]>} : vector<6x8x8xf32>, vector<6x8x32xf32>, vector<6x8x32xf32> -> vector<6x8x32xf32>
    %98 = vector.extract_strided_slice %50 {offsets = [0, 0, 96], sizes = [6, 8, 32], strides = [1, 1, 1]} : vector<6x8x128xf32> to vector<6x8x32xf32>
    %99 = vector.extract_strided_slice %51 {offsets = [0, 0, 96], sizes = [6, 8, 32], strides = [1, 1, 1]} : vector<6x8x128xf32> to vector<6x8x32xf32>
    %100 = vector.extract_strided_slice %52 {offsets = [0, 0, 96], sizes = [6, 8, 32], strides = [1, 1, 1]} : vector<6x8x128xf32> to vector<6x8x32xf32>
    %cst_44 = arith.constant dense<0.000000e+00> : vector<6x8x8xf32>
    %101 = tpu.matmul %98, %99, %cst_44 {dimension_numbers = #tpu.dot_dimension_numbers<[2], [2], [1], [1], [0, 0, 0, 1, 1, 1], [0], [0]>} : vector<6x8x32xf32>, vector<6x8x32xf32>, vector<6x8x8xf32> -> vector<6x8x8xf32>
    %cst_45 = arith.constant dense<0xFF800000> : vector<6x8xf32>
    %102 = vector.multi_reduction <maximumf>, %101, %cst_45 [2] : vector<6x8x8xf32> to vector<6x8xf32>
    %103 = vector.shape_cast %102 : vector<6x8xf32> to vector<6x8x1xf32>
    %104 = vector.broadcast %103 : vector<6x8x1xf32> to vector<6x8x8xf32>
    %105 = arith.subf %101, %104 : vector<6x8x8xf32>
    %106 = math.exp %105 : vector<6x8x8xf32>
    %cst_46 = arith.constant dense<0.000000e+00> : vector<6x8xf32>
    %107 = vector.multi_reduction <add>, %106, %cst_46 [2] : vector<6x8x8xf32> to vector<6x8xf32>
    %108 = vector.shape_cast %107 : vector<6x8xf32> to vector<6x8x1xf32>
    %109 = tpu.reciprocal %108 {approx = true} : vector<6x8x1xf32> -> vector<6x8x1xf32>
    %110 = vector.broadcast %109 : vector<6x8x1xf32> to vector<6x8x8xf32>
    %111 = arith.mulf %106, %110 : vector<6x8x8xf32>
    %cst_47 = arith.constant dense<0.000000e+00> : vector<6x8x32xf32>
    %112 = tpu.matmul %111, %100, %cst_47 {dimension_numbers = #tpu.dot_dimension_numbers<[2], [1], [1], [2], [0, 0, 0, 1, 1, 2], [0], [0]>} : vector<6x8x8xf32>, vector<6x8x32xf32>, vector<6x8x32xf32> -> vector<6x8x32xf32>
    %113 = tpu.concatenate %67, %82, %97, %112 in 2 : vector<6x8x32xf32>, vector<6x8x32xf32>, vector<6x8x32xf32>, vector<6x8x32xf32> -> vector<6x8x128xf32>
    %114 = math.tanh %113 : vector<6x8x128xf32>
    %115 = vector.shape_cast %114 : vector<6x8x128xf32> to vector<3x16x128xf32>
    %c0_48 = arith.constant 0 : index
    %c0_49 = arith.constant 0 : index
    %116 = vector.load %arg8[%c0_48, %c0_49] : memref<384x128xbf16, #tpu.memory_space<vmem>>, vector<384x128xbf16>
    %117 = vector.extract_strided_slice %115 {offsets = [0, 0, 0], sizes = [1, 16, 128], strides = [1, 1, 1]} : vector<3x16x128xf32> to vector<1x16x128xf32>
    %118 = vector.shape_cast %117 : vector<1x16x128xf32> to vector<16x128xf32>
    %119 = arith.truncf %118 : vector<16x128xf32> to vector<16x128xbf16>
    %120 = vector.extract_strided_slice %116 {offsets = [0, 0], sizes = [128, 128], strides = [1, 1]} : vector<384x128xbf16> to vector<128x128xbf16>
    %cst_50 = arith.constant dense<0.000000e+00> : vector<16x128xf32>
    %121 = tpu.matmul %119, %120, %cst_50 {dimension_numbers = #tpu.dot_dimension_numbers<[1], [0], [0], [1], [0, 0, 1, 1], [], []>} : vector<16x128xbf16>, vector<128x128xbf16>, vector<16x128xf32> -> vector<16x128xf32>
    %122 = vector.extract_strided_slice %115 {offsets = [1, 0, 0], sizes = [1, 16, 128], strides = [1, 1, 1]} : vector<3x16x128xf32> to vector<1x16x128xf32>
    %123 = vector.shape_cast %122 : vector<1x16x128xf32> to vector<16x128xf32>
    %124 = arith.truncf %123 : vector<16x128xf32> to vector<16x128xbf16>
    %125 = vector.extract_strided_slice %116 {offsets = [128, 0], sizes = [128, 128], strides = [1, 1]} : vector<384x128xbf16> to vector<128x128xbf16>
    %cst_51 = arith.constant dense<0.000000e+00> : vector<16x128xf32>
    %126 = tpu.matmul %124, %125, %cst_51 {dimension_numbers = #tpu.dot_dimension_numbers<[1], [0], [0], [1], [0, 0, 1, 1], [], []>} : vector<16x128xbf16>, vector<128x128xbf16>, vector<16x128xf32> -> vector<16x128xf32>
    %127 = arith.addf %121, %126 : vector<16x128xf32>
    %128 = vector.extract_strided_slice %115 {offsets = [2, 0, 0], sizes = [1, 16, 128], strides = [1, 1, 1]} : vector<3x16x128xf32> to vector<1x16x128xf32>
    %129 = vector.shape_cast %128 : vector<1x16x128xf32> to vector<16x128xf32>
    %130 = arith.truncf %129 : vector<16x128xf32> to vector<16x128xbf16>
    %131 = vector.extract_strided_slice %116 {offsets = [256, 0], sizes = [128, 128], strides = [1, 1]} : vector<384x128xbf16> to vector<128x128xbf16>
    %cst_52 = arith.constant dense<0.000000e+00> : vector<16x128xf32>
    %132 = tpu.matmul %130, %131, %cst_52 {dimension_numbers = #tpu.dot_dimension_numbers<[1], [0], [0], [1], [0, 0, 1, 1], [], []>} : vector<16x128xbf16>, vector<128x128xbf16>, vector<16x128xf32> -> vector<16x128xf32>
    %133 = arith.addf %127, %132 : vector<16x128xf32>
    %c0_53 = arith.constant 0 : index
    %c0_54 = arith.constant 0 : index
    %134 = vector.load %arg9[%c0_53, %c0_54] : memref<1x128xf32, #tpu.memory_space<vmem>>, vector<1x128xf32>
    %135 = vector.broadcast %134 : vector<1x128xf32> to vector<16x128xf32>
    %136 = arith.addf %133, %135 : vector<16x128xf32>
    %c0_55 = arith.constant 0 : index
    %c0_56 = arith.constant 0 : index
    %137 = vector.load %arg10[%c0_55, %c0_56] : memref<256x128xbf16, #tpu.memory_space<vmem>>, vector<256x128xbf16>
    %138 = arith.truncf %9 : vector<16x128xf32> to vector<16x128xbf16>
    %139 = vector.extract_strided_slice %137 {offsets = [0, 0], sizes = [128, 128], strides = [1, 1]} : vector<256x128xbf16> to vector<128x128xbf16>
    %cst_57 = arith.constant dense<0.000000e+00> : vector<16x128xf32>
    %140 = tpu.matmul %138, %139, %cst_57 {dimension_numbers = #tpu.dot_dimension_numbers<[1], [0], [0], [1], [0, 0, 1, 1], [], []>} : vector<16x128xbf16>, vector<128x128xbf16>, vector<16x128xf32> -> vector<16x128xf32>
    %141 = arith.truncf %136 : vector<16x128xf32> to vector<16x128xbf16>
    %142 = vector.extract_strided_slice %137 {offsets = [128, 0], sizes = [128, 128], strides = [1, 1]} : vector<256x128xbf16> to vector<128x128xbf16>
    %cst_58 = arith.constant dense<0.000000e+00> : vector<16x128xf32>
    %143 = tpu.matmul %141, %142, %cst_58 {dimension_numbers = #tpu.dot_dimension_numbers<[1], [0], [0], [1], [0, 0, 1, 1], [], []>} : vector<16x128xbf16>, vector<128x128xbf16>, vector<16x128xf32> -> vector<16x128xf32>
    %144 = arith.addf %140, %143 : vector<16x128xf32>
    %c0_59 = arith.constant 0 : index
    %c0_60 = arith.constant 0 : index
    %145 = vector.load %arg11[%c0_59, %c0_60] : memref<1x128xf32, #tpu.memory_space<vmem>>, vector<1x128xf32>
    %146 = vector.broadcast %145 : vector<1x128xf32> to vector<16x128xf32>
    %147 = arith.addf %144, %146 : vector<16x128xf32>
    %148 = arith.truncf %147 : vector<16x128xf32> to vector<16x128xbf16>
    %c0_61 = arith.constant 0 : index
    %c0_62 = arith.constant 0 : index
    %149 = vector.load %arg12[%c0_61, %c0_62] : memref<128x384xbf16, #tpu.memory_space<vmem>>, vector<128x384xbf16>
    %cst_63 = arith.constant dense<0.000000e+00> : vector<16x384xf32>
    %150 = tpu.matmul %148, %149, %cst_63 {dimension_numbers = #tpu.dot_dimension_numbers<[1], [0], [0], [1], [0, 0, 1, 1], [], []>} : vector<16x128xbf16>, vector<128x384xbf16>, vector<16x384xf32> -> vector<16x384xf32>
    %c0_64 = arith.constant 0 : index
    %c0_65 = arith.constant 0 : index
    %151 = vector.load %arg13[%c0_64, %c0_65] : memref<1x384xf32, #tpu.memory_space<vmem>>, vector<1x384xf32>
    %152 = vector.broadcast %151 : vector<1x384xf32> to vector<16x384xf32>
    %153 = arith.addf %150, %152 : vector<16x384xf32>
    %154 = vector.shape_cast %153 : vector<16x384xf32> to vector<2x8x384xf32>
    %155 = vector.extract_strided_slice %154 {offsets = [0, 0, 0], sizes = [2, 8, 128], strides = [1, 1, 1]} : vector<2x8x384xf32> to vector<2x8x128xf32>
    %156 = vector.extract_strided_slice %154 {offsets = [0, 0, 128], sizes = [2, 8, 128], strides = [1, 1, 1]} : vector<2x8x384xf32> to vector<2x8x128xf32>
    %157 = vector.extract_strided_slice %154 {offsets = [0, 0, 256], sizes = [2, 8, 128], strides = [1, 1, 1]} : vector<2x8x384xf32> to vector<2x8x128xf32>
    %158 = vector.extract_strided_slice %155 {offsets = [0, 0, 0], sizes = [2, 8, 32], strides = [1, 1, 1]} : vector<2x8x128xf32> to vector<2x8x32xf32>
    %159 = vector.extract_strided_slice %156 {offsets = [0, 0, 0], sizes = [2, 8, 32], strides = [1, 1, 1]} : vector<2x8x128xf32> to vector<2x8x32xf32>
    %160 = vector.extract_strided_slice %157 {offsets = [0, 0, 0], sizes = [2, 8, 32], strides = [1, 1, 1]} : vector<2x8x128xf32> to vector<2x8x32xf32>
    %cst_66 = arith.constant dense<0.000000e+00> : vector<2x8x8xf32>
    %161 = tpu.matmul %158, %159, %cst_66 {dimension_numbers = #tpu.dot_dimension_numbers<[2], [2], [1], [1], [0, 0, 0, 1, 1, 1], [0], [0]>} : vector<2x8x32xf32>, vector<2x8x32xf32>, vector<2x8x8xf32> -> vector<2x8x8xf32>
    %cst_67 = arith.constant dense<0xFF800000> : vector<2x8xf32>
    %162 = vector.multi_reduction <maximumf>, %161, %cst_67 [2] : vector<2x8x8xf32> to vector<2x8xf32>
    %163 = vector.shape_cast %162 : vector<2x8xf32> to vector<2x8x1xf32>
    %164 = vector.broadcast %163 : vector<2x8x1xf32> to vector<2x8x8xf32>
    %165 = arith.subf %161, %164 : vector<2x8x8xf32>
    %166 = math.exp %165 : vector<2x8x8xf32>
    %cst_68 = arith.constant dense<0.000000e+00> : vector<2x8xf32>
    %167 = vector.multi_reduction <add>, %166, %cst_68 [2] : vector<2x8x8xf32> to vector<2x8xf32>
    %168 = vector.shape_cast %167 : vector<2x8xf32> to vector<2x8x1xf32>
    %169 = tpu.reciprocal %168 {approx = true} : vector<2x8x1xf32> -> vector<2x8x1xf32>
    %170 = vector.broadcast %169 : vector<2x8x1xf32> to vector<2x8x8xf32>
    %171 = arith.mulf %166, %170 : vector<2x8x8xf32>
    %cst_69 = arith.constant dense<0.000000e+00> : vector<2x8x32xf32>
    %172 = tpu.matmul %171, %160, %cst_69 {dimension_numbers = #tpu.dot_dimension_numbers<[2], [1], [1], [2], [0, 0, 0, 1, 1, 2], [0], [0]>} : vector<2x8x8xf32>, vector<2x8x32xf32>, vector<2x8x32xf32> -> vector<2x8x32xf32>
    %173 = vector.extract_strided_slice %155 {offsets = [0, 0, 32], sizes = [2, 8, 32], strides = [1, 1, 1]} : vector<2x8x128xf32> to vector<2x8x32xf32>
    %174 = vector.extract_strided_slice %156 {offsets = [0, 0, 32], sizes = [2, 8, 32], strides = [1, 1, 1]} : vector<2x8x128xf32> to vector<2x8x32xf32>
    %175 = vector.extract_strided_slice %157 {offsets = [0, 0, 32], sizes = [2, 8, 32], strides = [1, 1, 1]} : vector<2x8x128xf32> to vector<2x8x32xf32>
    %cst_70 = arith.constant dense<0.000000e+00> : vector<2x8x8xf32>
    %176 = tpu.matmul %173, %174, %cst_70 {dimension_numbers = #tpu.dot_dimension_numbers<[2], [2], [1], [1], [0, 0, 0, 1, 1, 1], [0], [0]>} : vector<2x8x32xf32>, vector<2x8x32xf32>, vector<2x8x8xf32> -> vector<2x8x8xf32>
    %cst_71 = arith.constant dense<0xFF800000> : vector<2x8xf32>
    %177 = vector.multi_reduction <maximumf>, %176, %cst_71 [2] : vector<2x8x8xf32> to vector<2x8xf32>
    %178 = vector.shape_cast %177 : vector<2x8xf32> to vector<2x8x1xf32>
    %179 = vector.broadcast %178 : vector<2x8x1xf32> to vector<2x8x8xf32>
    %180 = arith.subf %176, %179 : vector<2x8x8xf32>
    %181 = math.exp %180 : vector<2x8x8xf32>
    %cst_72 = arith.constant dense<0.000000e+00> : vector<2x8xf32>
    %182 = vector.multi_reduction <add>, %181, %cst_72 [2] : vector<2x8x8xf32> to vector<2x8xf32>
    %183 = vector.shape_cast %182 : vector<2x8xf32> to vector<2x8x1xf32>
    %184 = tpu.reciprocal %183 {approx = true} : vector<2x8x1xf32> -> vector<2x8x1xf32>
    %185 = vector.broadcast %184 : vector<2x8x1xf32> to vector<2x8x8xf32>
    %186 = arith.mulf %181, %185 : vector<2x8x8xf32>
    %cst_73 = arith.constant dense<0.000000e+00> : vector<2x8x32xf32>
    %187 = tpu.matmul %186, %175, %cst_73 {dimension_numbers = #tpu.dot_dimension_numbers<[2], [1], [1], [2], [0, 0, 0, 1, 1, 2], [0], [0]>} : vector<2x8x8xf32>, vector<2x8x32xf32>, vector<2x8x32xf32> -> vector<2x8x32xf32>
    %188 = vector.extract_strided_slice %155 {offsets = [0, 0, 64], sizes = [2, 8, 32], strides = [1, 1, 1]} : vector<2x8x128xf32> to vector<2x8x32xf32>
    %189 = vector.extract_strided_slice %156 {offsets = [0, 0, 64], sizes = [2, 8, 32], strides = [1, 1, 1]} : vector<2x8x128xf32> to vector<2x8x32xf32>
    %190 = vector.extract_strided_slice %157 {offsets = [0, 0, 64], sizes = [2, 8, 32], strides = [1, 1, 1]} : vector<2x8x128xf32> to vector<2x8x32xf32>
    %cst_74 = arith.constant dense<0.000000e+00> : vector<2x8x8xf32>
    %191 = tpu.matmul %188, %189, %cst_74 {dimension_numbers = #tpu.dot_dimension_numbers<[2], [2], [1], [1], [0, 0, 0, 1, 1, 1], [0], [0]>} : vector<2x8x32xf32>, vector<2x8x32xf32>, vector<2x8x8xf32> -> vector<2x8x8xf32>
    %cst_75 = arith.constant dense<0xFF800000> : vector<2x8xf32>
    %192 = vector.multi_reduction <maximumf>, %191, %cst_75 [2] : vector<2x8x8xf32> to vector<2x8xf32>
    %193 = vector.shape_cast %192 : vector<2x8xf32> to vector<2x8x1xf32>
    %194 = vector.broadcast %193 : vector<2x8x1xf32> to vector<2x8x8xf32>
    %195 = arith.subf %191, %194 : vector<2x8x8xf32>
    %196 = math.exp %195 : vector<2x8x8xf32>
    %cst_76 = arith.constant dense<0.000000e+00> : vector<2x8xf32>
    %197 = vector.multi_reduction <add>, %196, %cst_76 [2] : vector<2x8x8xf32> to vector<2x8xf32>
    %198 = vector.shape_cast %197 : vector<2x8xf32> to vector<2x8x1xf32>
    %199 = tpu.reciprocal %198 {approx = true} : vector<2x8x1xf32> -> vector<2x8x1xf32>
    %200 = vector.broadcast %199 : vector<2x8x1xf32> to vector<2x8x8xf32>
    %201 = arith.mulf %196, %200 : vector<2x8x8xf32>
    %cst_77 = arith.constant dense<0.000000e+00> : vector<2x8x32xf32>
    %202 = tpu.matmul %201, %190, %cst_77 {dimension_numbers = #tpu.dot_dimension_numbers<[2], [1], [1], [2], [0, 0, 0, 1, 1, 2], [0], [0]>} : vector<2x8x8xf32>, vector<2x8x32xf32>, vector<2x8x32xf32> -> vector<2x8x32xf32>
    %203 = vector.extract_strided_slice %155 {offsets = [0, 0, 96], sizes = [2, 8, 32], strides = [1, 1, 1]} : vector<2x8x128xf32> to vector<2x8x32xf32>
    %204 = vector.extract_strided_slice %156 {offsets = [0, 0, 96], sizes = [2, 8, 32], strides = [1, 1, 1]} : vector<2x8x128xf32> to vector<2x8x32xf32>
    %205 = vector.extract_strided_slice %157 {offsets = [0, 0, 96], sizes = [2, 8, 32], strides = [1, 1, 1]} : vector<2x8x128xf32> to vector<2x8x32xf32>
    %cst_78 = arith.constant dense<0.000000e+00> : vector<2x8x8xf32>
    %206 = tpu.matmul %203, %204, %cst_78 {dimension_numbers = #tpu.dot_dimension_numbers<[2], [2], [1], [1], [0, 0, 0, 1, 1, 1], [0], [0]>} : vector<2x8x32xf32>, vector<2x8x32xf32>, vector<2x8x8xf32> -> vector<2x8x8xf32>
    %cst_79 = arith.constant dense<0xFF800000> : vector<2x8xf32>
    %207 = vector.multi_reduction <maximumf>, %206, %cst_79 [2] : vector<2x8x8xf32> to vector<2x8xf32>
    %208 = vector.shape_cast %207 : vector<2x8xf32> to vector<2x8x1xf32>
    %209 = vector.broadcast %208 : vector<2x8x1xf32> to vector<2x8x8xf32>
    %210 = arith.subf %206, %209 : vector<2x8x8xf32>
    %211 = math.exp %210 : vector<2x8x8xf32>
    %cst_80 = arith.constant dense<0.000000e+00> : vector<2x8xf32>
    %212 = vector.multi_reduction <add>, %211, %cst_80 [2] : vector<2x8x8xf32> to vector<2x8xf32>
    %213 = vector.shape_cast %212 : vector<2x8xf32> to vector<2x8x1xf32>
    %214 = tpu.reciprocal %213 {approx = true} : vector<2x8x1xf32> -> vector<2x8x1xf32>
    %215 = vector.broadcast %214 : vector<2x8x1xf32> to vector<2x8x8xf32>
    %216 = arith.mulf %211, %215 : vector<2x8x8xf32>
    %cst_81 = arith.constant dense<0.000000e+00> : vector<2x8x32xf32>
    %217 = tpu.matmul %216, %205, %cst_81 {dimension_numbers = #tpu.dot_dimension_numbers<[2], [1], [1], [2], [0, 0, 0, 1, 1, 2], [0], [0]>} : vector<2x8x8xf32>, vector<2x8x32xf32>, vector<2x8x32xf32> -> vector<2x8x32xf32>
    %218 = tpu.concatenate %172, %187, %202, %217 in 2 : vector<2x8x32xf32>, vector<2x8x32xf32>, vector<2x8x32xf32>, vector<2x8x32xf32> -> vector<2x8x128xf32>
    %219 = math.tanh %218 : vector<2x8x128xf32>
    %220 = vector.extract_strided_slice %219 {offsets = [0, 0, 0], sizes = [2, 1, 128], strides = [1, 1, 1]} : vector<2x8x128xf32> to vector<2x1x128xf32>
    %221 = vector.shape_cast %220 : vector<2x1x128xf32> to vector<2x128xf32>
    %222 = arith.truncf %221 : vector<2x128xf32> to vector<2x128xbf16>
    %c0_82 = arith.constant 0 : index
    %c0_83 = arith.constant 0 : index
    %223 = vector.load %arg14[%c0_82, %c0_83] : memref<128x128xbf16, #tpu.memory_space<vmem>>, vector<128x128xbf16>
    %cst_84 = arith.constant dense<0.000000e+00> : vector<2x128xf32>
    %224 = tpu.matmul %222, %223, %cst_84 {dimension_numbers = #tpu.dot_dimension_numbers<[1], [0], [0], [1], [0, 0, 1, 1], [], []>} : vector<2x128xbf16>, vector<128x128xbf16>, vector<2x128xf32> -> vector<2x128xf32>
    %c0_85 = arith.constant 0 : index
    %c0_86 = arith.constant 0 : index
    %225 = vector.load %arg15[%c0_85, %c0_86] : memref<1x128xf32, #tpu.memory_space<vmem>>, vector<1x128xf32>
    %226 = vector.broadcast %225 : vector<1x128xf32> to vector<2x128xf32>
    %227 = arith.addf %224, %226 : vector<2x128xf32>
    %228 = math.tanh %227 : vector<2x128xf32>
    %229 = arith.truncf %228 : vector<2x128xf32> to vector<2x128xbf16>
    %c0_87 = arith.constant 0 : index
    %c0_88 = arith.constant 0 : index
    %230 = vector.load %arg16[%c0_87, %c0_88] : memref<128x128xbf16, #tpu.memory_space<vmem>>, vector<128x128xbf16>
    %cst_89 = arith.constant dense<0.000000e+00> : vector<2x128xf32>
    %231 = tpu.matmul %229, %230, %cst_89 {dimension_numbers = #tpu.dot_dimension_numbers<[1], [0], [0], [1], [0, 0, 1, 1], [], []>} : vector<2x128xbf16>, vector<128x128xbf16>, vector<2x128xf32> -> vector<2x128xf32>
    %c0_90 = arith.constant 0 : index
    %c0_91 = arith.constant 0 : index
    %232 = vector.load %arg17[%c0_90, %c0_91] : memref<1x128xf32, #tpu.memory_space<vmem>>, vector<1x128xf32>
    %233 = vector.broadcast %232 : vector<1x128xf32> to vector<2x128xf32>
    %234 = arith.addf %231, %233 : vector<2x128xf32>
    %235 = tpu.concatenate %228, %234 in 1 : vector<2x128xf32>, vector<2x128xf32> -> vector<2x256xf32>
    %c0_92 = arith.constant 0 : index
    %c0_93 = arith.constant 0 : index
    %236 = vector.load %arg18[%c0_92, %c0_93] : memref<2x256xf32, #tpu.memory_space<vmem>>, vector<2x256xf32>
    tpu.vector_store %arg18[%c0_92, %c0_93], %235 {strides = array<i32>} : memref<2x256xf32, #tpu.memory_space<vmem>>, vector<2x256xf32>,
    return
  }
}

</mosaic_0001>

<bundles_post_ra>
// kernel: fast_lsa_t_forward.1
= control target key start
LH: loop header
LB: loop body
LE: loop exit
PB: predicated region body
PF: predicated region fallthrough
CT: control target
= control target key end

     0   :  { %s10129_s0 = inlined_call_operand.vmem [shape: s32[16,1], index: 0, kind: input, shape index: {}]   ;;  %s10130_s1 = inlined_call_operand.vmem [shape: f32[16,1], index: 1, kind: input, shape index: {}]   ;;  %s10131_s2 = inlined_call_operand.vmem [shape: f32[16,1], index: 2, kind: input, shape index: {}]   ;;  %s10132_s3 = inlined_call_operand.vmem [shape: f32[16,1], index: 3, kind: input, shape index: {}]   ;;  %s10133_s4 = inlined_call_operand.vmem [shape: f32[16,1], index: 4, kind: input, shape index: {}]   ;;  %s10134_s5 = inlined_call_operand.vmem [shape: bf16[64,128], index: 5, kind: input, shape index: {}]   ;;  %s10135_s6 = inlined_call_operand.hbm [shape: bf16[3,128,384], index: 6, kind: input, shape index: {}]   ;;  %s10136_s7 = inlined_call_operand.vmem [shape: f32[3,1,384], index: 7, kind: input, shape index: {}]   ;;  %s10137_s8 = inlined_call_operand.hbm [shape: bf16[384,128], index: 8, kind: input, shape index: {}]   ;;  %s10138_s9 = inlined_call_operand.vmem [shape: f32[1,128], index: 9, kind: input, shape index: {}]   ;;  %s10139_s10 = inlined_call_operand.hbm [shape: bf16[256,128], index: 10, kind: input, shape index: {}]   ;;  %s10140_s11 = inlined_call_operand.vmem [shape: f32[1,128], index: 11, kind: input, shape index: {}]   ;;  %s10141_s12 = inlined_call_operand.hbm [shape: bf16[128,384], index: 12, kind: input, shape index: {}]   ;;  %s10142_s13 = inlined_call_operand.vmem [shape: f32[1,384], index: 13, kind: input, shape index: {}]   ;;  %s10143_s14 = inlined_call_operand.vmem [shape: bf16[128,128], index: 14, kind: input, shape index: {}]   ;;  %s10144_s15 = inlined_call_operand.vmem [shape: f32[1,128], index: 15, kind: input, shape index: {}]   ;;  %s10145_s16 = inlined_call_operand.hbm [shape: bf16[128,128], index: 16, kind: input, shape index: {}]   ;;  %s10146_s17 = inlined_call_operand.hbm [shape: f32[1,128], index: 17, kind: input, shape index: {}]   ;;  %s10147_s18 = inlined_call_operand.vmem [shape: f32[2,256], index: 18, kind: output, shape index: {}]  }
   0x1   :  { %10151 = sst [smem:[#allocation16_spill]] %s10129_s0 }
   0x2   :  { %10152 = sst [smem:[#allocation17_spill]] %s10130_s1 }
   0x3   :  { %10153 = sst [smem:[#allocation18_spill]] %s10131_s2 }
   0x4   :  { %23 = vsyncpa [#allocation3], 0 }
   0x5   :  { %24 = vsyncpa [#allocation5], 0 }
   0x6   :  { %25 = vsyncpa [#allocation8], 0 }
   0x7   :  { %26 = vsyncpa [#allocation11], 0  ;;  %s9047_s27 = smov [#allocation4]  }
   0x8   :  { %s58_s28 = sshll.u32 %s9047_s27, 4  ;;  %s59_s28 = int_to_ptr.vmem [resolvable:$true] %s58_s28 }
   0x9   :  { %s8927_s29 = scalar_lea.vmem %s59_s28, 3072  ;;  %p8932_p1 = scmp.lt.s32.totalorder %s59_s28, %s59_s28 }
   0xa   :  { %p8928_p0 = scmp.ne.s32.totalorder %s59_s28, %s8927_s29  ;;  %p8933_p2 = scmp.lt.s32.totalorder %s8927_s29, %s8927_s29 }
   0xc   :  { %p8934_p3 = por %p8933_p2, %p8932_p1 }
   0xe   :  { %p8935_p4 = pnand %p8934_p3, %p8928_p0 }
  0x10   :  { %8938 = shalt.err (!%p8935_p4)
}
  0x11   :  { %s9048_s30 = smov 64   ;;  %s9049_s0 = smov 4  }
  0x12   :  { %64 = dma.hbm_to_vmem [thread:$0]  %s10137_s8, 3072, %s59_s28, [#allocation5], %s9048_s30, %s9048_s30, %s9049_s0  }
  0x13   :  { %s9050_s20 = smov [#allocation7]   ;;  %s9051_s22 = smov [#allocation2]  }
  0x14   :  { %s86_s21 = sshll.u32 %s9050_s20, 4  ;;  %s44_s2 = sshll.u32 %s9051_s22, 4  ;;  %s87_s21 = int_to_ptr.vmem [resolvable:$true] %s86_s21  ;;  %s45_s2 = int_to_ptr.vmem [resolvable:$true] %s44_s2 }
  0x15   :  { %s8947_s23 = scalar_lea.vmem %s87_s21, 3072  ;;  %p8952_p6 = scmp.lt.s32.totalorder %s87_s21, %s87_s21 }
  0x16   :  { %p8948_p5 = scmp.ne.s32.totalorder %s87_s21, %s8947_s23  ;;  %p8953_p7 = scmp.lt.s32.totalorder %s8947_s23, %s8947_s23 }
  0x18   :  { %p8954_p8 = por %p8953_p7, %p8952_p6 }
  0x1a   :  { %p8955_p9 = pnand %p8954_p8, %p8948_p5 }
  0x1c   :  { %8958 = shalt.err (!%p8955_p9)
}
  0x1d   :  { %s9052_s24 = smov 192   ;;  %s9053_s25 = smov 12  }
  0x1e   :  { %92 = dma.hbm_to_vmem [thread:$0]  %s10141_s12, 3072, %s87_s21, [#allocation8], %s9052_s24, %s9052_s24, %s9053_s25  }
  0x1f   :  { %s8967_s8 = scalar_lea.vmem %s45_s2, 9216  ;;  %p8972_p11 = scmp.lt.s32.totalorder %s45_s2, %s45_s2 }
  0x20   :  { %p8968_p10 = scmp.ne.s32.totalorder %s45_s2, %s8967_s8  ;;  %p8973_p12 = scmp.lt.s32.totalorder %s8967_s8, %s8967_s8 }
  0x22   :  { %p8974_p13 = por %p8973_p12, %p8972_p11 }
  0x24   :  { %p8975_p0 = pnand %p8974_p13, %p8968_p10 }
  0x26   :  { %8978 = shalt.err (!%p8975_p0)
}
  0x27   :  { %50 = dma.hbm_to_vmem [thread:$0]  %s10135_s6, 9216, %s45_s2, [#allocation3], %s9052_s24, %s9052_s24, %s9053_s25  }
  0x28   :  { %s9054_s19 = smov [#allocation6]   ;;  %s9055_s20 = smov [#allocation9]  }
  0x29   :  { %s72_s1 = sshll.u32 %s9054_s19, 4  ;;  %s104_s22 = sshll.u32 %s9055_s20, 4  ;;  %s73_s1 = int_to_ptr.vmem [resolvable:$true] %s72_s1  ;;  %s105_s22 = int_to_ptr.vmem [resolvable:$true] %s104_s22 }
  0x2a   :  { %s8987_s23 = scalar_lea.vmem %s73_s1, 2048  ;;  %p8992_p2 = scmp.lt.s32.totalorder %s73_s1, %s73_s1 }
  0x2b   :  { %p8988_p1 = scmp.ne.s32.totalorder %s73_s1, %s8987_s23  ;;  %p8993_p3 = scmp.lt.s32.totalorder %s8987_s23, %s8987_s23 }
  0x2d   :  { %p8994_p4 = por %p8993_p3, %p8992_p2 }
  0x2f   :  { %p8995_p5 = pnand %p8994_p4, %p8988_p1 }
  0x31   :  { %8998 = shalt.err (!%p8995_p5)
}
  0x32   :  { %78 = dma.hbm_to_vmem [thread:$0]  %s10139_s10, 2048, %s73_s1, [#allocation5], %s9048_s30, %s9048_s30, %s9049_s0  }
  0x33   :  { %s9007_s6 = scalar_lea.vmem %s105_s22, 1024  ;;  %p9012_p7 = scmp.lt.s32.totalorder %s105_s22, %s105_s22 }
  0x34   :  { %p9008_p6 = scmp.ne.s32.totalorder %s105_s22, %s9007_s6  ;;  %p9013_p8 = scmp.lt.s32.totalorder %s9007_s6, %s9007_s6 }
  0x36   :  { %p9014_p9 = por %p9013_p8, %p9012_p7 }
  0x38   :  { %p9015_p10 = pnand %p9014_p9, %p9008_p6 }
  0x3a   :  { %9018 = shalt.err (!%p9015_p10)
}
  0x3b   :  { %110 = dma.hbm_to_vmem [thread:$0]  %s10145_s16, 1024, %s105_s22, [#allocation8], %s9048_s30, %s9048_s30, %s9049_s0  }
  0x3c   :  { %s9056_s25 = smov [#allocation10]  }
  0x3d   :  { %s117_s26 = sshll.u32 %s9056_s25, 4  ;;  %s118_s26 = int_to_ptr.vmem [resolvable:$true] %s117_s26 }
  0x3e   :  { %s9027_s27 = scalar_lea.vmem %s118_s26, 16  ;;  %s9031_s10 = scalar_lea.vmem %s118_s26, 32 }
  0x3f   :  { %p9028_p11 = scmp.ne.s32.totalorder %s118_s26, %s9027_s27  ;;  %p9032_p12 = scmp.lt.s32.totalorder %s118_s26, %s118_s26 }
  0x40   :  { %p9033_p13 = scmp.lt.s32.totalorder %s9031_s10, %s9027_s27 }
  0x42   :  { %p9034_p0 = por %p9033_p13, %p9032_p12 }
  0x44   :  { %p9035_p1 = pnand %p9034_p0, %p9028_p11 }
  0x46   :  { %9038 = shalt.err (!%p9035_p1)
}
  0x47   :  { %120 = dma.hbm_to_vmem [thread:$0]  %s10146_s17, 16, %s118_s26, [#allocation11]  }
  0x48   :  { %9039 = dma.done.wait [#allocation3], 9216  }
  0x49   :  { %9040 = vsyncadd [#allocation3], 4294958080 }
  0x4a   :  { %9041 = dma.done.wait [#allocation5], 5120  }
  0x4b   :  { %9042 = vsyncadd [#allocation5], 4294962176 }
  0x4c   :  { %9043 = dma.done.wait [#allocation8], 4096  }
  0x4d   :  { %9044 = vsyncadd [#allocation8], 4294963200 }
  0x4e   :  { %9045 = dma.done.wait [#allocation11], 16  }
  0x4f   :  { %9046 = vsyncadd [#allocation11], 4294967280  ;;  %v9057_v0 = vmov 0   ;;  %v9058_v1 = vmov 0.0   ;;  %s10154_s0 = sld [smem:[#allocation16_spill]]  ;;  %v8585_v4 = vld [vmem:[%s10134_s5 + $0x18] sm:$0xff]   ;;  %v142_v29 = vlaneseq }
  0x50   :  { %8583 = vset.pattern.permute.xlu0 %v9057_v0  ;;  %8016 = vmatprep.subr.bf16.mxu0 %v9058_v1  ;;  %v8586_v5 = vld [vmem:[%s10134_s5 + $0x10] sm:$0xff]   ;;  %vm9059_vm0 = vmmov 0   ;;  %s10155_s6 = sld [smem:[#allocation17_spill]]  ;;  %v8587_v7 = vld [vmem:[%s10134_s5 + $0x8] sm:$0xff]   ;;  %v260_v8 = vld [vmem:[%s10132_s3] sm:$0xff]  ;;  %vm187_vm3 = vcmask 523264  }
  0x51   :  { %8584 = vset.pattern.permute.xlu1 %v9057_v0  ;;  %498 = vmatprep.mubr.bf16.mxu1 %v9057_v0  ;;  %v8588_v9 = vld [vmem:[%s10134_s5] sm:$0xff]   ;;  %s10156_s16 = sld [smem:[#allocation18_spill]]  ;;  %v8589_v11 = vld [vmem:[#allocation2 + $0xac] ss:$12 sps:$4 sm:$0xff]   ;;  %v8591_v13 = vld [vmem:[#allocation2 + $0xa8] ss:$12 sps:$4 sm:$0xff]  }
  0x52   :  { %8017 = vmatpush3.bf16.msra.mxu0 %v8585_v4  ;;  %8024 = vmatprep.mubr.msk.bf16.mxu0 %vm9059_vm0, %v9058_v1  ;;  %v274_v12 = vld [vmem:[%s10133_s4] sm:$0xff]  ;;  %v8595_v16 = vld [vmem:[#allocation2 + $0x90] ss:$12 sps:$4 sm:$0xff]   ;;  %v261_v21 = vld [vmem:[%s10132_s3 + $0x8] sm:$0xff]  ;;  %v143_v30 = vand.u32 127, %v142_v29  ;;  %vm1078_vm4 = vcmask 261120  }
  0x53   :  { %8018 = vmatprep.subr.bf16.mxu0 %v9058_v1  ;;  %v8593_v14 = vld [vmem:[#allocation2 + $0x94] ss:$12 sps:$4 sm:$0xff]   ;;  %466 = vmatprep.subr.bf16.mxu1 %v8589_v11  ;;  %v8597_v17 = vld [vmem:[#allocation2 + $0x7c] ss:$12 sps:$4 sm:$0xff]   ;;  %v8599_v19 = vld [vmem:[#allocation2 + $0x78] ss:$12 sps:$4 sm:$0xff]  }
  0x54   :  { %467 = vmatpush1.bf16.msra.mxu1 %v8591_v13  ;;  %v8601_v20 = vld [vmem:[#allocation2 + $0x64] ss:$12 sps:$4 sm:$0xff]   ;;  %v8603_v22 = vld [vmem:[#allocation2 + $0x60] ss:$12 sps:$4 sm:$0xff]   ;;  %v8607_v25 = vld [vmem:[#allocation2 + $0x48] ss:$12 sps:$4 sm:$0xff]  }
  0x55   :  { %v140_v2 = vld [vmem:[%s10154_s0] sm:$0xff]  ;;  %v141_v3 = vld [vmem:[%s10154_s0 + $0x8] sm:$0xff]  ;;  %468 = vmatprep.subr.bf16.mxu1 %v8593_v14  ;;  %v8611_v27 = vld [vmem:[#allocation2 + $0x30] ss:$12 sps:$4 sm:$0xff]   ;;  %vm1535_vm5 = vcmask 64512   ;;  %s9061_s25 = smov 32  }
  0x56   :  { %145 = vperm.xlu0 %8583, %v140_v2   ;;  %v232_v6 = vld [vmem:[%s10155_s6] sm:$0xff]  ;;  %8019 = vmatpush3.bf16.msra.mxu0 %v8586_v5  ;;  %v233_v18 = vld [vmem:[%s10155_s6 + $0x8] sm:$0xff]  ;;  %v8592_v35 = vld [vmem:[#allocation2 + $0xb0] ss:$12 sps:$4 sm:$0xff]   ;;  %vm5100_vm6 = vcmask 785408   ;;  %vm7299_vm7 = vcmask 1041409  }
  0x57   :  { %8020 = vmatprep.subr.bf16.mxu0 %v9058_v1  ;;  %v246_v10 = vld [vmem:[%s10156_s16] sm:$0xff]  ;;  %v247_v15 = vld [vmem:[%s10156_s16 + $0x8] sm:$0xff]  ;;  %v8608_v40 = vld [vmem:[#allocation2 + $0x50] ss:$12 sps:$4 sm:$0xff]  }
  0x58   :  { %250 = vperm.xlu1 %8584, %v246_v10   ;;  %469 = vmatpush1.bf16.msra.mxu1 %v8595_v16  ;;  %v8605_v23 = vld [vmem:[#allocation2 + $0x4c] ss:$12 sps:$4 sm:$0xff]   ;;  %v8609_v26 = vld [vmem:[#allocation2 + $0x34] ss:$12 sps:$4 sm:$0xff]   ;;  %v8613_v28 = vld [vmem:[#allocation2 + $0x1c] ss:$12 sps:$4 sm:$0xff]  }
  0x59   :  { %470 = vmatprep.subr.bf16.mxu1 %v8597_v17  ;;  %v275_v24 = vld [vmem:[%s10133_s4 + $0x8] sm:$0xff]  ;;  %v8596_v37 = vld [vmem:[#allocation2 + $0x98] ss:$12 sps:$4 sm:$0xff]   ;;  %v8624_v58 = vld [vmem:[#allocation2 + $0x170] ss:$12 sps:$4 sm:$0xff]  }
  0x5a   :  { %148 = vperm.xlu0 %8583, %v141_v3   ;;  %8021 = vmatpush3.bf16.msra.mxu0 %v8587_v7  ;;  %v8600_v38 = vld [vmem:[#allocation2 + $0x80] ss:$12 sps:$4 sm:$0xff]   ;;  %v8604_v39 = vld [vmem:[#allocation2 + $0x68] ss:$12 sps:$4 sm:$0xff]   ;;  %v8612_v41 = vld [vmem:[#allocation2 + $0x38] ss:$12 sps:$4 sm:$0xff]  }
  0x5b   :  { %8022 = vmatprep.subr.bf16.mxu0 %v9058_v1  ;;  %v8615_v42 = vld [vmem:[#allocation2 + $0x18] ss:$12 sps:$4 sm:$0xff]   ;;  %v8616_v43 = vld [vmem:[#allocation2 + $0x20] ss:$12 sps:$4 sm:$0xff]   ;;  %v8620_v46 = vld [vmem:[#allocation2 + $0x8] ss:$12 sps:$4 sm:$0xff]  }
  0x5c   :  { %255 = vperm.xlu1 %8584, %v247_v15   ;;  %471 = vmatpush1.bf16.msra.mxu1 %v8599_v19  ;;  %v8617_v44 = vld [vmem:[#allocation2 + $0x4] ss:$12 sps:$4 sm:$0xff]   ;;  %v8619_v45 = vld [vmem:[#allocation2] ss:$12 sps:$4 sm:$0xff]   ;;  %v8621_v57 = vld [vmem:[#allocation2 + $0x168] ss:$12 sps:$4 sm:$0xff]  }
  0x5d   :  { %472 = vmatprep.subr.bf16.mxu1 %v8601_v20  ;;  %v8623_v47 = vld [vmem:[#allocation2 + $0x16c] ss:$12 sps:$4 sm:$0xff]   ;;  %v8627_v60 = vld [vmem:[#allocation2 + $0x154] ss:$12 sps:$4 sm:$0xff]   ;;  %v8625_v61 = vld [vmem:[#allocation2 + $0x150] ss:$12 sps:$4 sm:$0xff]  }
  0x5e   :  { %236 = vperm.xlu0 %8583, %v232_v6   ;;  %8023 = vmatpush3.bf16.msra.mxu0 %v8588_v9  ;;  %v8628_v62 = vld [vmem:[#allocation2 + $0x158] ss:$12 sps:$4 sm:$0xff]   ;;  %v8631_v63 = vld [vmem:[#allocation2 + $0x13c] ss:$12 sps:$4 sm:$0xff]   ;;  %v8632_v3 = vld [vmem:[#allocation2 + $0x140] ss:$12 sps:$4 sm:$0xff]  }
  0x5f   :  { %8028 = vmatprep.subr.bf16.mxu0 %v9058_v1  ;;  %v8629_v2 = vld [vmem:[#allocation2 + $0x138] ss:$12 sps:$4 sm:$0xff]   ;;  %v8633_v5 = vld [vmem:[#allocation2 + $0x120] ss:$12 sps:$4 sm:$0xff]   ;;  %v8636_v6 = vld [vmem:[#allocation2 + $0x128] ss:$12 sps:$4 sm:$0xff]  }
  0x60   :  { %241 = vperm.xlu1 %8584, %v233_v18   ;;  %473 = vmatpush1.bf16.msra.mxu1 %v8603_v22  ;;  %v8635_v4 = vld [vmem:[#allocation2 + $0x124] ss:$12 sps:$4 sm:$0xff]   ;;  %v8639_v7 = vld [vmem:[#allocation2 + $0x10c] ss:$12 sps:$4 sm:$0xff]   ;;  %v8643_v10 = vld [vmem:[#allocation2 + $0xf4] ss:$12 sps:$4 sm:$0xff]  }
  0x61   :  { %474 = vmatprep.subr.bf16.mxu1 %v8605_v23  ;;  %v8640_v9 = vld [vmem:[#allocation2 + $0x110] ss:$12 sps:$4 sm:$0xff]   ;;  %v8645_v16 = vld [vmem:[#allocation2 + $0xd8] ss:$12 sps:$4 sm:$0xff]   ;;  %v8648_v17 = vld [vmem:[#allocation2 + $0xe0] ss:$12 sps:$4 sm:$0xff]  }
  0x62   :  { %264 = vperm.xlu0 %8583, %v260_v8   ;;  %v8637_v8 = vld [vmem:[#allocation2 + $0x108] ss:$12 sps:$4 sm:$0xff]   ;;  %v8641_v11 = vld [vmem:[#allocation2 + $0xf0] ss:$12 sps:$4 sm:$0xff]   ;;  %v8649_v22 = vld [vmem:[#allocation2 + $0xc0] ss:$12 sps:$4 sm:$0xff]  }
  0x63   :  { %v8647_v13 = vld [vmem:[#allocation2 + $0xdc] ss:$12 sps:$4 sm:$0xff]   ;;  %v8651_v19 = vld [vmem:[#allocation2 + $0xc4] ss:$12 sps:$4 sm:$0xff]  }
  0x64   :  { %269 = vperm.xlu1 %8584, %v261_v21   ;;  %475 = vmatpush1.bf16.msra.mxu1 %v8607_v25  ;;  %v8652_v23 = vld [vmem:[#allocation2 + $0xc8] ss:$12 sps:$4 sm:$0xff]   ;;  %v8655_v25 = vld [vmem:[#allocation2 + $0x22c] ss:$12 sps:$4 sm:$0xff]  }
  0x65   :  { %476 = vmatprep.subr.bf16.mxu1 %v8609_v26 }
  0x66   :  { %278 = vperm.xlu0 %8583, %v274_v12   ;;  %v8644_v12 = vld [vmem:[#allocation2 + $0xf8] ss:$12 sps:$4 sm:$0xff]  }
  0x68   :  { %283 = vperm.xlu1 %8584, %v275_v24   ;;  %477 = vmatpush1.bf16.msra.mxu1 %v8611_v27 }
  0x69   :  { %478 = vmatprep.subr.bf16.mxu1 %v8613_v28  ;;  %v8653_v28 = vld [vmem:[#allocation2 + $0x228] ss:$12 sps:$4 sm:$0xff]  }
  0x6c   :  { %479 = vmatpush1.bf16.msra.mxu1 %v8615_v42  ;;  %v8669_v42 = vld [vmem:[#allocation2 + $0x1c8] ss:$12 sps:$4 sm:$0xff]  }
  0x6d   :  { %480 = vmatprep.subr.bf16.mxu1 %v8617_v44  ;;  %v8675_v44 = vld [vmem:[#allocation2 + $0x1b4] ss:$12 sps:$4 sm:$0xff]  }
  0x70   :  { %481 = vmatpush1.bf16.msra.mxu1 %v8619_v45  ;;  %v8673_v45 = vld [vmem:[#allocation2 + $0x1b0] ss:$12 sps:$4 sm:$0xff]  }
  0x71   :  { %730 = vmatprep.subr.bf16.mxu1 %v8623_v47  ;;  %v8679_v47 = vld [vmem:[#allocation2 + $0x19c] ss:$12 sps:$4 sm:$0xff]  }
  0xd1   :  { %v146_v31 = vpop.permute.xlu0 %145 }
  0xd2   :  { %vm150_vm1 = vcmp.eq.s32.totalorder %v146_v31, %v143_v30 }
  0xd3   :  { %v152_v33 = vsel %vm150_vm1, 1.0, %v9058_v1  ;;  %v251_v48 = vpop.permute.xlu1 %250 }
  0xd5   :  { %v149_v32 = vpop.permute.xlu0 %148 }
  0xd6   :  { %vm151_vm2 = vcmp.eq.s32.totalorder %v149_v32, %v143_v30  ;;  %v8656_v30 = vld [vmem:[#allocation2 + $0x230] ss:$12 sps:$4 sm:$0xff]   ;;  %v8659_v32 = vld [vmem:[#allocation2 + $0x214] ss:$12 sps:$4 sm:$0xff]  }
  0xd7   :  { %v153_v34 = vsel %vm151_vm2, 1.0, %v9058_v1  ;;  %v256_v51 = vpop.permute.xlu1 %255 }
  0xd8   :  { %v154_v36 = vpack.c.bf16 %v153_v34, %v152_v33  ;;  %v8657_v33 = vld [vmem:[#allocation2 + $0x210] ss:$12 sps:$4 sm:$0xff]   ;;  %v8660_v34 = vld [vmem:[#allocation2 + $0x218] ss:$12 sps:$4 sm:$0xff]  }
  0xd9   :  { %v237_v15 = vpop.permute.xlu0 %236 }
  0xda   :  { %8025 = vmatmul.mubr.msk.bf16.vlgmr.msra.gmra.mxu0 %vm187_vm3, %v154_v36  ;;  %v8661_v36 = vld [vmem:[#allocation2 + $0x1f8] ss:$12 sps:$4 sm:$0xff]  }
  0xdb   :  { %8029 = vmatpush3.bf16.msra.mxu0 %v8592_v35  ;;  %8044 = vmatprep.mubr.msk.bf16.mxu0 %vm9059_vm0, %v9058_v1  ;;  %v242_v14 = vpop.permute.xlu1 %241  ;;  %v8663_v35 = vld [vmem:[#allocation2 + $0x1fc] ss:$12 sps:$4 sm:$0xff]  }
  0xdc   :  { %8030 = vmatprep.subr.bf16.mxu0 %v9058_v1 }
  0xdd   :  { %v265_v26 = vpop.permute.xlu0 %264 }
  0xdf   :  { %8031 = vmatpush3.bf16.msra.mxu0 %v8596_v37  ;;  %v270_v21 = vpop.permute.xlu1 %269  ;;  %v8664_v37 = vld [vmem:[#allocation2 + $0x200] ss:$12 sps:$4 sm:$0xff]  }
  0xe0   :  { %8032 = vmatprep.subr.bf16.mxu0 %v9058_v1 }
  0xe3   :  { %8033 = vmatpush3.bf16.msra.mxu0 %v8600_v38  ;;  %v8667_v38 = vld [vmem:[#allocation2 + $0x1e4] ss:$12 sps:$4 sm:$0xff]  }
  0xe4   :  { %8034 = vmatprep.subr.bf16.mxu0 %v9058_v1 }
  0xe7   :  { %8035 = vmatpush3.bf16.msra.mxu0 %v8604_v39  ;;  %v8665_v39 = vld [vmem:[#allocation2 + $0x1e0] ss:$12 sps:$4 sm:$0xff]  }
  0xe8   :  { %8036 = vmatprep.subr.bf16.mxu0 %v9058_v1 }
  0xeb   :  { %8037 = vmatpush3.bf16.msra.mxu0 %v8608_v40  ;;  %v8668_v40 = vld [vmem:[#allocation2 + $0x1e8] ss:$12 sps:$4 sm:$0xff]  }
  0xec   :  { %8038 = vmatprep.subr.bf16.mxu0 %v9058_v1 }
  0xef   :  { %8039 = vmatpush3.bf16.msra.mxu0 %v8612_v41  ;;  %v8671_v41 = vld [vmem:[#allocation2 + $0x1cc] ss:$12 sps:$4 sm:$0xff]  }
  0xf0   :  { %8040 = vmatprep.subr.bf16.mxu0 %v9058_v1 }
  0xf3   :  { %8041 = vmatpush3.bf16.msra.mxu0 %v8616_v43  ;;  %v8672_v43 = vld [vmem:[#allocation2 + $0x1d0] ss:$12 sps:$4 sm:$0xff]  }
  0xf4   :  { %8042 = vmatprep.subr.bf16.mxu0 %v9058_v1 }
  0xf7   :  { %8043 = vmatpush3.bf16.msra.mxu0 %v8620_v46  ;;  %v8676_v46 = vld [vmem:[#allocation2 + $0x1b8] ss:$12 sps:$4 sm:$0xff]  }
  0xf8   :  { %8048 = vmatprep.subr.bf16.mxu0 %v9058_v1 }
 0x19a   :  { %v9250_v49 = vpop.f32.mrf.mxu0 }
 0x19b   :  { %v258_v53 = vmul.f32 %v251_v48, %v9250_v49  ;;  %v9271_v20 = vmul.f32 %v237_v15, %v9250_v49  ;;  %v8677_v48 = vld [vmem:[#allocation2 + $0x198] ss:$12 sps:$4 sm:$0xff]  }
 0x19c   :  { %v8026_v50 = vpop.f32.mrf.mxu0 }
 0x19d   :  { %v272_v27 = vmul.f32 %v265_v26, %v9271_v20  ;;  %v8680_v50 = vld [vmem:[#allocation2 + $0x1a0] ss:$12 sps:$4 sm:$0xff]  }
 0x19e   :  { %v9252_v52 = vpop.f32.mrf.mxu0 }
 0x19f   :  { %v259_v54 = vmul.f32 %v256_v51, %v9252_v52  ;;  %v5474_v55 = vpack.c.bf16 %v9252_v52, %v9250_v49  ;;  %v9267_v18 = vmul.f32 %v242_v14, %v9252_v52  ;;  %v8683_v51 = vld [vmem:[#allocation2 + $0x184] ss:$12 sps:$4 sm:$0xff]   ;;  %v8723_v52 = vld [vmem:[#allocation6 + $0x48] sm:$0xff]  }
 0x1a0   :  { %v8027_v56 = vpop.f32.mrf.mxu0  ;;  %v8722_v49 = vld [vmem:[#allocation6 + $0x50] sm:$0xff]  }
 0x1a1   :  { %v288_v59 = vpack.c.bf16 %v259_v54, %v258_v53  ;;  %v273_v24 = vmul.f32 %v270_v21, %v9267_v18  ;;  %v284_v53 = vpop.permute.xlu1 %283  ;;  %v8681_v54 = vld [vmem:[#allocation2 + $0x180] ss:$12 sps:$4 sm:$0xff]   ;;  %v8684_v56 = vld [vmem:[#allocation2 + $0x188] ss:$12 sps:$4 sm:$0xff]  }
 0x1a3   :  { %499 = vmatmul.mubr.bf16.vlgmr.msra.gmra.mxu1 %v288_v59  ;;  %8045 = vmatmul.mubr.bf16.vlgmr.msra.gmra.mxu0 %v288_v59  ;;  %v550_v31 = vpack.c.bf16 %v273_v24, %v272_v27 }
 0x1a4   :  { %731 = vmatpush1.bf16.msra.mxu1 %v8621_v57  ;;  %8049 = vmatpush3.bf16.msra.mxu0 %v8624_v58  ;;  %v287_v57 = vmul.f32 %v284_v53, %v9267_v18  ;;  %v279_v58 = vpop.permute.xlu0 %278 }
 0x1a5   :  { %732 = vmatprep.subr.bf16.mxu1 %v8627_v60  ;;  %8050 = vmatprep.subr.bf16.mxu0 %v9058_v1  ;;  %v286_v59 = vmul.f32 %v279_v58, %v9271_v20 }
 0x1a6   :  { %762 = vmatprep.mubr.bf16.mxu1 %v9057_v0  ;;  %8064 = vmatprep.mubr.msk.bf16.mxu0 %vm9059_vm0, %v9058_v1 }
 0x1a7   :  { %v814_v60 = vpack.c.bf16 %v287_v57, %v286_v59 }
 0x1a8   :  { %733 = vmatpush1.bf16.msra.mxu1 %v8625_v61  ;;  %8051 = vmatpush3.bf16.msra.mxu0 %v8628_v62  ;;  %v324_v61 = vshrl.u32 %v142_v29, 7 }
 0x1a9   :  { %734 = vmatprep.subr.bf16.mxu1 %v8631_v63  ;;  %8052 = vmatprep.subr.bf16.mxu0 %v9058_v1  ;;  %v321_v63 = vld [vmem:[%s10136_s7] sm:$0x7] }
 0x1aa   :  { %v9296_v62 = vsub.s32 1, %v324_v61 }
 0x1ac   :  { %735 = vmatpush1.bf16.msra.mxu1 %v8629_v2  ;;  %8053 = vmatpush3.bf16.msra.mxu0 %v8632_v3  ;;  %v9301_v2 = vsub.s32 0, %v324_v61  ;;  %v330_v3 = vrot.slane %v321_v63, %v9296_v62 }
 0x1ad   :  { %736 = vmatprep.subr.bf16.mxu1 %v8635_v4  ;;  %8054 = vmatprep.subr.bf16.mxu0 %v9058_v1 }
 0x1b0   :  { %737 = vmatpush1.bf16.msra.mxu1 %v8633_v5  ;;  %8055 = vmatpush3.bf16.msra.mxu0 %v8636_v6  ;;  %v326_v6 = vrot.slane %v321_v63, %v9301_v2 }
 0x1b1   :  { %738 = vmatprep.subr.bf16.mxu1 %v8639_v7  ;;  %8056 = vmatprep.subr.bf16.mxu0 %v9058_v1 }
 0x1b4   :  { %739 = vmatpush1.bf16.msra.mxu1 %v8637_v8  ;;  %8057 = vmatpush3.bf16.msra.mxu0 %v8640_v9 }
 0x1b5   :  { %740 = vmatprep.subr.bf16.mxu1 %v8643_v10  ;;  %8058 = vmatprep.subr.bf16.mxu0 %v9058_v1 }
 0x1b8   :  { %741 = vmatpush1.bf16.msra.mxu1 %v8641_v11  ;;  %8059 = vmatpush3.bf16.msra.mxu0 %v8644_v12 }
 0x1b9   :  { %742 = vmatprep.subr.bf16.mxu1 %v8647_v13  ;;  %8060 = vmatprep.subr.bf16.mxu0 %v9058_v1 }
 0x1bc   :  { %743 = vmatpush1.bf16.msra.mxu1 %v8645_v16  ;;  %8061 = vmatpush3.bf16.msra.mxu0 %v8648_v17  ;;  %v7553_v16 = vld [vmem:[%s10136_s7 + $0x3] sm:$0x7]  ;;  %v9334_v17 = vsub.s32 2, %v324_v61 }
 0x1bd   :  { %744 = vmatprep.subr.bf16.mxu1 %v8651_v19  ;;  %8062 = vmatprep.subr.bf16.mxu0 %v9058_v1  ;;  %v594_v19 = vrot.slane %v7553_v16, %v9296_v62 }
 0x1be   :  { %v598_v18 = vrot.slane %v7553_v16, %v9334_v17 }
 0x1c0   :  { %745 = vmatpush1.bf16.msra.mxu1 %v8649_v22  ;;  %8063 = vmatpush3.bf16.msra.mxu0 %v8652_v23  ;;  %v590_v23 = vrot.slane %v7553_v16, %v9301_v2 }
 0x1c1   :  { %994 = vmatprep.subr.bf16.mxu1 %v8655_v25  ;;  %8068 = vmatprep.subr.bf16.mxu0 %v9058_v1 }
 0x1c3   :  { %763 = vmatmul.mubr.bf16.vlgmr.msra.gmra.mxu1 %v550_v31  ;;  %8065 = vmatmul.mubr.bf16.vlgmr.msra.gmra.mxu0 %v550_v31 }
 0x1c4   :  { %995 = vmatpush1.bf16.msra.mxu1 %v8653_v28  ;;  %8069 = vmatpush3.bf16.msra.mxu0 %v8656_v30 }
 0x1c5   :  { %996 = vmatprep.subr.bf16.mxu1 %v8659_v32  ;;  %8070 = vmatprep.subr.bf16.mxu0 %v9058_v1 }
 0x1c6   :  { %1026 = vmatprep.mubr.bf16.mxu1 %v9057_v0  ;;  %8084 = vmatprep.mubr.msk.bf16.mxu0 %vm9059_vm0, %v9058_v1 }
 0x1c8   :  { %997 = vmatpush1.bf16.msra.mxu1 %v8657_v33  ;;  %8071 = vmatpush3.bf16.msra.mxu0 %v8660_v34 }
 0x1c9   :  { %998 = vmatprep.subr.bf16.mxu1 %v8663_v35  ;;  %8072 = vmatprep.subr.bf16.mxu0 %v9058_v1 }
 0x1cc   :  { %999 = vmatpush1.bf16.msra.mxu1 %v8661_v36  ;;  %8073 = vmatpush3.bf16.msra.mxu0 %v8664_v37  ;;  %v7578_v36 = vld [vmem:[%s10136_s7 + $0x6] sm:$0x7]  ;;  %s9060_s7 = smov 96  }
 0x1cd   :  { %1000 = vmatprep.subr.bf16.mxu1 %v8667_v38  ;;  %8074 = vmatprep.subr.bf16.mxu0 %v9058_v1  ;;  %v862_v37 = vrot.slane %v7578_v36, %v9334_v17  ;;  %v858_v38 = vrot.slane %v7578_v36, %v9296_v62 }
 0x1d0   :  { %1001 = vmatpush1.bf16.msra.mxu1 %v8665_v39  ;;  %8075 = vmatpush3.bf16.msra.mxu0 %v8668_v40 }
 0x1d1   :  { %1002 = vmatprep.subr.bf16.mxu1 %v8671_v41  ;;  %8076 = vmatprep.subr.bf16.mxu0 %v9058_v1 }
 0x1d4   :  { %1003 = vmatpush1.bf16.msra.mxu1 %v8669_v42  ;;  %8077 = vmatpush3.bf16.msra.mxu0 %v8672_v43  ;;  %v854_v42 = vrot.slane %v7578_v36, %v9301_v2 }
 0x1d5   :  { %1004 = vmatprep.subr.bf16.mxu1 %v8675_v44  ;;  %8078 = vmatprep.subr.bf16.mxu0 %v9058_v1 }
 0x1d8   :  { %1005 = vmatpush1.bf16.msra.mxu1 %v8673_v45  ;;  %8079 = vmatpush3.bf16.msra.mxu0 %v8676_v46  ;;  %v334_v45 = vrot.slane %v321_v63, %v9334_v17 }
 0x1d9   :  { %1006 = vmatprep.subr.bf16.mxu1 %v8679_v47  ;;  %8080 = vmatprep.subr.bf16.mxu0 %v9058_v1 }
 0x1dc   :  { %1007 = vmatpush1.bf16.msra.mxu1 %v8677_v48  ;;  %8081 = vmatpush3.bf16.msra.mxu0 %v8680_v50 }
 0x1dd   :  { %1008 = vmatprep.subr.bf16.mxu1 %v8683_v51  ;;  %8082 = vmatprep.subr.bf16.mxu0 %v9058_v1 }
 0x1e0   :  { %1009 = vmatpush1.bf16.msra.mxu1 %v8681_v54  ;;  %8083 = vmatpush3.bf16.msra.mxu0 %v8684_v56 }
 0x1e1   :  { %8088 = vmatprep.subr.mxu1 %v9058_v1  ;;  %8108 = vmatprep.subr.mxu0 %v9058_v1 }
 0x1e3   :  { %1027 = vmatmul.mubr.bf16.vlgmr.msra.gmra.mxu1 %v814_v60  ;;  %8085 = vmatmul.mubr.bf16.vlgmr.msra.gmra.mxu0 %v814_v60 }
 0x1e4   :  { %8090 = vmatprep.mubr.msk.f32.mxu1 %vm9059_vm0, %v9058_v1  ;;  %8110 = vmatprep.mubr.msk.f32.mxu0 %vm9059_vm0, %v9058_v1 }
 0x263   :  { %v500_v4 = vpop.f32.mrf.mxu1  ;;  %v9304_v5 = vpop.f32.mrf.mxu0 }
 0x264   :  { %v9313_v11 = vadd.f32 %v500_v4, %v326_v6  ;;  %v9384_v56 = vadd.f32 %v9304_v5, %v334_v45 }
 0x265   :  { %v502_v7 = vpop.f32.mrf.mxu1  ;;  %v8046_v8 = vpop.f32.mrf.mxu0 }
 0x266   :  { %v9307_v9 = vadd.f32 %v502_v7, %v330_v3 }
 0x267   :  { %v504_v29 = vpop.f32.mrf.mxu1  ;;  %v9309_v10 = vpop.f32.mrf.mxu0 }
 0x268   :  { %8089 = vmatpush3.xpose.msk.msra.mxu1 %vm1078_vm4, %v9307_v9  ;;  %v9324_v15 = vadd.f32 %v504_v29, %v326_v6  ;;  %v9399_v59 = vadd.f32 %v9309_v10, %v334_v45 }
 0x269   :  { %v506_v12 = vpop.f32.mrf.mxu1  ;;  %v8047_v13 = vpop.f32.mrf.mxu0  ;;  %8093 = vmatprep.subr.mxu1 %v9058_v1 }
 0x26a   :  { %v9316_v14 = vadd.f32 %v506_v12, %v330_v3 }
 0x26b   :  { %8091 = vmatmul.mubr.msk.f32.vlgmr.msra.gmra.mxu1 %vm1078_vm4, %v9313_v11 }
 0x26c   :  { %8094 = vmatpush3.xpose.msk.msra.mxu1 %vm1078_vm4, %v9316_v14  ;;  %8095 = vmatprep.mubr.msk.f32.mxu1 %vm9059_vm0, %v9058_v1 }
 0x26d   :  { %8098 = vmatprep.subr.mxu1 %v9058_v1 }
 0x26f   :  { %8096 = vmatmul.mubr.msk.f32.vlgmr.msra.gmra.mxu1 %vm1078_vm4, %v9324_v15 }
 0x270   :  { %8100 = vmatprep.mubr.msk.f32.mxu1 %vm9059_vm0, %v9058_v1 }
 0x283   :  { %v764_v20 = vpop.f32.mrf.mxu1  ;;  %v807_v21 = vpop.f32.mrf.mxu0 }
 0x284   :  { %v9338_v22 = vadd.f32 %v807_v21, %v598_v18  ;;  %v9347_v31 = vadd.f32 %v764_v20, %v590_v23 }
 0x285   :  { %v766_v24 = vpop.f32.mrf.mxu1  ;;  %v8066_v25 = vpop.f32.mrf.mxu0 }
 0x286   :  { %v9341_v26 = vadd.f32 %v766_v24, %v594_v19 }
 0x287   :  { %v768_v27 = vpop.f32.mrf.mxu1  ;;  %v810_v28 = vpop.f32.mrf.mxu0 }
 0x288   :  { %v9343_v30 = vadd.f32 %v810_v28, %v598_v18  ;;  %8099 = vmatpush3.xpose.msk.msra.mxu1 %vm1078_vm4, %v9341_v26  ;;  %v9358_v35 = vadd.f32 %v768_v27, %v590_v23 }
 0x289   :  { %v770_v32 = vpop.f32.mrf.mxu1  ;;  %v8067_v33 = vpop.f32.mrf.mxu0  ;;  %8103 = vmatprep.subr.mxu1 %v9058_v1 }
 0x28a   :  { %v9350_v34 = vadd.f32 %v770_v32, %v594_v19 }
 0x28b   :  { %8101 = vmatmul.mubr.msk.f32.vlgmr.msra.gmra.mxu1 %vm1078_vm4, %v9347_v31 }
 0x28c   :  { %8104 = vmatpush3.xpose.msk.msra.mxu1 %vm1078_vm4, %v9350_v34  ;;  %8105 = vmatprep.mubr.msk.f32.mxu1 %vm9059_vm0, %v9058_v1 }
 0x28d   :  { %8113 = vmatprep.subr.mxu1 %v9058_v1 }
 0x28f   :  { %8106 = vmatmul.mubr.msk.f32.vlgmr.msra.gmra.mxu1 %vm1078_vm4, %v9358_v35 }
 0x290   :  { %8115 = vmatprep.mubr.msk.f32.mxu1 %vm9059_vm0, %v9058_v1 }
 0x2a3   :  { %v1028_v39 = vpop.f32.mrf.mxu1  ;;  %v1071_v40 = vpop.f32.mrf.mxu0 }
 0x2a4   :  { %v9370_v41 = vadd.f32 %v1071_v40, %v862_v37  ;;  %v9380_v51 = vadd.f32 %v1028_v39, %v854_v42 }
 0x2a5   :  { %v1030_v43 = vpop.f32.mrf.mxu1  ;;  %v8086_v44 = vpop.f32.mrf.mxu0 }
 0x2a6   :  { %v9374_v46 = vadd.f32 %v1030_v43, %v858_v38 }
 0x2a7   :  { %v1032_v47 = vpop.f32.mrf.mxu1  ;;  %v1074_v48 = vpop.f32.mrf.mxu0 }
 0x2a8   :  { %v9376_v50 = vadd.f32 %v1074_v48, %v862_v37  ;;  %8109 = vmatpush3.xpose.msk.msra.mxu0 %vm1078_vm4, %v9374_v46  ;;  %v9393_v58 = vadd.f32 %v1032_v47, %v854_v42 }
 0x2a9   :  { %v1034_v53 = vpop.f32.mrf.mxu1  ;;  %v8087_v54 = vpop.f32.mrf.mxu0  ;;  %8118 = vmatprep.subr.mxu0 %v9058_v1 }
 0x2aa   :  { %v9386_v57 = vadd.f32 %v1034_v53, %v858_v38 }
 0x2ab   :  { %8111 = vmatmul.mubr.msk.f32.vlgmr.msra.gmra.mxu0 %vm1078_vm4, %v9380_v51 }
 0x2ac   :  { %8114 = vmatpush3.xpose.msk.msra.mxu1 %vm1078_vm4, %v9386_v57  ;;  %8119 = vmatpush3.msra.mxu0 %v9384_v56 }
 0x2ad   :  { %8123 = vmatprep.subr.mxu1 %v9058_v1  ;;  %8120 = vmatprep.mubr.msk.f32.mxu0 %vm9059_vm0, %v9058_v1 }
 0x2ae   :  { %8128 = vmatprep.subr.mxu0 %v9058_v1 }
 0x2af   :  { %8116 = vmatmul.mubr.msk.f32.vlgmr.msra.gmra.mxu1 %vm1078_vm4, %v9393_v58 }
 0x2b0   :  { %8124 = vmatpush3.msra.mxu1 %v9399_v59  ;;  %8125 = vmatprep.mubr.msk.f32.mxu1 %vm9059_vm0, %v9058_v1 }
 0x2b1   :  { %8133 = vmatprep.subr.mxu1 %v9058_v1 }
 0x32b   :  { %v1151_v60 = vpop.f32.mrf.mxu1 }
 0x32c   :  { %v1536_v61 = vsel %vm1535_vm5, %v1151_v60, -inf }
 0x32d   :  { %1537 = vmax.xlane.f32.xlu0 %v1536_v61  ;;  %v8092_v63 = vpop.f32.mrf.mxu1 }
 0x32f   :  { %v1227_v3 = vpop.f32.mrf.mxu1 }
 0x330   :  { %v1539_v4 = vsel %vm1535_vm5, %v1227_v3, -inf }
 0x331   :  { %1540 = vmax.xlane.f32.xlu1 %v1539_v4  ;;  %v8097_v5 = vpop.f32.mrf.mxu1 }
 0x34b   :  { %v1303_v6 = vpop.f32.mrf.mxu1 }
 0x34c   :  { %v1542_v7 = vsel %vm1535_vm5, %v1303_v6, -inf }
 0x34d   :  { %1543 = vmax.xlane.f32.xlu0 %v1542_v7  ;;  %v8102_v8 = vpop.f32.mrf.mxu1 }
 0x34f   :  { %v1379_v29 = vpop.f32.mrf.mxu1 }
 0x350   :  { %v1545_v10 = vsel %vm1535_vm5, %v1379_v29, -inf }
 0x351   :  { %1546 = vmax.xlane.f32.xlu0 %v1545_v10  ;;  %v8107_v12 = vpop.f32.mrf.mxu1 }
 0x36b   :  { %v1455_v13 = vpop.f32.mrf.mxu0 }
 0x36c   :  { %v1548_v16 = vsel %vm1535_vm5, %v1455_v13, -inf }
 0x36d   :  { %1549 = vmax.xlane.f32.xlu1 %v1548_v16  ;;  %v8112_v18 = vpop.f32.mrf.mxu0 }
 0x36f   :  { %v1531_v19 = vpop.f32.mrf.mxu1 }
 0x370   :  { %v1551_v20 = vsel %vm1535_vm5, %v1531_v19, -inf }
 0x371   :  { %1552 = vmax.xlane.f32.xlu0 %v1551_v20  ;;  %v8117_v21 = vpop.f32.mrf.mxu1 }
 0x37e   :  { %2042 = vrot.lane.b32.xlu1 %v9307_v9, %s9060_s7 }
 0x382   :  { %2040 = vrot.lane.b32.xlu1 %v9313_v11, %s9060_s7 }
 0x386   :  { %2118 = vrot.lane.b32.xlu1 %v9324_v15, %s9060_s7 }
 0x387   :  { %2120 = vrot.lane.b32.xlu0 %v9316_v14, %s9060_s7 }
 0x3b6   :  { %v1538_v23 = vpop.xlane.xlu0 %1537 }
 0x3b7   :  { %v1554_v24 = vsub.f32 %v1151_v60, %v1538_v23 }
 0x3b9   :  { %v1560_v25 = vmul.f32 1.442695, %v1554_v24 }
 0x3ba   :  { %v1541_v27 = vpop.xlane.xlu1 %1540 }
 0x3bb   :  { %8773 = vpow2.f32 %v1560_v25  ;;  %v1555_v28 = vsub.f32 %v1227_v3, %v1541_v27 }
 0x3bd   :  { %v1562_v32 = vmul.f32 1.442695, %v1555_v28 }
 0x3bf   :  { %8775 = vpow2.f32 %v1562_v32 }
 0x3c8   :  { %v8774_v33 = vpop.eup %8773 }
 0x3c9   :  { %v1572_v36 = vsel %vm1535_vm5, %v8774_v33, 0.0 }
 0x3ca   :  { %1573 = vadd.xlane.f32.xlu1 %v1572_v36 }
 0x3cc   :  { %v8776_v37 = vpop.eup %8775 }
 0x3cd   :  { %v1575_v38 = vsel %vm1535_vm5, %v8776_v37, 0.0 }
 0x3ce   :  { %1576 = vadd.xlane.f32.xlu0 %v1575_v38 }
 0x3d6   :  { %v1544_v39 = vpop.xlane.xlu0 %1543 }
 0x3d7   :  { %v1556_v40 = vsub.f32 %v1303_v6, %v1544_v39 }
 0x3d9   :  { %v1564_v42 = vmul.f32 1.442695, %v1556_v40 }
 0x3da   :  { %v1547_v43 = vpop.xlane.xlu0 %1546 }
 0x3db   :  { %8777 = vpow2.f32 %v1564_v42  ;;  %v1557_v44 = vsub.f32 %v1379_v29, %v1547_v43 }
 0x3dd   :  { %v1566_v45 = vmul.f32 1.442695, %v1557_v44 }
 0x3df   :  { %8779 = vpow2.f32 %v1566_v45 }
 0x3e8   :  { %v8778_v47 = vpop.eup %8777 }
 0x3e9   :  { %v1578_v48 = vsel %vm1535_vm5, %v8778_v47, 0.0 }
 0x3ea   :  { %1579 = vadd.xlane.f32.xlu1 %v1578_v48 }
 0x3ec   :  { %v8780_v53 = vpop.eup %8779 }
 0x3ed   :  { %v1581_v54 = vsel %vm1535_vm5, %v8780_v53, 0.0 }
 0x3ee   :  { %1582 = vadd.xlane.f32.xlu0 %v1581_v54 }
 0x3f6   :  { %v1550_v60 = vpop.xlane.xlu1 %1549 }
 0x3f7   :  { %v1558_v61 = vsub.f32 %v1455_v13, %v1550_v60 }
 0x3f9   :  { %v1568_v63 = vmul.f32 1.442695, %v1558_v61 }
 0x3fa   :  { %v1553_v3 = vpop.xlane.xlu0 %1552  ;;  %v2043_v10 = vpop.permute.xlu1 %2042 }
 0x3fb   :  { %8781 = vpow2.f32 %v1568_v63  ;;  %v1559_v4 = vsub.f32 %v1531_v19, %v1553_v3 }
 0x3fd   :  { %v1570_v5 = vmul.f32 1.442695, %v1559_v4 }
 0x3fe   :  { %v2041_v12 = vpop.permute.xlu1 %2040  ;;  %v2121_v16 = vpop.permute.xlu0 %2120 }
 0x3ff   :  { %8783 = vpow2.f32 %v1570_v5 }
 0x402   :  { %v2119_v13 = vpop.permute.xlu1 %2118 }
 0x408   :  { %v8782_v6 = vpop.eup %8781 }
 0x409   :  { %v1584_v7 = vsel %vm1535_vm5, %v8782_v6, 0.0 }
 0x40a   :  { %1585 = vadd.xlane.f32.xlu1 %v1584_v7 }
 0x40c   :  { %v8784_v8 = vpop.eup %8783 }
 0x40d   :  { %v1587_v29 = vsel %vm1535_vm5, %v8784_v8, 0.0 }
 0x40e   :  { %1588 = vadd.xlane.f32.xlu0 %v1587_v29 }
 0x41b   :  { %2276 = vrot.lane.b32.xlu1 %v9350_v34, %s9060_s7 }
 0x41f   :  { %2274 = vrot.lane.b32.xlu1 %v9358_v35, %s9060_s7 }
 0x423   :  { %2432 = vrot.lane.b32.xlu1 %v9386_v57, %s9060_s7 }
 0x424   :  { %2198 = vrot.lane.b32.xlu0 %v9341_v26, %s9060_s7 }
 0x427   :  { %2430 = vrot.lane.b32.xlu1 %v9393_v58, %s9060_s7 }
 0x428   :  { %2196 = vrot.lane.b32.xlu0 %v9347_v31, %s9060_s7 }
 0x42c   :  { %2354 = vrot.lane.b32.xlu0 %v9374_v46, %s9060_s7 }
 0x430   :  { %2352 = vrot.lane.b32.xlu0 %v9380_v51, %s9060_s7 }
 0x453   :  { %v1574_v18 = vpop.xlane.xlu1 %1573 }
 0x454   :  { %8785 = vrcp.f32 %v1574_v18 }
 0x457   :  { %v1577_v19 = vpop.xlane.xlu0 %1576 }
 0x458   :  { %8787 = vrcp.f32 %v1577_v19 }
 0x461   :  { %v8786_v20 = vpop.eup %8785 }
 0x462   :  { %v1596_v21 = vmul.f32 %v8786_v20, %v8774_v33 }
 0x464   :  { %8121 = vmatmul.mubr.msk.f32.vlgmr.msra.gmra.mxu0 %vm1535_vm5, %v1596_v21 }
 0x465   :  { %v8788_v23 = vpop.eup %8787  ;;  %8129 = vmatpush3.msra.mxu0 %v9338_v22  ;;  %8130 = vmatprep.mubr.msk.f32.mxu0 %vm9059_vm0, %v9058_v1 }
 0x466   :  { %v1597_v24 = vmul.f32 %v8788_v23, %v8776_v37  ;;  %8138 = vmatprep.subr.mxu0 %v9058_v1 }
 0x468   :  { %8126 = vmatmul.mubr.msk.f32.vlgmr.msra.gmra.mxu1 %vm1535_vm5, %v1597_v24 }
 0x469   :  { %8134 = vmatpush3.msra.mxu1 %v9343_v30  ;;  %8135 = vmatprep.mubr.msk.f32.mxu1 %vm9059_vm0, %v9058_v1 }
 0x46a   :  { %8143 = vmatprep.subr.mxu1 %v9058_v1 }
 0x473   :  { %v1580_v25 = vpop.xlane.xlu1 %1579 }
 0x474   :  { %8789 = vrcp.f32 %v1580_v25 }
 0x477   :  { %v1583_v27 = vpop.xlane.xlu0 %1582 }
 0x478   :  { %8791 = vrcp.f32 %v1583_v27 }
 0x481   :  { %v8790_v28 = vpop.eup %8789 }
 0x482   :  { %v1598_v32 = vmul.f32 %v8790_v28, %v8778_v47 }
 0x484   :  { %8131 = vmatmul.mubr.msk.f32.vlgmr.msra.gmra.mxu0 %vm1535_vm5, %v1598_v32 }
 0x485   :  { %v8792_v33 = vpop.eup %8791  ;;  %8139 = vmatpush3.msra.mxu0 %v9370_v41  ;;  %8140 = vmatprep.mubr.msk.f32.mxu0 %vm9059_vm0, %v9058_v1 }
 0x486   :  { %v1599_v36 = vmul.f32 %v8792_v33, %v8780_v53  ;;  %8148 = vmatprep.subr.mxu0 %v9058_v1 }
 0x488   :  { %8136 = vmatmul.mubr.msk.f32.vlgmr.msra.gmra.mxu1 %vm1535_vm5, %v1599_v36 }
 0x489   :  { %8144 = vmatpush3.msra.mxu1 %v9376_v50  ;;  %8145 = vmatprep.mubr.msk.f32.mxu1 %vm9059_vm0, %v9058_v1 }
 0x48a   :  { %8153 = vmatprep.subr.mxu1 %v9058_v1 }
 0x493   :  { %v1586_v37 = vpop.xlane.xlu1 %1585 }
 0x494   :  { %8793 = vrcp.f32 %v1586_v37 }
 0x497   :  { %v1589_v38 = vpop.xlane.xlu0 %1588  ;;  %v2277_v42 = vpop.permute.xlu1 %2276 }
 0x498   :  { %8795 = vrcp.f32 %v1589_v38 }
 0x49b   :  { %v2199_v39 = vpop.permute.xlu0 %2198  ;;  %v2275_v48 = vpop.permute.xlu1 %2274 }
 0x49f   :  { %v2197_v44 = vpop.permute.xlu0 %2196  ;;  %v2433_v54 = vpop.permute.xlu1 %2432 }
 0x4a1   :  { %v8794_v40 = vpop.eup %8793 }
 0x4a2   :  { %v1600_v43 = vmul.f32 %v8794_v40, %v8782_v6 }
 0x4a3   :  { %v2355_v53 = vpop.permute.xlu0 %2354  ;;  %v2431_v61 = vpop.permute.xlu1 %2430 }
 0x4a4   :  { %8141 = vmatmul.mubr.msk.f32.vlgmr.msra.gmra.mxu0 %vm1535_vm5, %v1600_v43 }
 0x4a5   :  { %v8796_v45 = vpop.eup %8795  ;;  %8149 = vmatpush3.xpose.msk.msra.mxu0 %vm1078_vm4, %v2043_v10  ;;  %8150 = vmatprep.mubr.msk.f32.mxu0 %vm9059_vm0, %v9058_v1 }
 0x4a6   :  { %8158 = vmatprep.subr.mxu0 %v9058_v1  ;;  %v1601_v47 = vmul.f32 %v8796_v45, %v8784_v8 }
 0x4a7   :  { %v2353_v60 = vpop.permute.xlu0 %2352 }
 0x4a8   :  { %8146 = vmatmul.mubr.msk.f32.vlgmr.msra.gmra.mxu1 %vm1535_vm5, %v1601_v47  ;;  %8151 = vmatmul.mubr.msk.f32.vlgmr.msra.gmra.mxu0 %vm1078_vm4, %v2041_v12 }
 0x4a9   :  { %8154 = vmatpush3.xpose.msk.msra.mxu1 %vm1078_vm4, %v2121_v16  ;;  %8159 = vmatpush3.xpose.msk.msra.mxu0 %vm1078_vm4, %v2199_v39 }
 0x4aa   :  { %8155 = vmatprep.mubr.msk.f32.mxu1 %vm9059_vm0, %v9058_v1  ;;  %8160 = vmatprep.mubr.msk.f32.mxu0 %vm9059_vm0, %v9058_v1 }
 0x4ab   :  { %8163 = vmatprep.subr.mxu1 %v9058_v1  ;;  %8168 = vmatprep.subr.mxu0 %v9058_v1 }
 0x4ac   :  { %8156 = vmatmul.mubr.msk.f32.vlgmr.msra.gmra.mxu1 %vm1078_vm4, %v2119_v13  ;;  %8161 = vmatmul.mubr.msk.f32.vlgmr.msra.gmra.mxu0 %vm1078_vm4, %v2197_v44 }
 0x4ad   :  { %8164 = vmatpush3.xpose.msk.msra.mxu1 %vm1078_vm4, %v2277_v42  ;;  %8169 = vmatpush3.xpose.msk.msra.mxu0 %vm1078_vm4, %v2355_v53 }
 0x4ae   :  { %8165 = vmatprep.mubr.msk.f32.mxu1 %vm9059_vm0, %v9058_v1  ;;  %8170 = vmatprep.mubr.msk.f32.mxu0 %vm9059_vm0, %v9058_v1 }
 0x4af   :  { %8173 = vmatprep.subr.mxu1 %v9058_v1  ;;  %8178 = vmatprep.subr.mxu0 %v9058_v1 }
 0x4b0   :  { %8166 = vmatmul.mubr.msk.f32.vlgmr.msra.gmra.mxu1 %vm1078_vm4, %v2275_v48  ;;  %8171 = vmatmul.mubr.msk.f32.vlgmr.msra.gmra.mxu0 %vm1078_vm4, %v2353_v60 }
 0x4b1   :  { %8174 = vmatpush3.xpose.msk.msra.mxu1 %vm1078_vm4, %v2433_v54  ;;  %8175 = vmatprep.mubr.msk.f32.mxu1 %vm9059_vm0, %v9058_v1 }
 0x4b2   :  { %8183 = vmatprep.subr.mxu1 %v9058_v1  ;;  %8180 = vmatprep.mubr.msk.f32.mxu0 %vm9059_vm0, %v9058_v1 }
 0x4b4   :  { %8176 = vmatmul.mubr.msk.f32.vlgmr.msra.gmra.mxu1 %vm1078_vm4, %v2431_v61 }
 0x4b5   :  { %8185 = vmatprep.mubr.msk.f32.mxu1 %vm9059_vm0, %v9058_v1 }
 0x524   :  { %v9500_v63 = vpop.f32.mrf.mxu0 }
 0x526   :  { %v8122_v3 = vpop.f32.mrf.mxu0 }
 0x528   :  { %v9502_v4 = vpop.f32.mrf.mxu1 }
 0x52a   :  { %v8127_v5 = vpop.f32.mrf.mxu1 }
 0x544   :  { %v9504_v6 = vpop.f32.mrf.mxu0 }
 0x546   :  { %v8132_v7 = vpop.f32.mrf.mxu0 }
 0x548   :  { %v9506_v8 = vpop.f32.mrf.mxu1 }
 0x54a   :  { %v8137_v29 = vpop.f32.mrf.mxu1 }
 0x564   :  { %v9508_v10 = vpop.f32.mrf.mxu0 }
 0x566   :  { %v8142_v12 = vpop.f32.mrf.mxu0 }
 0x568   :  { %v9510_v13 = vpop.f32.mrf.mxu1  ;;  %v2114_v16 = vpop.f32.mrf.mxu0 }
 0x569   :  { %v2508_v18 = vsel %vm1535_vm5, %v2114_v16, -inf }
 0x56a   :  { %v8147_v19 = vpop.f32.mrf.mxu1  ;;  %2509 = vmax.xlane.f32.xlu0 %v2508_v18  ;;  %v8152_v20 = vpop.f32.mrf.mxu0 }
 0x56c   :  { %v2192_v21 = vpop.f32.mrf.mxu1  ;;  %v2270_v23 = vpop.f32.mrf.mxu0 }
 0x56d   :  { %v2511_v24 = vsel %vm1535_vm5, %v2192_v21, -inf  ;;  %v2514_v25 = vsel %vm1535_vm5, %v2270_v23, -inf }
 0x56e   :  { %2512 = vmax.xlane.f32.xlu1 %v2511_v24  ;;  %v8157_v27 = vpop.f32.mrf.mxu1  ;;  %2515 = vmax.xlane.f32.xlu0 %v2514_v25  ;;  %v8162_v28 = vpop.f32.mrf.mxu0 }
 0x570   :  { %v2348_v32 = vpop.f32.mrf.mxu1  ;;  %v2426_v33 = vpop.f32.mrf.mxu0 }
 0x571   :  { %v2517_v36 = vsel %vm1535_vm5, %v2348_v32, -inf  ;;  %v2520_v37 = vsel %vm1535_vm5, %v2426_v33, -inf }
 0x572   :  { %v8167_v38 = vpop.f32.mrf.mxu1  ;;  %2518 = vmax.xlane.f32.xlu0 %v2517_v36  ;;  %2521 = vmax.xlane.f32.xlu1 %v2520_v37  ;;  %v8172_v39 = vpop.f32.mrf.mxu0 }
 0x574   :  { %v2504_v40 = vpop.f32.mrf.mxu1 }
 0x575   :  { %v2523_v42 = vsel %vm1535_vm5, %v2504_v40, -inf }
 0x576   :  { %v8177_v43 = vpop.f32.mrf.mxu1  ;;  %2524 = vmax.xlane.f32.xlu0 %v2523_v42 }
 0x583   :  { %2575 = vrot.lane.b32.xlu1 %v9384_v56, %s9060_s7 }
 0x587   :  { %2729 = vrot.lane.b32.xlu1 %v9338_v22, %s9060_s7 }
 0x58b   :  { %2806 = vrot.lane.b32.xlu1 %v9343_v30, %s9060_s7 }
 0x58c   :  { %2652 = vrot.lane.b32.xlu0 %v9399_v59, %s9060_s7 }
 0x58f   :  { %2960 = vrot.lane.b32.xlu1 %v9376_v50, %s9060_s7 }
 0x590   :  { %2883 = vrot.lane.b32.xlu0 %v9370_v41, %s9060_s7 }
 0x593   :  { %3116 = vrot.lane.b32.xlu1 %v9316_v14, %s9048_s30 }
 0x594   :  { %3038 = vrot.lane.b32.xlu0 %v9307_v9, %s9048_s30 }
 0x597   :  { %3114 = vrot.lane.b32.xlu1 %v9324_v15, %s9048_s30 }
 0x598   :  { %3036 = vrot.lane.b32.xlu0 %v9313_v11, %s9048_s30 }
 0x5f3   :  { %v2510_v44 = vpop.xlane.xlu0 %2509 }
 0x5f4   :  { %v2526_v45 = vsub.f32 %v2114_v16, %v2510_v44 }
 0x5f6   :  { %v2532_v47 = vmul.f32 1.442695, %v2526_v45 }
 0x5f7   :  { %v2513_v48 = vpop.xlane.xlu1 %2512  ;;  %v2516_v53 = vpop.xlane.xlu0 %2515 }
 0x5f8   :  { %8797 = vpow2.f32 %v2532_v47  ;;  %v2527_v54 = vsub.f32 %v2192_v21, %v2513_v48  ;;  %v2528_v60 = vsub.f32 %v2270_v23, %v2516_v53 }
 0x5fa   :  { %v2534_v61 = vmul.f32 1.442695, %v2527_v54  ;;  %v2536_v3 = vmul.f32 1.442695, %v2528_v60 }
 0x5fb   :  { %v2519_v5 = vpop.xlane.xlu0 %2518  ;;  %v2522_v7 = vpop.xlane.xlu1 %2521 }
 0x5fc   :  { %8799 = vpow2.f32 %v2534_v61  ;;  %v2529_v29 = vsub.f32 %v2348_v32, %v2519_v5  ;;  %v2530_v12 = vsub.f32 %v2426_v33, %v2522_v7 }
 0x5fd   :  { %8801 = vpow2.f32 %v2536_v3 }
 0x5fe   :  { %v2538_v18 = vmul.f32 1.442695, %v2529_v29  ;;  %v2540_v19 = vmul.f32 1.442695, %v2530_v12 }
 0x5ff   :  { %v2525_v20 = vpop.xlane.xlu0 %2524  ;;  %v2576_v24 = vpop.permute.xlu1 %2575 }
 0x600   :  { %8803 = vpow2.f32 %v2538_v18  ;;  %v2531_v16 = vsub.f32 %v2504_v40, %v2525_v20  ;;  %8179 = vmatpush3.msra.mxu0 %v2576_v24 }
 0x601   :  { %8805 = vpow2.f32 %v2540_v19  ;;  %8188 = vmatprep.subr.mxu0 %v9058_v1 }
 0x602   :  { %v2542_v21 = vmul.f32 1.442695, %v2531_v16 }
 0x603   :  { %v2653_v23 = vpop.permute.xlu0 %2652  ;;  %v2730_v44 = vpop.permute.xlu1 %2729 }
 0x604   :  { %8807 = vpow2.f32 %v2542_v21  ;;  %8184 = vmatpush3.msra.mxu1 %v2653_v23 }
 0x605   :  { %v8798_v25 = vpop.eup %8797  ;;  %8193 = vmatprep.subr.mxu1 %v9058_v1 }
 0x606   :  { %v2544_v27 = vsel %vm1535_vm5, %v8798_v25, 0.0 }
 0x607   :  { %2545 = vadd.xlane.f32.xlu1 %v2544_v27  ;;  %v2807_v45 = vpop.permute.xlu1 %2806  ;;  %v2884_v48 = vpop.permute.xlu0 %2883 }
 0x609   :  { %v8800_v28 = vpop.eup %8799 }
 0x60a   :  { %v8802_v32 = vpop.eup %8801  ;;  %v2547_v33 = vsel %vm1535_vm5, %v8800_v28, 0.0 }
 0x60b   :  { %2548 = vadd.xlane.f32.xlu0 %v2547_v33  ;;  %v2550_v36 = vsel %vm1535_vm5, %v8802_v32, 0.0  ;;  %v2961_v47 = vpop.permute.xlu1 %2960  ;;  %v3039_v54 = vpop.permute.xlu0 %3038 }
 0x60c   :  { %2551 = vadd.xlane.f32.xlu1 %v2550_v36 }
 0x60d   :  { %v8804_v37 = vpop.eup %8803 }
 0x60e   :  { %v8806_v38 = vpop.eup %8805  ;;  %v2553_v39 = vsel %vm1535_vm5, %v8804_v37, 0.0 }
 0x60f   :  { %2554 = vadd.xlane.f32.xlu0 %v2553_v39  ;;  %v2556_v40 = vsel %vm1535_vm5, %v8806_v38, 0.0  ;;  %v3117_v53 = vpop.permute.xlu1 %3116  ;;  %v3037_v61 = vpop.permute.xlu0 %3036 }
 0x610   :  { %2557 = vadd.xlane.f32.xlu1 %v2556_v40 }
 0x611   :  { %v8808_v42 = vpop.eup %8807 }
 0x612   :  { %v2559_v43 = vsel %vm1535_vm5, %v8808_v42, 0.0 }
 0x613   :  { %2560 = vadd.xlane.f32.xlu0 %v2559_v43  ;;  %v3115_v60 = vpop.permute.xlu1 %3114 }
 0x621   :  { %3272 = vrot.lane.b32.xlu1 %v9350_v34, %s9048_s30 }
 0x625   :  { %3270 = vrot.lane.b32.xlu1 %v9358_v35, %s9048_s30 }
 0x629   :  { %3428 = vrot.lane.b32.xlu1 %v9386_v57, %s9048_s30  ;;  %3194 = vrot.lane.b32.xlu0 %v9341_v26, %s9048_s30 }
 0x62d   :  { %3426 = vrot.lane.b32.xlu1 %v9393_v58, %s9048_s30  ;;  %3192 = vrot.lane.b32.xlu0 %v9347_v31, %s9048_s30 }
 0x631   :  { %3350 = vrot.lane.b32.xlu0 %v9374_v46, %s9048_s30 }
 0x635   :  { %3348 = vrot.lane.b32.xlu0 %v9380_v51, %s9048_s30 }
 0x690   :  { %v2546_v3 = vpop.xlane.xlu1 %2545 }
 0x691   :  { %8809 = vrcp.f32 %v2546_v3 }
 0x694   :  { %v2549_v5 = vpop.xlane.xlu0 %2548 }
 0x695   :  { %8811 = vrcp.f32 %v2549_v5  ;;  %v2552_v7 = vpop.xlane.xlu1 %2551 }
 0x696   :  { %8813 = vrcp.f32 %v2552_v7 }
 0x698   :  { %v2555_v29 = vpop.xlane.xlu0 %2554 }
 0x699   :  { %8815 = vrcp.f32 %v2555_v29  ;;  %v2558_v12 = vpop.xlane.xlu1 %2557 }
 0x69a   :  { %8817 = vrcp.f32 %v2558_v12 }
 0x69c   :  { %v2561_v18 = vpop.xlane.xlu0 %2560 }
 0x69d   :  { %8819 = vrcp.f32 %v2561_v18  ;;  %v3273_v36 = vpop.permute.xlu1 %3272 }
 0x69e   :  { %v8810_v19 = vpop.eup %8809 }
 0x69f   :  { %v2568_v20 = vmul.f32 %v8810_v19, %v8798_v25 }
 0x6a0   :  { %v3195_v21 = vpop.permute.xlu0 %3194 }
 0x6a1   :  { %8181 = vmatmul.mubr.msk.f32.vlgmr.msra.gmra.mxu0 %vm1535_vm5, %v2568_v20  ;;  %v3271_v43 = vpop.permute.xlu1 %3270 }
 0x6a2   :  { %v8812_v24 = vpop.eup %8811  ;;  %8189 = vmatpush3.msra.mxu0 %v2730_v44  ;;  %8190 = vmatprep.mubr.msk.f32.mxu0 %vm9059_vm0, %v9058_v1 }
 0x6a3   :  { %v8814_v16 = vpop.eup %8813  ;;  %8198 = vmatprep.subr.mxu0 %v9058_v1  ;;  %v2569_v23 = vmul.f32 %v8812_v24, %v8800_v28 }
 0x6a4   :  { %v2570_v27 = vmul.f32 %v8814_v16, %v8802_v32  ;;  %v3193_v32 = vpop.permute.xlu0 %3192 }
 0x6a5   :  { %8186 = vmatmul.mubr.msk.f32.vlgmr.msra.gmra.mxu1 %vm1535_vm5, %v2569_v23 }
 0x6a6   :  { %v8816_v33 = vpop.eup %8815  ;;  %8191 = vmatmul.mubr.msk.f32.vlgmr.msra.gmra.mxu0 %vm1535_vm5, %v2570_v27  ;;  %8194 = vmatpush3.msra.mxu1 %v2807_v45 }
 0x6a7   :  { %v8818_v25 = vpop.eup %8817  ;;  %8199 = vmatpush3.msra.mxu0 %v2884_v48  ;;  %8195 = vmatprep.mubr.msk.f32.mxu1 %vm9059_vm0, %v9058_v1  ;;  %v2571_v39 = vmul.f32 %v8816_v33, %v8804_v37 }
 0x6a8   :  { %8200 = vmatprep.mubr.msk.f32.mxu0 %vm9059_vm0, %v9058_v1  ;;  %8203 = vmatprep.subr.mxu1 %v9058_v1  ;;  %v2572_v28 = vmul.f32 %v8818_v25, %v8806_v38  ;;  %v3351_v38 = vpop.permute.xlu0 %3350 }
 0x6a9   :  { %8208 = vmatprep.subr.mxu0 %v9058_v1  ;;  %8196 = vmatmul.mubr.msk.f32.vlgmr.msra.gmra.mxu1 %vm1535_vm5, %v2571_v39 }
 0x6aa   :  { %v8820_v40 = vpop.eup %8819  ;;  %8201 = vmatmul.mubr.msk.f32.vlgmr.msra.gmra.mxu0 %vm1535_vm5, %v2572_v28  ;;  %8204 = vmatpush3.msra.mxu1 %v2961_v47 }
 0x6ab   :  { %8209 = vmatpush3.xpose.msk.msra.mxu0 %vm1078_vm4, %v3039_v54  ;;  %8205 = vmatprep.mubr.msk.f32.mxu1 %vm9059_vm0, %v9058_v1  ;;  %v2573_v37 = vmul.f32 %v8820_v40, %v8808_v42  ;;  %v3429_v42 = vpop.permute.xlu1 %3428 }
 0x6ac   :  { %8210 = vmatprep.mubr.msk.f32.mxu0 %vm9059_vm0, %v9058_v1  ;;  %8213 = vmatprep.subr.mxu1 %v9058_v1  ;;  %v3349_v44 = vpop.permute.xlu0 %3348 }
 0x6ad   :  { %8218 = vmatprep.subr.mxu0 %v9058_v1  ;;  %8206 = vmatmul.mubr.msk.f32.vlgmr.msra.gmra.mxu1 %vm1535_vm5, %v2573_v37 }
 0x6ae   :  { %8211 = vmatmul.mubr.msk.f32.vlgmr.msra.gmra.mxu0 %vm1078_vm4, %v3037_v61  ;;  %8214 = vmatpush3.xpose.msk.msra.mxu1 %vm1078_vm4, %v3117_v53 }
 0x6af   :  { %8219 = vmatpush3.xpose.msk.msra.mxu0 %vm1078_vm4, %v3195_v21  ;;  %8215 = vmatprep.mubr.msk.f32.mxu1 %vm9059_vm0, %v9058_v1  ;;  %v3427_v45 = vpop.permute.xlu1 %3426 }
 0x6b0   :  { %8220 = vmatprep.mubr.msk.f32.mxu0 %vm9059_vm0, %v9058_v1  ;;  %8223 = vmatprep.subr.mxu1 %v9058_v1 }
 0x6b1   :  { %8228 = vmatprep.subr.mxu0 %v9058_v1  ;;  %8216 = vmatmul.mubr.msk.f32.vlgmr.msra.gmra.mxu1 %vm1078_vm4, %v3115_v60 }
 0x6b2   :  { %8221 = vmatmul.mubr.msk.f32.vlgmr.msra.gmra.mxu0 %vm1078_vm4, %v3193_v32  ;;  %8224 = vmatpush3.xpose.msk.msra.mxu1 %vm1078_vm4, %v3273_v36 }
 0x6b3   :  { %8229 = vmatpush3.xpose.msk.msra.mxu0 %vm1078_vm4, %v3351_v38  ;;  %8225 = vmatprep.mubr.msk.f32.mxu1 %vm9059_vm0, %v9058_v1 }
 0x6b4   :  { %8230 = vmatprep.mubr.msk.f32.mxu0 %vm9059_vm0, %v9058_v1  ;;  %8233 = vmatprep.subr.mxu1 %v9058_v1 }
 0x6b5   :  { %8226 = vmatmul.mubr.msk.f32.vlgmr.msra.gmra.mxu1 %vm1078_vm4, %v3271_v43  ;;  %8238 = vmatprep.subr.mxu0 %v9058_v1 }
 0x6b6   :  { %8231 = vmatmul.mubr.msk.f32.vlgmr.msra.gmra.mxu0 %vm1078_vm4, %v3349_v44  ;;  %8234 = vmatpush3.xpose.msk.msra.mxu1 %vm1078_vm4, %v3429_v42 }
 0x6b7   :  { %8235 = vmatprep.mubr.msk.f32.mxu1 %vm9059_vm0, %v9058_v1  ;;  %8243 = vmatprep.subr.mxu1 %v9058_v1 }
 0x6b8   :  { %8240 = vmatprep.mubr.msk.f32.mxu0 %vm9059_vm0, %v9058_v1 }
 0x6b9   :  { %8236 = vmatmul.mubr.msk.f32.vlgmr.msra.gmra.mxu1 %vm1078_vm4, %v3427_v45 }
 0x6ba   :  { %8245 = vmatprep.mubr.msk.f32.mxu1 %vm9059_vm0, %v9058_v1 }
 0x761   :  { %v9614_v47 = vpop.f32.mrf.mxu0 }
 0x763   :  { %v8182_v48 = vpop.f32.mrf.mxu0 }
 0x765   :  { %v9616_v53 = vpop.f32.mrf.mxu1 }
 0x766   :  { %v9618_v54 = vpop.f32.mrf.mxu0 }
 0x767   :  { %v8187_v60 = vpop.f32.mrf.mxu1 }
 0x768   :  { %v8192_v61 = vpop.f32.mrf.mxu0 }
 0x769   :  { %v9620_v3 = vpop.f32.mrf.mxu1 }
 0x76a   :  { %v9622_v5 = vpop.f32.mrf.mxu0 }
 0x76b   :  { %v8197_v7 = vpop.f32.mrf.mxu1 }
 0x76c   :  { %v8202_v29 = vpop.f32.mrf.mxu0 }
 0x76d   :  { %v9624_v12 = vpop.f32.mrf.mxu1 }
 0x76e   :  { %v3110_v18 = vpop.f32.mrf.mxu0 }
 0x76f   :  { %v8207_v19 = vpop.f32.mrf.mxu1  ;;  %v3504_v20 = vsel %vm1535_vm5, %v3110_v18, -inf }
 0x770   :  { %3505 = vmax.xlane.f32.xlu0 %v3504_v20  ;;  %v8212_v24 = vpop.f32.mrf.mxu0 }
 0x771   :  { %v3188_v16 = vpop.f32.mrf.mxu1 }
 0x772   :  { %v3266_v21 = vpop.f32.mrf.mxu0  ;;  %v3507_v23 = vsel %vm1535_vm5, %v3188_v16, -inf }
 0x773   :  { %3508 = vmax.xlane.f32.xlu1 %v3507_v23  ;;  %v8217_v27 = vpop.f32.mrf.mxu1  ;;  %v3510_v33 = vsel %vm1535_vm5, %v3266_v21, -inf }
 0x774   :  { %3511 = vmax.xlane.f32.xlu0 %v3510_v33  ;;  %v8222_v36 = vpop.f32.mrf.mxu0 }
 0x775   :  { %v3344_v25 = vpop.f32.mrf.mxu1 }
 0x776   :  { %v3422_v39 = vpop.f32.mrf.mxu0  ;;  %v3513_v28 = vsel %vm1535_vm5, %v3344_v25, -inf }
 0x777   :  { %v8227_v32 = vpop.f32.mrf.mxu1  ;;  %v3516_v40 = vsel %vm1535_vm5, %v3422_v39, -inf }
 0x778   :  { %3514 = vmax.xlane.f32.xlu0 %v3513_v28  ;;  %3517 = vmax.xlane.f32.xlu1 %v3516_v40  ;;  %v8232_v37 = vpop.f32.mrf.mxu0 }
 0x779   :  { %v3500_v43 = vpop.f32.mrf.mxu1 }
 0x77a   :  { %v3519_v38 = vsel %vm1535_vm5, %v3500_v43, -inf }
 0x77b   :  { %v8237_v42 = vpop.f32.mrf.mxu1 }
 0x77c   :  { %3520 = vmax.xlane.f32.xlu0 %v3519_v38 }
 0x789   :  { %3570 = vrot.lane.b32.xlu1 %v9384_v56, %s9048_s30 }
 0x78d   :  { %3722 = vrot.lane.b32.xlu1 %v9338_v22, %s9048_s30 }
 0x791   :  { %3798 = vrot.lane.b32.xlu1 %v9343_v30, %s9048_s30 }
 0x792   :  { %3646 = vrot.lane.b32.xlu0 %v9399_v59, %s9048_s30 }
 0x795   :  { %3950 = vrot.lane.b32.xlu1 %v9376_v50, %s9048_s30 }
 0x796   :  { %3874 = vrot.lane.b32.xlu0 %v9370_v41, %s9048_s30 }
 0x799   :  { %4106 = vrot.lane.b32.xlu1 %v9316_v14, %s9061_s25 }
 0x79a   :  { %4028 = vrot.lane.b32.xlu0 %v9307_v9, %s9061_s25 }
 0x7f9   :  { %v3506_v44 = vpop.xlane.xlu0 %3505 }
 0x7fa   :  { %v3522_v45 = vsub.f32 %v3110_v18, %v3506_v44 }
 0x7fc   :  { %v3528_v48 = vmul.f32 1.442695, %v3522_v45  ;;  %v3509_v60 = vpop.xlane.xlu1 %3508 }
 0x7fd   :  { %v3523_v61 = vsub.f32 %v3188_v16, %v3509_v60  ;;  %v3512_v7 = vpop.xlane.xlu0 %3511 }
 0x7fe   :  { %8821 = vpow2.f32 %v3528_v48  ;;  %v3524_v29 = vsub.f32 %v3266_v21, %v3512_v7 }
 0x7ff   :  { %v3530_v19 = vmul.f32 1.442695, %v3523_v61 }
 0x800   :  { %v3532_v20 = vmul.f32 1.442695, %v3524_v29 }
 0x801   :  { %8823 = vpow2.f32 %v3530_v19  ;;  %v3515_v24 = vpop.xlane.xlu0 %3514  ;;  %v3518_v23 = vpop.xlane.xlu1 %3517 }
 0x802   :  { %8825 = vpow2.f32 %v3532_v20  ;;  %v3525_v27 = vsub.f32 %v3344_v25, %v3515_v24  ;;  %v3526_v33 = vsub.f32 %v3422_v39, %v3518_v23 }
 0x804   :  { %v3534_v14 = vmul.f32 1.442695, %v3525_v27  ;;  %v3536_v36 = vmul.f32 1.442695, %v3526_v33 }
 0x805   :  { %v3521_v28 = vpop.xlane.xlu0 %3520  ;;  %v3571_v9 = vpop.permute.xlu1 %3570 }
 0x806   :  { %8827 = vpow2.f32 %v3534_v14  ;;  %v3527_v18 = vsub.f32 %v3500_v43, %v3521_v28  ;;  %8239 = vmatpush3.msra.mxu0 %v3571_v9 }
 0x807   :  { %8829 = vpow2.f32 %v3536_v36  ;;  %8248 = vmatprep.subr.mxu0 %v9058_v1 }
 0x808   :  { %v3538_v16 = vmul.f32 1.442695, %v3527_v18 }
 0x809   :  { %v3647_v21 = vpop.permute.xlu0 %3646 }
 0x80a   :  { %8831 = vpow2.f32 %v3538_v16  ;;  %8244 = vmatpush3.msra.mxu1 %v3647_v21 }
 0x80b   :  { %v8822_v32 = vpop.eup %8821  ;;  %8253 = vmatprep.subr.mxu1 %v9058_v1 }
 0x80c   :  { %v3540_v25 = vsel %vm1535_vm5, %v8822_v32, 0.0 }
 0x80d   :  { %3541 = vadd.xlane.f32.xlu1 %v3540_v25 }
 0x80e   :  { %v8824_v39 = vpop.eup %8823 }
 0x80f   :  { %v8826_v40 = vpop.eup %8825  ;;  %v3543_v37 = vsel %vm1535_vm5, %v8824_v39, 0.0 }
 0x810   :  { %3544 = vadd.xlane.f32.xlu0 %v3543_v37  ;;  %v3546_v43 = vsel %vm1535_vm5, %v8826_v40, 0.0 }
 0x811   :  { %3547 = vadd.xlane.f32.xlu1 %v3546_v43 }
 0x813   :  { %v8828_v38 = vpop.eup %8827 }
 0x814   :  { %v8830_v42 = vpop.eup %8829  ;;  %v3549_v44 = vsel %vm1535_vm5, %v8828_v38, 0.0 }
 0x815   :  { %3550 = vadd.xlane.f32.xlu0 %v3549_v44  ;;  %v3552_v45 = vsel %vm1535_vm5, %v8830_v42, 0.0 }
 0x816   :  { %3553 = vadd.xlane.f32.xlu1 %v3552_v45 }
 0x817   :  { %v9655_v48 = vpop.eup %8831 }
 0x818   :  { %v3555_v60 = vsel %vm1535_vm5, %v9655_v48, 0.0 }
 0x819   :  { %3556 = vadd.xlane.f32.xlu0 %v3555_v60 }
 0x827   :  { %4104 = vrot.lane.b32.xlu1 %v9324_v15, %s9061_s25  ;;  %v3723_v15 = vpop.permute.xlu1 %3722 }
 0x82b   :  { %4262 = vrot.lane.b32.xlu1 %v9350_v34, %s9061_s25 }
 0x82f   :  { %4260 = vrot.lane.b32.xlu1 %v9358_v35, %s9061_s25  ;;  %4026 = vrot.lane.b32.xlu0 %v9313_v11, %s9061_s25  ;;  %v3799_v11 = vpop.permute.xlu1 %3798  ;;  %v3875_v35 = vpop.permute.xlu0 %3874 }
 0x833   :  { %4418 = vrot.lane.b32.xlu1 %v9386_v57, %s9061_s25  ;;  %4184 = vrot.lane.b32.xlu0 %v9341_v26, %s9061_s25  ;;  %v3951_v34 = vpop.permute.xlu1 %3950  ;;  %v4029_v61 = vpop.permute.xlu0 %4028 }
 0x837   :  { %4416 = vrot.lane.b32.xlu1 %v9393_v58, %s9061_s25  ;;  %4182 = vrot.lane.b32.xlu0 %v9347_v31, %s9061_s25  ;;  %v4107_v57 = vpop.permute.xlu1 %4106 }
 0x83b   :  { %4340 = vrot.lane.b32.xlu0 %v9374_v46, %s9061_s25 }
 0x83f   :  { %4338 = vrot.lane.b32.xlu0 %v9380_v51, %s9061_s25 }
 0x896   :  { %v3542_v7 = vpop.xlane.xlu1 %3541 }
 0x897   :  { %8833 = vrcp.f32 %v3542_v7 }
 0x899   :  { %v3545_v26 = vpop.xlane.xlu0 %3544 }
 0x89a   :  { %8835 = vrcp.f32 %v3545_v26  ;;  %v3548_v58 = vpop.xlane.xlu1 %3547 }
 0x89b   :  { %8837 = vrcp.f32 %v3548_v58 }
 0x89e   :  { %v3551_v29 = vpop.xlane.xlu0 %3550 }
 0x89f   :  { %8839 = vrcp.f32 %v3551_v29  ;;  %v3554_v31 = vpop.xlane.xlu1 %3553 }
 0x8a0   :  { %8841 = vrcp.f32 %v3554_v31 }
 0x8a2   :  { %v3557_v46 = vpop.xlane.xlu0 %3556 }
 0x8a3   :  { %8843 = vrcp.f32 %v3557_v46  ;;  %v4105_v20 = vpop.permute.xlu1 %4104 }
 0x8a4   :  { %v8834_v19 = vpop.eup %8833 }
 0x8a5   :  { %v3564_v51 = vmul.f32 %v8834_v19, %v8822_v32 }
 0x8a6   :  { %v4027_v24 = vpop.permute.xlu0 %4026 }
 0x8a7   :  { %v8836_v23 = vpop.eup %8835  ;;  %8241 = vmatmul.mubr.msk.f32.vlgmr.msra.gmra.mxu0 %vm1535_vm5, %v3564_v51  ;;  %v4263_v9 = vpop.permute.xlu1 %4262 }
 0x8a8   :  { %v8838_v27 = vpop.eup %8837  ;;  %8249 = vmatpush3.msra.mxu0 %v3723_v15  ;;  %8250 = vmatprep.mubr.msk.f32.mxu0 %vm9059_vm0, %v9058_v1  ;;  %v3565_v33 = vmul.f32 %v8836_v23, %v8824_v39 }
 0x8a9   :  { %8258 = vmatprep.subr.mxu0 %v9058_v1  ;;  %v3566_v14 = vmul.f32 %v8838_v27, %v8826_v40 }
 0x8aa   :  { %v4185_v36 = vpop.permute.xlu0 %4184  ;;  %8246 = vmatmul.mubr.msk.f32.vlgmr.msra.gmra.mxu1 %vm1535_vm5, %v3565_v33 }
 0x8ab   :  { %8251 = vmatmul.mubr.msk.f32.vlgmr.msra.gmra.mxu0 %vm1535_vm5, %v3566_v14  ;;  %8254 = vmatpush3.msra.mxu1 %v3799_v11  ;;  %v4261_v40 = vpop.permute.xlu1 %4260 }
 0x8ac   :  { %v8840_v28 = vpop.eup %8839  ;;  %8259 = vmatpush3.msra.mxu0 %v3875_v35  ;;  %8255 = vmatprep.mubr.msk.f32.mxu1 %vm9059_vm0, %v9058_v1 }
 0x8ad   :  { %v8842_v18 = vpop.eup %8841  ;;  %8260 = vmatprep.mubr.msk.f32.mxu0 %vm9059_vm0, %v9058_v1  ;;  %8263 = vmatprep.subr.mxu1 %v9058_v1  ;;  %v3567_v16 = vmul.f32 %v8840_v28, %v8828_v38 }
 0x8ae   :  { %8268 = vmatprep.subr.mxu0 %v9058_v1  ;;  %v3568_v21 = vmul.f32 %v8842_v18, %v8830_v42  ;;  %v4183_v32 = vpop.permute.xlu0 %4182 }
 0x8af   :  { %8256 = vmatmul.mubr.msk.f32.vlgmr.msra.gmra.mxu1 %vm1535_vm5, %v3567_v16  ;;  %v4419_v43 = vpop.permute.xlu1 %4418 }
 0x8b0   :  { %v8844_v25 = vpop.eup %8843  ;;  %8261 = vmatmul.mubr.msk.f32.vlgmr.msra.gmra.mxu0 %vm1535_vm5, %v3568_v21  ;;  %8264 = vmatpush3.msra.mxu1 %v3951_v34 }
 0x8b1   :  { %8269 = vmatpush3.xpose.msk.msra.mxu0 %vm1078_vm4, %v4029_v61  ;;  %8265 = vmatprep.mubr.msk.f32.mxu1 %vm9059_vm0, %v9058_v1  ;;  %v3569_v39 = vmul.f32 %v8844_v25, %v9655_v48 }
 0x8b2   :  { %8270 = vmatprep.mubr.msk.f32.mxu0 %vm9059_vm0, %v9058_v1  ;;  %8273 = vmatprep.subr.mxu1 %v9058_v1  ;;  %v4341_v37 = vpop.permute.xlu0 %4340 }
 0x8b3   :  { %8278 = vmatprep.subr.mxu0 %v9058_v1  ;;  %8266 = vmatmul.mubr.msk.f32.vlgmr.msra.gmra.mxu1 %vm1535_vm5, %v3569_v39  ;;  %v4417_v42 = vpop.permute.xlu1 %4416 }
 0x8b4   :  { %8271 = vmatmul.mubr.msk.f32.vlgmr.msra.gmra.mxu0 %vm1078_vm4, %v4027_v24  ;;  %8274 = vmatpush3.xpose.msk.msra.mxu1 %vm1078_vm4, %v4107_v57 }
 0x8b5   :  { %8279 = vmatpush3.xpose.msk.msra.mxu0 %vm1078_vm4, %v4185_v36  ;;  %8275 = vmatprep.mubr.msk.f32.mxu1 %vm9059_vm0, %v9058_v1 }
 0x8b6   :  { %8280 = vmatprep.mubr.msk.f32.mxu0 %vm9059_vm0, %v9058_v1  ;;  %8283 = vmatprep.subr.mxu1 %v9058_v1  ;;  %v4339_v38 = vpop.permute.xlu0 %4338 }
 0x8b7   :  { %8288 = vmatprep.subr.mxu0 %v9058_v1  ;;  %8276 = vmatmul.mubr.msk.f32.vlgmr.msra.gmra.mxu1 %vm1078_vm4, %v4105_v20 }
 0x8b8   :  { %8281 = vmatmul.mubr.msk.f32.vlgmr.msra.gmra.mxu0 %vm1078_vm4, %v4183_v32  ;;  %8284 = vmatpush3.xpose.msk.msra.mxu1 %vm1078_vm4, %v4263_v9 }
 0x8b9   :  { %8289 = vmatpush3.xpose.msk.msra.mxu0 %vm1078_vm4, %v4341_v37  ;;  %8285 = vmatprep.mubr.msk.f32.mxu1 %vm9059_vm0, %v9058_v1 }
 0x8ba   :  { %8290 = vmatprep.mubr.msk.f32.mxu0 %vm9059_vm0, %v9058_v1  ;;  %8293 = vmatprep.subr.mxu1 %v9058_v1 }
 0x8bb   :  { %8286 = vmatmul.mubr.msk.f32.vlgmr.msra.gmra.mxu1 %vm1078_vm4, %v4261_v40  ;;  %8298 = vmatprep.subr.mxu0 %v9058_v1 }
 0x8bc   :  { %8291 = vmatmul.mubr.msk.f32.vlgmr.msra.gmra.mxu0 %vm1078_vm4, %v4339_v38  ;;  %8294 = vmatpush3.xpose.msk.msra.mxu1 %vm1078_vm4, %v4419_v43 }
 0x8bd   :  { %8295 = vmatprep.mubr.msk.f32.mxu1 %vm9059_vm0, %v9058_v1  ;;  %8303 = vmatprep.subr.mxu1 %v9058_v1 }
 0x8be   :  { %8300 = vmatprep.mubr.msk.f32.mxu0 %vm9059_vm0, %v9058_v1 }
 0x8bf   :  { %8296 = vmatmul.mubr.msk.f32.vlgmr.msra.gmra.mxu1 %vm1078_vm4, %v4417_v42 }
 0x8c0   :  { %8305 = vmatprep.mubr.msk.f32.mxu1 %vm9059_vm0, %v9058_v1 }
 0x967   :  { %v9732_v44 = vpop.f32.mrf.mxu0 }
 0x969   :  { %v8242_v45 = vpop.f32.mrf.mxu0 }
 0x96a   :  { %v9734_v48 = vpop.f32.mrf.mxu1 }
 0x96b   :  { %v9736_v60 = vpop.f32.mrf.mxu0 }
 0x96c   :  { %v8247_v15 = vpop.f32.mrf.mxu1 }
 0x96d   :  { %v8252_v11 = vpop.f32.mrf.mxu0 }
 0x96f   :  { %v9738_v34 = vpop.f32.mrf.mxu1 }
 0x970   :  { %v9740_v35 = vpop.f32.mrf.mxu0 }
 0x971   :  { %v8257_v57 = vpop.f32.mrf.mxu1 }
 0x972   :  { %v8262_v61 = vpop.f32.mrf.mxu0 }
 0x973   :  { %v9742_v7 = vpop.f32.mrf.mxu1 }
 0x974   :  { %v4100_v26 = vpop.f32.mrf.mxu0 }
 0x975   :  { %v8267_v58 = vpop.f32.mrf.mxu1  ;;  %v4494_v29 = vsel %vm1535_vm5, %v4100_v26, -inf }
 0x976   :  { %4495 = vmax.xlane.f32.xlu0 %v4494_v29  ;;  %v8272_v31 = vpop.f32.mrf.mxu0 }
 0x977   :  { %v4178_v46 = vpop.f32.mrf.mxu1 }
 0x978   :  { %v4256_v19 = vpop.f32.mrf.mxu0  ;;  %v4497_v51 = vsel %vm1535_vm5, %v4178_v46, -inf }
 0x979   :  { %4498 = vmax.xlane.f32.xlu1 %v4497_v51  ;;  %v8277_v20 = vpop.f32.mrf.mxu1  ;;  %v4500_v24 = vsel %vm1535_vm5, %v4256_v19, -inf }
 0x97a   :  { %4501 = vmax.xlane.f32.xlu0 %v4500_v24  ;;  %v8282_v23 = vpop.f32.mrf.mxu0 }
 0x97b   :  { %v4334_v27 = vpop.f32.mrf.mxu1 }
 0x97c   :  { %v4412_v33 = vpop.f32.mrf.mxu0  ;;  %v4503_v14 = vsel %vm1535_vm5, %v4334_v27, -inf }
 0x97d   :  { %v8287_v36 = vpop.f32.mrf.mxu1  ;;  %v4506_v28 = vsel %vm1535_vm5, %v4412_v33, -inf }
 0x97e   :  { %4504 = vmax.xlane.f32.xlu0 %v4503_v14  ;;  %4507 = vmax.xlane.f32.xlu1 %v4506_v28  ;;  %v8292_v9 = vpop.f32.mrf.mxu0 }
 0x97f   :  { %v4490_v18 = vpop.f32.mrf.mxu1 }
 0x980   :  { %v4509_v16 = vsel %vm1535_vm5, %v4490_v18, -inf }
 0x981   :  { %v8297_v21 = vpop.f32.mrf.mxu1 }
 0x982   :  { %4510 = vmax.xlane.f32.xlu0 %v4509_v16 }
 0x98f   :  { %4560 = vrot.lane.b32.xlu1 %v9384_v56, %s9061_s25 }
 0x9ff   :  { %v4496_v32 = vpop.xlane.xlu0 %4495 }
 0xa00   :  { %v4512_v25 = vsub.f32 %v4100_v26, %v4496_v32 }
 0xa02   :  { %v4518_v39 = vmul.f32 1.442695, %v4512_v25  ;;  %v4499_v40 = vpop.xlane.xlu1 %4498 }
 0xa03   :  { %v4513_v37 = vsub.f32 %v4178_v46, %v4499_v40  ;;  %v4502_v43 = vpop.xlane.xlu0 %4501 }
 0xa04   :  { %8845 = vpow2.f32 %v4518_v39  ;;  %v4514_v38 = vsub.f32 %v4256_v19, %v4502_v43 }
 0xa05   :  { %v4520_v42 = vmul.f32 1.442695, %v4513_v37 }
 0xa06   :  { %v4522_v45 = vmul.f32 1.442695, %v4514_v38 }
 0xa07   :  { %8847 = vpow2.f32 %v4520_v42  ;;  %v4505_v15 = vpop.xlane.xlu0 %4504  ;;  %v4508_v11 = vpop.xlane.xlu1 %4507 }
 0xa08   :  { %8849 = vpow2.f32 %v4522_v45  ;;  %v4515_v57 = vsub.f32 %v4334_v27, %v4505_v15  ;;  %v4516_v23 = vsub.f32 %v4412_v33, %v4508_v11 }
 0xa0a   :  { %v4524_v61 = vmul.f32 1.442695, %v4515_v57  ;;  %v4526_v14 = vmul.f32 1.442695, %v4516_v23 }
 0xa0b   :  { %v4561_v58 = vpop.permute.xlu1 %4560  ;;  %v4511_v24 = vpop.xlane.xlu0 %4510 }
 0xa0c   :  { %8851 = vpow2.f32 %v4524_v61  ;;  %8299 = vmatpush3.msra.mxu0 %v4561_v58  ;;  %v4517_v27 = vsub.f32 %v4490_v18, %v4511_v24  ;;  %v8685_v61 = vld [vmem:[#allocation4 + $0x78] sm:$0xff]   ;;  %v8686_v58 = vld [vmem:[#allocation4 + $0x70] sm:$0xff]  }
 0xa0d   :  { %8308 = vmatprep.subr.mxu0 %v9058_v1  ;;  %8853 = vpow2.f32 %v4526_v14  ;;  %v8694_v14 = vld [vmem:[#allocation4 + $0x28] sm:$0xff]  }
 0xa0e   :  { %v4528_v36 = vmul.f32 1.442695, %v4517_v27  ;;  %v8693_v27 = vld [vmem:[#allocation4 + $0x48] sm:$0xff]  }
 0xa10   :  { %8855 = vpow2.f32 %v4528_v36 }
 0xa11   :  { %v8846_v56 = vpop.eup %8845 }
 0xa12   :  { %v4530_v26 = vsel %vm1535_vm5, %v8846_v56, 0.0 }
 0xa13   :  { %4531 = vadd.xlane.f32.xlu1 %v4530_v26  ;;  %v8688_v26 = vld [vmem:[#allocation4 + $0x60] sm:$0xff]  }
 0xa14   :  { %v8848_v29 = vpop.eup %8847 }
 0xa15   :  { %v8850_v31 = vpop.eup %8849  ;;  %v4533_v46 = vsel %vm1535_vm5, %v8848_v29, 0.0 }
 0xa16   :  { %4534 = vadd.xlane.f32.xlu0 %v4533_v46  ;;  %v4536_v19 = vsel %vm1535_vm5, %v8850_v31, 0.0 }
 0xa17   :  { %4537 = vadd.xlane.f32.xlu1 %v4536_v19  ;;  %v8691_v19 = vld [vmem:[#allocation4 + $0x50] sm:$0xff]  }
 0xa19   :  { %v8852_v51 = vpop.eup %8851 }
 0xa1a   :  { %v4539_v20 = vsel %vm1535_vm5, %v8852_v51, 0.0  ;;  %v8854_v28 = vpop.eup %8853 }
 0xa1b   :  { %4540 = vadd.xlane.f32.xlu0 %v4539_v20  ;;  %v4542_v21 = vsel %vm1535_vm5, %v8854_v28, 0.0 }
 0xa1d   :  { %v8856_v9 = vpop.eup %8855 }
 0xa1e   :  { %v4545_v16 = vsel %vm1535_vm5, %v8856_v9, 0.0 }
 0xa28   :  { %4712 = vrot.lane.b32.xlu1 %v9338_v22, %s9061_s25 }
 0xa2c   :  { %4788 = vrot.lane.b32.xlu1 %v9343_v30, %s9061_s25 }
 0xa31   :  { %4636 = vrot.lane.b32.xlu0 %v9399_v59, %s9061_s25 }
 0xa50   :  { %4546 = vadd.xlane.f32.xlu1 %v4545_v16  ;;  %4543 = vadd.xlane.f32.xlu0 %v4542_v21  ;;  %v8695_v16 = vld [vmem:[#allocation4 + $0x40] sm:$0xff]  }
 0xa51   :  { %v8696_v21 = vld [vmem:[#allocation4 + $0x20] sm:$0xff]  }
 0xa61   :  { %4940 = vrot.lane.b32.xlu1 %v9376_v50, %s9061_s25 }
 0xa65   :  { %5028 = vrot.lane.b32.xlu1 %v9620_v3, %s9061_s25 }
 0xa66   :  { %4864 = vrot.lane.b32.xlu0 %v9370_v41, %s9061_s25 }
 0xa69   :  { %5052 = vrot.lane.b32.xlu1 %v9738_v34, %s9048_s30 }
 0xa6a   :  { %5026 = vrot.lane.b32.xlu0 %v9618_v54, %s9061_s25 }
 0xa6e   :  { %5050 = vrot.lane.b32.xlu0 %v9736_v60, %s9048_s30 }
 0xa9c   :  { %v4532_v22 = vpop.xlane.xlu1 %4531 }
 0xa9d   :  { %8857 = vrcp.f32 %v4532_v22 }
 0xa9f   :  { %v4535_v30 = vpop.xlane.xlu0 %4534 }
 0xaa0   :  { %8859 = vrcp.f32 %v4535_v30  ;;  %v4538_v50 = vpop.xlane.xlu1 %4537  ;;  %v8697_v30 = vld [vmem:[#allocation4 + $0x18] sm:$0xff]  }
 0xaa1   :  { %8861 = vrcp.f32 %v4538_v50  ;;  %v8699_v50 = vld [vmem:[#allocation4 + $0x8] sm:$0xff]  }
 0xaa4   :  { %v4541_v59 = vpop.xlane.xlu0 %4540  ;;  %v4713_v33 = vpop.permute.xlu1 %4712 }
 0xaa5   :  { %8863 = vrcp.f32 %v4541_v59 }
 0xaa8   :  { %v4637_v3 = vpop.permute.xlu0 %4636  ;;  %v4789_v25 = vpop.permute.xlu1 %4788 }
 0xaa9   :  { %8304 = vmatpush3.msra.mxu1 %v4637_v3 }
 0xaaa   :  { %v8858_v41 = vpop.eup %8857  ;;  %8313 = vmatprep.subr.mxu1 %v9058_v1 }
 0xaab   :  { %v4554_v34 = vmul.f32 %v8858_v41, %v8846_v56  ;;  %v8687_v56 = vld [vmem:[#allocation4 + $0x68] sm:$0xff]  }
 0xaad   :  { %v8860_v18 = vpop.eup %8859  ;;  %8301 = vmatmul.mubr.msk.f32.vlgmr.msra.gmra.mxu0 %vm1535_vm5, %v4554_v34 }
 0xaae   :  { %v8862_v54 = vpop.eup %8861  ;;  %8309 = vmatpush3.msra.mxu0 %v4713_v33  ;;  %8310 = vmatprep.mubr.msk.f32.mxu0 %vm9059_vm0, %v9058_v1  ;;  %v4555_v60 = vmul.f32 %v8860_v18, %v8848_v29  ;;  %v8689_v29 = vld [vmem:[#allocation4 + $0x58] sm:$0xff]  }
 0xaaf   :  { %v4556_v32 = vmul.f32 %v8862_v54, %v8850_v31  ;;  %8318 = vmatprep.subr.mxu0 %v9058_v1  ;;  %v8690_v31 = vld [vmem:[#allocation4 + $0x38] sm:$0xff]  }
 0xab0   :  { %8306 = vmatmul.mubr.msk.f32.vlgmr.msra.gmra.mxu1 %vm1535_vm5, %v4555_v60 }
 0xab1   :  { %8311 = vmatmul.mubr.msk.f32.vlgmr.msra.gmra.mxu0 %vm1535_vm5, %v4556_v32  ;;  %8314 = vmatpush3.msra.mxu1 %v4789_v25 }
 0xab2   :  { %v8864_v39 = vpop.eup %8863  ;;  %8315 = vmatprep.mubr.msk.f32.mxu1 %vm9059_vm0, %v9058_v1  ;;  %8323 = vmatprep.subr.mxu1 %v9058_v1 }
 0xab3   :  { %v4557_v40 = vmul.f32 %v8864_v39, %v8852_v51  ;;  %8320 = vmatprep.mubr.msk.f32.mxu0 %vm9059_vm0, %v9058_v1  ;;  %v8692_v51 = vld [vmem:[#allocation4 + $0x30] sm:$0xff]  }
 0xab5   :  { %8316 = vmatmul.mubr.msk.f32.vlgmr.msra.gmra.mxu1 %vm1535_vm5, %v4557_v40 }
 0xab6   :  { %8325 = vmatprep.mubr.msk.f32.mxu1 %vm9059_vm0, %v9058_v1 }
 0xad9   :  { %v4544_v37 = vpop.xlane.xlu0 %4543  ;;  %v4547_v43 = vpop.xlane.xlu1 %4546 }
 0xada   :  { %8865 = vrcp.f32 %v4544_v37 }
 0xadb   :  { %8867 = vrcp.f32 %v4547_v43 }
 0xadd   :  { %v4865_v38 = vpop.permute.xlu0 %4864  ;;  %v4941_v42 = vpop.permute.xlu1 %4940 }
 0xade   :  { %8319 = vmatpush3.msra.mxu0 %v4865_v38  ;;  %8324 = vmatpush3.msra.mxu1 %v4941_v42 }
 0xadf   :  { %8328 = vmatprep.subr.bf16.mxu0 %v9058_v1  ;;  %8348 = vmatprep.subr.bf16.mxu1 %v9058_v1 }
 0xae1   :  { %v5027_v59 = vpop.permute.xlu0 %5026  ;;  %v5029_v3 = vpop.permute.xlu1 %5028 }
 0xae2   :  { %v5091_v54 = vsel %vm1078_vm4, %v9506_v8, %v5029_v3  ;;  %v8713_v3 = vld [vmem:[#allocation6 + $0x18] sm:$0xff]  }
 0xae5   :  { %v5051_v41 = vpop.permute.xlu0 %5050  ;;  %v5053_v33 = vpop.permute.xlu1 %5052 }
 0xae6   :  { %v5097_v60 = vsel %vm187_vm3, %v5091_v54, %v5053_v33  ;;  %v8716_v33 = vld [vmem:[#allocation6] sm:$0xff]  }
 0xae7   :  { %v8866_v45 = vpop.eup %8865  ;;  %v8720_v54 = vld [vmem:[#allocation6 + $0x60] sm:$0xff]  }
 0xae8   :  { %v8868_v15 = vpop.eup %8867  ;;  %v4558_v11 = vmul.f32 %v8866_v45, %v8854_v28 }
 0xae9   :  { %v4559_v57 = vmul.f32 %v8868_v15, %v8856_v9 }
 0xaea   :  { %8321 = vmatmul.mubr.msk.f32.vlgmr.msra.gmra.mxu0 %vm1535_vm5, %v4558_v11 }
 0xaeb   :  { %8326 = vmatmul.mubr.msk.f32.vlgmr.msra.gmra.mxu1 %vm1535_vm5, %v4559_v57  ;;  %8344 = vmatprep.mubr.msk.bf16.mxu0 %vm9059_vm0, %v9058_v1 }
 0xaec   :  { %8364 = vmatprep.mubr.msk.bf16.mxu1 %vm9059_vm0, %v9058_v1  ;;  %8329 = vmatpush3.bf16.msra.mxu0 %v8685_v61 }
 0xaed   :  { %8330 = vmatprep.subr.bf16.mxu0 %v9058_v1  ;;  %8349 = vmatpush3.bf16.msra.mxu1 %v8690_v31 }
 0xaee   :  { %8350 = vmatprep.subr.bf16.mxu1 %v9058_v1 }
 0xaf0   :  { %8331 = vmatpush3.bf16.msra.mxu0 %v8686_v58  ;;  %v8701_v58 = vld [vmem:[#allocation4 + $0xb8] sm:$0xff]  }
 0xaf1   :  { %8332 = vmatprep.subr.bf16.mxu0 %v9058_v1  ;;  %8351 = vmatpush3.bf16.msra.mxu1 %v8692_v51 }
 0xaf2   :  { %8352 = vmatprep.subr.bf16.mxu1 %v9058_v1 }
 0xaf4   :  { %8333 = vmatpush3.bf16.msra.mxu0 %v8687_v56 }
 0xaf5   :  { %8334 = vmatprep.subr.bf16.mxu0 %v9058_v1  ;;  %8353 = vmatpush3.bf16.msra.mxu1 %v8694_v14  ;;  %v8708_v14 = vld [vmem:[#allocation4 + $0x80] sm:$0xff]  }
 0xaf6   :  { %8354 = vmatprep.subr.bf16.mxu1 %v9058_v1 }
 0xaf8   :  { %8335 = vmatpush3.bf16.msra.mxu0 %v8688_v26 }
 0xaf9   :  { %8336 = vmatprep.subr.bf16.mxu0 %v9058_v1  ;;  %8355 = vmatpush3.bf16.msra.mxu1 %v8696_v21 }
 0xafa   :  { %8356 = vmatprep.subr.bf16.mxu1 %v9058_v1 }
 0xafc   :  { %8337 = vmatpush3.bf16.msra.mxu0 %v8689_v29 }
 0xafd   :  { %8338 = vmatprep.subr.bf16.mxu0 %v9058_v1  ;;  %8357 = vmatpush3.bf16.msra.mxu1 %v8697_v30 }
 0xafe   :  { %8358 = vmatprep.subr.bf16.mxu1 %v9058_v1 }
 0xb00   :  { %8339 = vmatpush3.bf16.msra.mxu0 %v8691_v19 }
 0xb01   :  { %8340 = vmatprep.subr.bf16.mxu0 %v9058_v1 }
 0xb04   :  { %8341 = vmatpush3.bf16.msra.mxu0 %v8693_v27  ;;  %v8707_v27 = vld [vmem:[#allocation4 + $0x88] sm:$0xff]  }
 0xb05   :  { %8342 = vmatprep.subr.bf16.mxu0 %v9058_v1 }
 0xb08   :  { %8343 = vmatpush3.bf16.msra.mxu0 %v8695_v16 }
 0xb09   :  { %8368 = vmatprep.subr.bf16.mxu0 %v9058_v1 }
 0xb6d   :  { %v4632_v46 = vpop.f32.mrf.mxu0 }
 0xb6f   :  { %v8302_v20 = vpop.f32.mrf.mxu0 }
 0xb70   :  { %v4708_v24 = vpop.f32.mrf.mxu1  ;;  %v8705_v20 = vld [vmem:[#allocation4 + $0x98] sm:$0xff]  }
 0xb71   :  { %v4784_v23 = vpop.f32.mrf.mxu0 }
 0xb72   :  { %5074 = vrot.lane.b32.xlu0 %v4784_v23, %s9060_s7  ;;  %v8307_v36 = vpop.f32.mrf.mxu1  ;;  %v8706_v23 = vld [vmem:[#allocation4 + $0x90] sm:$0xff]  }
 0xb73   :  { %v8312_v28 = vpop.f32.mrf.mxu0 }
 0xb75   :  { %v4860_v9 = vpop.f32.mrf.mxu1 }
 0xb76   :  { %5076 = vrot.lane.b32.xlu1 %v4860_v9, %s9060_s7  ;;  %5022 = vrot.lane.b32.xlu0 %v9614_v47, %s9061_s25  ;;  %v8698_v47 = vld [vmem:[#allocation4 + $0x10] sm:$0xff]  }
 0xb77   :  { %v8317_v22 = vpop.f32.mrf.mxu1  ;;  %8359 = vmatpush3.bf16.msra.mxu1 %v8698_v47 }
 0xb78   :  { %8360 = vmatprep.subr.bf16.mxu1 %v9058_v1 }
 0xb7a   :  { %5024 = vrot.lane.b32.xlu1 %v9616_v53, %s9061_s25  ;;  %5046 = vrot.lane.b32.xlu0 %v9732_v44, %s9048_s30  ;;  %v8700_v53 = vld [vmem:[#allocation4] sm:$0xff]  }
 0xb7b   :  { %8361 = vmatpush3.bf16.msra.mxu1 %v8699_v50 }
 0xb7c   :  { %8362 = vmatprep.subr.bf16.mxu1 %v9058_v1 }
 0xb7e   :  { %5048 = vrot.lane.b32.xlu1 %v9734_v48, %s9048_s30  ;;  %5030 = vrot.lane.b32.xlu0 %v9622_v5, %s9061_s25 }
 0xb7f   :  { %8363 = vmatpush3.bf16.msra.mxu1 %v8700_v53 }
 0xb80   :  { %8388 = vmatprep.subr.bf16.mxu1 %v9058_v1 }
 0xb82   :  { %5032 = vrot.lane.b32.xlu1 %v9624_v12, %s9061_s25  ;;  %5070 = vrot.lane.b32.xlu0 %v4632_v46, %s9060_s7  ;;  %v8703_v46 = vld [vmem:[#allocation4 + $0xa8] sm:$0xff]  }
 0xb86   :  { %5072 = vrot.lane.b32.xlu1 %v4708_v24, %s9060_s7  ;;  %5054 = vrot.lane.b32.xlu0 %v9740_v35, %s9048_s30  ;;  %v5090_v35 = vsel %vm1078_vm4, %v9504_v6, %v5027_v59  ;;  %v8712_v59 = vld [vmem:[#allocation6 + $0x20] sm:$0xff]  }
 0xb87   :  { %v5096_v18 = vsel %vm187_vm3, %v5090_v35, %v5051_v41  ;;  %v8714_v41 = vld [vmem:[#allocation6 + $0x10] sm:$0xff]   ;;  %v8715_v35 = vld [vmem:[#allocation6 + $0x8] sm:$0xff]  }
 0xb8a   :  { %5056 = vrot.lane.b32.xlu1 %v9742_v7, %s9048_s30 }
 0xbaa   :  { %v4936_v5 = vpop.f32.mrf.mxu0 }
 0xbab   :  { %v5012_v44 = vpop.f32.mrf.mxu1  ;;  %5078 = vrot.lane.b32.xlu0 %v4936_v5, %s9060_s7 }
 0xbac   :  { %5080 = vrot.lane.b32.xlu1 %v5012_v44, %s9060_s7  ;;  %v8322_v12 = vpop.f32.mrf.mxu0 }
 0xbad   :  { %v8327_v48 = vpop.f32.mrf.mxu1  ;;  %v8709_v12 = vld [vmem:[#allocation6 + $0x38] sm:$0xff]  }
 0xbe4   :  { %v5075_v34 = vpop.permute.xlu0 %5074 }
 0xbe5   :  { %v5103_v7 = vsel %vm5100_vm6, %v5096_v18, %v5075_v34  ;;  %v8717_v34 = vld [vmem:[#allocation6 + $0x78] sm:$0xff]   ;;  %v8718_v18 = vld [vmem:[#allocation6 + $0x70] sm:$0xff]  }
 0xbe6   :  { %8869 = vtanh.f32 %v5103_v7  ;;  %v8719_v7 = vld [vmem:[#allocation6 + $0x68] sm:$0xff]  }
 0xbe8   :  { %v5077_v32 = vpop.permute.xlu1 %5076  ;;  %v5023_v25 = vpop.permute.xlu0 %5022 }
 0xbe9   :  { %v5104_v39 = vsel %vm5100_vm6, %v5097_v60, %v5077_v32  ;;  %v5088_v38 = vsel %vm1078_vm4, %v9500_v63, %v5023_v25  ;;  %v8702_v63 = vld [vmem:[#allocation4 + $0xb0] sm:$0xff]   ;;  %v8721_v60 = vld [vmem:[#allocation6 + $0x58] sm:$0xff]  }
 0xbea   :  { %8871 = vtanh.f32 %v5104_v39  ;;  %v8727_v32 = vld [vmem:[#allocation7 + $0xac] ss:$12 sps:$4 sm:$0xff]   ;;  %v8728_v25 = vld [vmem:[#allocation7 + $0xb0] ss:$12 sps:$4 sm:$0xff]  }
 0xbeb   :  { %v8732_v39 = vld [vmem:[#allocation7 + $0x98] ss:$12 sps:$4 sm:$0xff]  }
 0xbec   :  { %v5025_v40 = vpop.permute.xlu1 %5024  ;;  %v5047_v37 = vpop.permute.xlu0 %5046 }
 0xbed   :  { %v5094_v15 = vsel %vm187_vm3, %v5088_v38, %v5047_v37  ;;  %v5089_v61 = vsel %vm1078_vm4, %v9502_v4, %v5025_v40  ;;  %v8704_v4 = vld [vmem:[#allocation4 + $0xa0] sm:$0xff]   ;;  %v8740_v37 = vld [vmem:[#allocation7 + $0x68] ss:$12 sps:$4 sm:$0xff]  }
 0xbee   :  { %v8736_v40 = vld [vmem:[#allocation7 + $0x80] ss:$12 sps:$4 sm:$0xff]  }
 0xbf0   :  { %v5049_v6 = vpop.permute.xlu1 %5048  ;;  %v5031_v43 = vpop.permute.xlu0 %5030 }
 0xbf1   :  { %v5095_v56 = vsel %vm187_vm3, %v5089_v61, %v5049_v6  ;;  %v5092_v9 = vsel %vm1078_vm4, %v9508_v10, %v5031_v43  ;;  %v8710_v10 = vld [vmem:[#allocation6 + $0x30] sm:$0xff]  }
 0xbf2   :  { %v8744_v6 = vld [vmem:[#allocation7 + $0x50] ss:$12 sps:$4 sm:$0xff]  }
 0xbf3   :  { %v8870_v8 = vpop.eup %8869 }
 0xbf4   :  { %v5033_v42 = vpop.permute.xlu1 %5032  ;;  %v5071_v45 = vpop.permute.xlu0 %5070 }
 0xbf5   :  { %v5101_v11 = vsel %vm5100_vm6, %v5094_v15, %v5071_v45  ;;  %v5093_v16 = vsel %vm1078_vm4, %v9510_v13, %v5033_v42  ;;  %v8711_v13 = vld [vmem:[#allocation6 + $0x28] sm:$0xff]  }
 0xbf6   :  { %8873 = vtanh.f32 %v5101_v11 }
 0xbf7   :  { %v8872_v57 = vpop.eup %8871 }
 0xbf8   :  { %v5073_v26 = vpop.permute.xlu1 %5072  ;;  %v5162_v29 = vpack.c.bf16 %v8872_v57, %v8870_v8  ;;  %v5055_v36 = vpop.permute.xlu0 %5054 }
 0xbf9   :  { %v5102_v31 = vsel %vm5100_vm6, %v5095_v56, %v5073_v26  ;;  %v5098_v21 = vsel %vm187_vm3, %v5092_v9, %v5055_v36  ;;  %v8733_v36 = vld [vmem:[#allocation7 + $0x78] ss:$12 sps:$4 sm:$0xff]   ;;  %v8737_v9 = vld [vmem:[#allocation7 + $0x60] ss:$12 sps:$4 sm:$0xff]  }
 0xbfa   :  { %8875 = vtanh.f32 %v5102_v31  ;;  %8345 = vmatmul.mubr.bf16.vlgmr.msra.gmra.mxu0 %v5162_v29  ;;  %v7699_v31 = vld [vmem:[%s10138_s9] ss:$0 sm:$0xff] }
 0xbfb   :  { %8369 = vmatpush3.bf16.msra.mxu0 %v8701_v58  ;;  %8384 = vmatprep.mubr.msk.bf16.mxu0 %vm9059_vm0, %v9058_v1 }
 0xbfc   :  { %8370 = vmatprep.subr.bf16.mxu0 %v9058_v1  ;;  %v5057_v28 = vpop.permute.xlu1 %5056 }
 0xbfd   :  { %v5099_v30 = vsel %vm187_vm3, %v5093_v16, %v5057_v28  ;;  %v8739_v28 = vld [vmem:[#allocation7 + $0x64] ss:$12 sps:$4 sm:$0xff]   ;;  %v8743_v16 = vld [vmem:[#allocation7 + $0x4c] ss:$12 sps:$4 sm:$0xff]  }
 0xbff   :  { %8371 = vmatpush3.bf16.msra.mxu0 %v8702_v63 }
 0xc00   :  { %8372 = vmatprep.subr.bf16.mxu0 %v9058_v1 }
 0xc03   :  { %8373 = vmatpush3.bf16.msra.mxu0 %v8703_v46  ;;  %v8874_v19 = vpop.eup %8873 }
 0xc04   :  { %8374 = vmatprep.subr.bf16.mxu0 %v9058_v1 }
 0xc07   :  { %v8876_v51 = vpop.eup %8875  ;;  %8375 = vmatpush3.bf16.msra.mxu0 %v8704_v4 }
 0xc08   :  { %v5161_v24 = vpack.c.bf16 %v8876_v51, %v8874_v19  ;;  %8376 = vmatprep.subr.bf16.mxu0 %v9058_v1 }
 0xc0a   :  { %8365 = vmatmul.mubr.bf16.vlgmr.msra.gmra.mxu1 %v5161_v24 }
 0xc0b   :  { %8377 = vmatpush3.bf16.msra.mxu0 %v8705_v20  ;;  %8404 = vmatprep.mubr.msk.bf16.mxu1 %vm9059_vm0, %v9058_v1  ;;  %v8725_v20 = vld [vmem:[#allocation7 + $0xa8] ss:$12 sps:$4 sm:$0xff]  }
 0xc0c   :  { %8378 = vmatprep.subr.bf16.mxu0 %v9058_v1  ;;  %8389 = vmatpush3.bf16.msra.mxu1 %v8717_v34 }
 0xc0d   :  { %8390 = vmatprep.subr.bf16.mxu1 %v9058_v1 }
 0xc0f   :  { %8379 = vmatpush3.bf16.msra.mxu0 %v8706_v23  ;;  %v8731_v23 = vld [vmem:[#allocation7 + $0x94] ss:$12 sps:$4 sm:$0xff]  }
 0xc10   :  { %8380 = vmatprep.subr.bf16.mxu0 %v9058_v1  ;;  %8391 = vmatpush3.bf16.msra.mxu1 %v8718_v18 }
 0xc11   :  { %8392 = vmatprep.subr.bf16.mxu1 %v9058_v1 }
 0xc13   :  { %8381 = vmatpush3.bf16.msra.mxu0 %v8707_v27  ;;  %v8729_v27 = vld [vmem:[#allocation7 + $0x90] ss:$12 sps:$4 sm:$0xff]  }
 0xc14   :  { %8382 = vmatprep.subr.bf16.mxu0 %v9058_v1  ;;  %8393 = vmatpush3.bf16.msra.mxu1 %v8719_v7 }
 0xc15   :  { %8394 = vmatprep.subr.bf16.mxu1 %v9058_v1 }
 0xc17   :  { %8383 = vmatpush3.bf16.msra.mxu0 %v8708_v14  ;;  %v8735_v14 = vld [vmem:[#allocation7 + $0x7c] ss:$12 sps:$4 sm:$0xff]  }
 0xc18   :  { %8408 = vmatprep.subr.bf16.mxu0 %v9058_v1  ;;  %8395 = vmatpush3.bf16.msra.mxu1 %v8720_v54 }
 0xc19   :  { %8396 = vmatprep.subr.bf16.mxu1 %v9058_v1 }
 0xc1c   :  { %8397 = vmatpush3.bf16.msra.mxu1 %v8721_v60 }
 0xc1d   :  { %v5079_v22 = vpop.permute.xlu0 %5078  ;;  %8398 = vmatprep.subr.bf16.mxu1 %v9058_v1 }
 0xc1e   :  { %v5081_v47 = vpop.permute.xlu1 %5080  ;;  %v5105_v50 = vsel %vm5100_vm6, %v5098_v21, %v5079_v22  ;;  %v8741_v21 = vld [vmem:[#allocation7 + $0x48] ss:$12 sps:$4 sm:$0xff]  }
 0xc1f   :  { %v5106_v53 = vsel %vm5100_vm6, %v5099_v30, %v5081_v47  ;;  %8877 = vtanh.f32 %v5105_v50  ;;  %v8747_v22 = vld [vmem:[#allocation7 + $0x34] ss:$12 sps:$4 sm:$0xff]   ;;  %v8745_v30 = vld [vmem:[#allocation7 + $0x30] ss:$12 sps:$4 sm:$0xff]  }
 0xc20   :  { %8879 = vtanh.f32 %v5106_v53  ;;  %8399 = vmatpush3.bf16.msra.mxu1 %v8722_v49 }
 0xc21   :  { %8400 = vmatprep.subr.bf16.mxu1 %v9058_v1 }
 0xc24   :  { %8401 = vmatpush3.bf16.msra.mxu1 %v8723_v52  ;;  %v5696_v52 = vld [vmem:[%s10142_s13] sm:$0x7] }
 0xc25   :  { %8402 = vmatprep.subr.bf16.mxu1 %v9058_v1 }
 0xc2c   :  { %v8878_v5 = vpop.eup %8877 }
 0xc2d   :  { %v8880_v44 = vpop.eup %8879 }
 0xc2e   :  { %v5341_v48 = vpack.c.bf16 %v8880_v44, %v8878_v5  ;;  %v8748_v5 = vld [vmem:[#allocation7 + $0x38] ss:$12 sps:$4 sm:$0xff]   ;;  %v8751_v44 = vld [vmem:[#allocation7 + $0x1c] ss:$12 sps:$4 sm:$0xff]  }
 0xc30   :  { %8385 = vmatmul.mubr.bf16.vlgmr.msra.gmra.mxu0 %v5341_v48  ;;  %v8752_v48 = vld [vmem:[#allocation7 + $0x20] ss:$12 sps:$4 sm:$0xff]  }
 0xc31   :  { %8409 = vmatpush3.bf16.msra.mxu0 %v8709_v12  ;;  %8424 = vmatprep.mubr.msk.bf16.mxu0 %vm9059_vm0, %v9058_v1  ;;  %v8749_v12 = vld [vmem:[#allocation7 + $0x18] ss:$12 sps:$4 sm:$0xff]  }
 0xc32   :  { %8410 = vmatprep.subr.bf16.mxu0 %v9058_v1 }
 0xc35   :  { %8411 = vmatpush3.bf16.msra.mxu0 %v8710_v10  ;;  %v8755_v10 = vld [vmem:[#allocation7 + $0x4] ss:$12 sps:$4 sm:$0xff]  }
 0xc36   :  { %8412 = vmatprep.subr.bf16.mxu0 %v9058_v1 }
 0xc39   :  { %8413 = vmatpush3.bf16.msra.mxu0 %v8711_v13  ;;  %v8753_v13 = vld [vmem:[#allocation7] ss:$12 sps:$4 sm:$0xff]  }
 0xc3a   :  { %8414 = vmatprep.subr.bf16.mxu0 %v9058_v1 }
 0xc3d   :  { %8415 = vmatpush3.bf16.msra.mxu0 %v8712_v59  ;;  %v8756_v59 = vld [vmem:[#allocation7 + $0x8] ss:$12 sps:$4 sm:$0xff]  }
 0xc3e   :  { %8416 = vmatprep.subr.bf16.mxu0 %v9058_v1 }
 0xc41   :  { %8417 = vmatpush3.bf16.msra.mxu0 %v8713_v3 }
 0xc42   :  { %8418 = vmatprep.subr.bf16.mxu0 %v9058_v1 }
 0xc45   :  { %8419 = vmatpush3.bf16.msra.mxu0 %v8714_v41 }
 0xc46   :  { %8420 = vmatprep.subr.bf16.mxu0 %v9058_v1 }
 0xc49   :  { %8421 = vmatpush3.bf16.msra.mxu0 %v8715_v35 }
 0xc4a   :  { %8422 = vmatprep.subr.bf16.mxu0 %v9058_v1 }
 0xc4d   :  { %8423 = vmatpush3.bf16.msra.mxu0 %v8716_v33  ;;  %v7716_v33 = vld [vmem:[%s10140_s11] ss:$0 sm:$0xff] }
 0xc4e   :  { %8428 = vmatprep.subr.bf16.mxu0 %v9058_v1 }
 0xc50   :  { %8425 = vmatmul.mubr.bf16.vlgmr.msra.gmra.mxu0 %v5474_v55  ;;  %v8724_v55 = vld [vmem:[#allocation6 + $0x40] sm:$0xff]  }
 0xc51   :  { %8444 = vmatprep.mubr.msk.bf16.mxu0 %vm9059_vm0, %v9058_v1  ;;  %8403 = vmatpush3.bf16.msra.mxu1 %v8724_v55  ;;  %v5705_v55 = vrot.slane %v5696_v52, %v9296_v62 }
 0xc52   :  { %5841 = vmatprep.subr.bf16.mxu1 %v8727_v32  ;;  %8429 = vmatpush3.bf16.msra.mxu0 %v8728_v25 }
 0xc53   :  { %8430 = vmatprep.subr.bf16.mxu0 %v9058_v1 }
 0xc56   :  { %8431 = vmatpush3.bf16.msra.mxu0 %v8732_v39  ;;  %v5701_v39 = vrot.slane %v5696_v52, %v9301_v2 }
 0xc57   :  { %8432 = vmatprep.subr.bf16.mxu0 %v9058_v1 }
 0xc5a   :  { %8433 = vmatpush3.bf16.msra.mxu0 %v8736_v40 }
 0xc5b   :  { %8434 = vmatprep.subr.bf16.mxu0 %v9058_v1 }
 0xc5e   :  { %8435 = vmatpush3.bf16.msra.mxu0 %v8740_v37 }
 0xc5f   :  { %8436 = vmatprep.subr.bf16.mxu0 %v9058_v1 }
 0xc62   :  { %8437 = vmatpush3.bf16.msra.mxu0 %v8744_v6  ;;  %v5709_v6 = vrot.slane %v5696_v52, %v9334_v17 }
 0xc63   :  { %8438 = vmatprep.subr.bf16.mxu0 %v9058_v1 }
 0xc66   :  { %8439 = vmatpush3.bf16.msra.mxu0 %v8748_v5 }
 0xc67   :  { %8440 = vmatprep.subr.bf16.mxu0 %v9058_v1 }
 0xc6a   :  { %8441 = vmatpush3.bf16.msra.mxu0 %v8752_v48 }
 0xc6b   :  { %8442 = vmatprep.subr.bf16.mxu0 %v9058_v1 }
 0xc6e   :  { %8443 = vmatpush3.bf16.msra.mxu0 %v8756_v59 }
 0xc6f   :  { %8488 = vmatprep.subr.mxu0 %v9058_v1 }
 0xcba   :  { %v5245_v43 = vpop.f32.mrf.mxu0 }
 0xcbc   :  { %v8346_v38 = vpop.f32.mrf.mxu0 }
 0xcbe   :  { %v5248_v42 = vpop.f32.mrf.mxu0 }
 0xcc0   :  { %v8347_v45 = vpop.f32.mrf.mxu0 }
 0xcca   :  { %v5334_v15 = vpop.f32.mrf.mxu1 }
 0xccb   :  { %v5335_v58 = vadd.f32 %v5334_v15, %v5245_v43 }
 0xccc   :  { %v8366_v8 = vpop.f32.mrf.mxu1 }
 0xcce   :  { %v5337_v11 = vpop.f32.mrf.mxu1 }
 0xccf   :  { %v5338_v26 = vadd.f32 %v5337_v11, %v5248_v42 }
 0xcd0   :  { %v8367_v57 = vpop.f32.mrf.mxu1 }
 0xcf0   :  { %v5424_v61 = vpop.f32.mrf.mxu0 }
 0xcf1   :  { %v5431_v29 = vadd.f32 %v5424_v61, %v5335_v58 }
 0xcf2   :  { %v8386_v56 = vpop.f32.mrf.mxu0 }
 0xcf3   :  { %v5440_v19 = vadd.f32 %v7699_v31, %v5431_v29 }
 0xcf4   :  { %v5427_v63 = vpop.f32.mrf.mxu0 }
 0xcf5   :  { %v5432_v46 = vadd.f32 %v5427_v63, %v5338_v26 }
 0xcf6   :  { %v8387_v4 = vpop.f32.mrf.mxu0 }
 0xcf7   :  { %v5441_v51 = vadd.f32 %v7699_v31, %v5432_v46 }
 0xcf9   :  { %v5475_v24 = vpack.c.bf16 %v5441_v51, %v5440_v19 }
 0xcfb   :  { %8405 = vmatmul.mubr.bf16.vlgmr.msra.gmra.mxu1 %v5475_v24 }
 0xcfc   :  { %5842 = vmatpush1.bf16.msra.mxu1 %v8725_v20  ;;  %5873 = vmatprep.mubr.bf16.mxu1 %v9057_v0 }
 0xcfd   :  { %5843 = vmatprep.subr.bf16.mxu1 %v8731_v23 }
 0xd00   :  { %5844 = vmatpush1.bf16.msra.mxu1 %v8729_v27 }
 0xd01   :  { %5845 = vmatprep.subr.bf16.mxu1 %v8735_v14 }
 0xd04   :  { %5846 = vmatpush1.bf16.msra.mxu1 %v8733_v36 }
 0xd05   :  { %5847 = vmatprep.subr.bf16.mxu1 %v8739_v28 }
 0xd08   :  { %5848 = vmatpush1.bf16.msra.mxu1 %v8737_v9 }
 0xd09   :  { %5849 = vmatprep.subr.bf16.mxu1 %v8743_v16 }
 0xd0c   :  { %5850 = vmatpush1.bf16.msra.mxu1 %v8741_v21 }
 0xd0d   :  { %5851 = vmatprep.subr.bf16.mxu1 %v8747_v22 }
 0xd10   :  { %v5647_v47 = vpop.f32.mrf.mxu0  ;;  %5852 = vmatpush1.bf16.msra.mxu1 %v8745_v30 }
 0xd11   :  { %5853 = vmatprep.subr.bf16.mxu1 %v8751_v44 }
 0xd12   :  { %v8426_v0 = vpop.f32.mrf.mxu0 }
 0xd14   :  { %v5650_v50 = vpop.f32.mrf.mxu0  ;;  %5854 = vmatpush1.bf16.msra.mxu1 %v8749_v12 }
 0xd15   :  { %5855 = vmatprep.subr.bf16.mxu1 %v8755_v10 }
 0xd16   :  { %v8427_v53 = vpop.f32.mrf.mxu0 }
 0xd18   :  { %5856 = vmatpush1.bf16.msra.mxu1 %v8753_v13 }
 0xd19   :  { %8448 = vmatprep.subr.mxu1 %v9058_v1 }
 0xdbb   :  { %v5558_v3 = vpop.f32.mrf.mxu1 }
 0xdbc   :  { %v5648_v35 = vadd.f32 %v5647_v47, %v5558_v3 }
 0xdbd   :  { %v8406_v41 = vpop.f32.mrf.mxu1 }
 0xdbe   :  { %v5661_v54 = vadd.f32 %v7716_v33, %v5648_v35 }
 0xdbf   :  { %v5561_v34 = vpop.f32.mrf.mxu1 }
 0xdc0   :  { %v5651_v18 = vadd.f32 %v5650_v50, %v5561_v34 }
 0xdc1   :  { %v8407_v7 = vpop.f32.mrf.mxu1 }
 0xdc2   :  { %v5662_v60 = vadd.f32 %v7716_v33, %v5651_v18 }
 0xdc4   :  { %v5663_v49 = vpack.c.bf16 %v5662_v60, %v5661_v54 }
 0xdc6   :  { %5874 = vmatmul.mubr.bf16.vlgmr.msra.gmra.mxu1 %v5663_v49  ;;  %8445 = vmatmul.mubr.bf16.vlgmr.msra.gmra.mxu0 %v5663_v49 }
 0xdc7   :  { %8450 = vmatprep.mubr.msk.f32.mxu1 %vm9059_vm0, %v9058_v1  ;;  %8490 = vmatprep.mubr.msk.f32.mxu0 %vm9059_vm0, %v9058_v1 }
 0xe86   :  { %v5875_v32 = vpop.f32.mrf.mxu1  ;;  %v5918_v25 = vpop.f32.mrf.mxu0 }
 0xe87   :  { %v9928_v15 = vadd.f32 %v5875_v32, %v5701_v39  ;;  %v9942_v11 = vadd.f32 %v5918_v25, %v5709_v6 }
 0xe88   :  { %v5877_v40 = vpop.f32.mrf.mxu1  ;;  %v8446_v37 = vpop.f32.mrf.mxu0 }
 0xe89   :  { %v9922_v43 = vadd.f32 %v5877_v40, %v5705_v55 }
 0xe8a   :  { %v5879_v38 = vpop.f32.mrf.mxu1  ;;  %v5921_v42 = vpop.f32.mrf.mxu0 }
 0xe8b   :  { %v9924_v45 = vadd.f32 %v5921_v42, %v5709_v6  ;;  %8449 = vmatpush3.xpose.msk.msra.mxu1 %vm1078_vm4, %v9922_v43  ;;  %v9939_v17 = vadd.f32 %v5879_v38, %v5701_v39 }
 0xe8c   :  { %v5881_v62 = vpop.f32.mrf.mxu1  ;;  %v8447_v8 = vpop.f32.mrf.mxu0  ;;  %8453 = vmatprep.subr.mxu1 %v9058_v1 }
 0xe8d   :  { %v9931_v2 = vadd.f32 %v5881_v62, %v5705_v55 }
 0xe8e   :  { %8451 = vmatmul.mubr.msk.f32.vlgmr.msra.gmra.mxu1 %vm1078_vm4, %v9928_v15 }
 0xe8f   :  { %8454 = vmatpush3.xpose.msk.msra.mxu1 %vm1078_vm4, %v9931_v2  ;;  %8455 = vmatprep.mubr.msk.f32.mxu1 %vm9059_vm0, %v9058_v1 }
 0xe90   :  { %8458 = vmatprep.subr.mxu1 %v9058_v1 }
 0xe92   :  { %8456 = vmatmul.mubr.msk.f32.vlgmr.msra.gmra.mxu1 %vm1078_vm4, %v9939_v17 }
 0xe93   :  { %8459 = vmatpush3.msra.mxu1 %v9942_v11  ;;  %8460 = vmatprep.mubr.msk.f32.mxu1 %vm9059_vm0, %v9058_v1 }
 0xe94   :  { %8463 = vmatprep.subr.mxu1 %v9058_v1 }
 0xf4e   :  { %v5997_v57 = vpop.f32.mrf.mxu1 }
 0xf4f   :  { %v6077_v61 = vsel %vm1535_vm5, %v5997_v57, -inf }
 0xf50   :  { %6078 = vmax.xlane.f32.xlu0 %v6077_v61  ;;  %v8452_v58 = vpop.f32.mrf.mxu1 }
 0xf52   :  { %v6073_v56 = vpop.f32.mrf.mxu1 }
 0xf53   :  { %v6080_v26 = vsel %vm1535_vm5, %v6073_v56, -inf }
 0xf54   :  { %6081 = vmax.xlane.f32.xlu1 %v6080_v26  ;;  %v8457_v29 = vpop.f32.mrf.mxu1 }
 0xf65   :  { %6247 = vrot.lane.b32.xlu1 %v9922_v43, %s9060_s7 }
 0xf69   :  { %6325 = vrot.lane.b32.xlu1 %v9931_v2, %s9060_s7 }
 0xf6d   :  { %6323 = vrot.lane.b32.xlu1 %v9939_v17, %s9060_s7 }
 0xfd9   :  { %v6079_v31 = vpop.xlane.xlu0 %6078 }
 0xfda   :  { %v6083_v63 = vsub.f32 %v5997_v57, %v6079_v31 }
 0xfdc   :  { %v6085_v46 = vmul.f32 1.442695, %v6083_v63 }
 0xfdd   :  { %v6082_v4 = vpop.xlane.xlu1 %6081 }
 0xfde   :  { %8881 = vpow2.f32 %v6085_v46  ;;  %v6084_v19 = vsub.f32 %v6073_v56, %v6082_v4 }
 0xfe0   :  { %v6087_v51 = vmul.f32 1.442695, %v6084_v19 }
 0xfe1   :  { %v6248_v16 = vpop.permute.xlu1 %6247 }
 0xfe2   :  { %8883 = vpow2.f32 %v6087_v51 }
 0xfe5   :  { %v6326_v30 = vpop.permute.xlu1 %6325 }
 0xfe9   :  { %v6324_v0 = vpop.permute.xlu1 %6323 }
 0xfeb   :  { %v8882_v20 = vpop.eup %8881 }
 0xfec   :  { %v6089_v24 = vsel %vm1535_vm5, %v8882_v20, 0.0 }
 0xfed   :  { %6090 = vadd.xlane.f32.xlu0 %v6089_v24 }
 0xfef   :  { %v8884_v23 = vpop.eup %8883 }
 0xff0   :  { %v6092_v27 = vsel %vm1535_vm5, %v8884_v23, 0.0 }
 0xff1   :  { %6093 = vadd.xlane.f32.xlu0 %v6092_v27 }
0x1007   :  { %6245 = vrot.lane.b32.xlu0 %v9928_v15, %s9060_s7 }
0x1076   :  { %v6091_v14 = vpop.xlane.xlu0 %6090 }
0x1077   :  { %8885 = vrcp.f32 %v6091_v14 }
0x107a   :  { %v6094_v36 = vpop.xlane.xlu0 %6093 }
0x107b   :  { %8887 = vrcp.f32 %v6094_v36 }
0x107e   :  { %v6246_v47 = vpop.permute.xlu0 %6245 }
0x1084   :  { %v8886_v28 = vpop.eup %8885 }
0x1085   :  { %v6097_v9 = vmul.f32 %v8886_v28, %v8882_v20 }
0x1087   :  { %8461 = vmatmul.mubr.msk.f32.vlgmr.msra.gmra.mxu1 %vm1535_vm5, %v6097_v9 }
0x1088   :  { %v8888_v21 = vpop.eup %8887  ;;  %8464 = vmatpush3.msra.mxu1 %v9924_v45  ;;  %8465 = vmatprep.mubr.msk.f32.mxu1 %vm9059_vm0, %v9058_v1 }
0x1089   :  { %8468 = vmatprep.subr.mxu1 %v9058_v1  ;;  %v6098_v22 = vmul.f32 %v8888_v21, %v8884_v23 }
0x108b   :  { %8466 = vmatmul.mubr.msk.f32.vlgmr.msra.gmra.mxu1 %vm1535_vm5, %v6098_v22 }
0x108c   :  { %8469 = vmatpush3.xpose.msk.msra.mxu1 %vm1078_vm4, %v6248_v16  ;;  %8470 = vmatprep.mubr.msk.f32.mxu1 %vm9059_vm0, %v9058_v1 }
0x108d   :  { %8473 = vmatprep.subr.mxu1 %v9058_v1 }
0x108f   :  { %8471 = vmatmul.mubr.msk.f32.vlgmr.msra.gmra.mxu1 %vm1078_vm4, %v6246_v47 }
0x1090   :  { %8474 = vmatpush3.xpose.msk.msra.mxu1 %vm1078_vm4, %v6326_v30  ;;  %8475 = vmatprep.mubr.msk.f32.mxu1 %vm9059_vm0, %v9058_v1 }
0x1091   :  { %8478 = vmatprep.subr.mxu1 %v9058_v1 }
0x1093   :  { %8476 = vmatmul.mubr.msk.f32.vlgmr.msra.gmra.mxu1 %vm1078_vm4, %v6324_v0 }
0x1094   :  { %8480 = vmatprep.mubr.msk.f32.mxu1 %vm9059_vm0, %v9058_v1 }
0x1147   :  { %v9980_v50 = vpop.f32.mrf.mxu1 }
0x1149   :  { %v8462_v53 = vpop.f32.mrf.mxu1 }
0x114b   :  { %v9982_v5 = vpop.f32.mrf.mxu1 }
0x114d   :  { %v8467_v44 = vpop.f32.mrf.mxu1 }
0x114f   :  { %v6319_v12 = vpop.f32.mrf.mxu1 }
0x1150   :  { %v6401_v48 = vsel %vm1535_vm5, %v6319_v12, -inf }
0x1151   :  { %6402 = vmax.xlane.f32.xlu0 %v6401_v48  ;;  %v8472_v10 = vpop.f32.mrf.mxu1 }
0x1153   :  { %v6397_v13 = vpop.f32.mrf.mxu1 }
0x1154   :  { %v6404_v59 = vsel %vm1535_vm5, %v6397_v13, -inf }
0x1155   :  { %6405 = vmax.xlane.f32.xlu1 %v6404_v59  ;;  %v8477_v3 = vpop.f32.mrf.mxu1 }
0x1166   :  { %6424 = vrot.lane.b32.xlu1 %v9942_v11, %s9060_s7 }
0x116a   :  { %6657 = vrot.lane.b32.xlu1 %v9931_v2, %s9048_s30 }
0x116e   :  { %6579 = vrot.lane.b32.xlu1 %v9922_v43, %s9048_s30 }
0x1172   :  { %6577 = vrot.lane.b32.xlu1 %v9928_v15, %s9048_s30 }
0x11da   :  { %v6403_v41 = vpop.xlane.xlu0 %6402 }
0x11db   :  { %v6407_v35 = vsub.f32 %v6319_v12, %v6403_v41 }
0x11dd   :  { %v6409_v33 = vmul.f32 1.442695, %v6407_v35 }
0x11de   :  { %v6406_v34 = vpop.xlane.xlu1 %6405 }
0x11df   :  { %8889 = vpow2.f32 %v6409_v33  ;;  %v6408_v18 = vsub.f32 %v6397_v13, %v6406_v34 }
0x11e1   :  { %v6411_v7 = vmul.f32 1.442695, %v6408_v18 }
0x11e2   :  { %v6425_v54 = vpop.permute.xlu1 %6424 }
0x11e3   :  { %8891 = vpow2.f32 %v6411_v7  ;;  %8479 = vmatpush3.msra.mxu1 %v6425_v54 }
0x11e4   :  { %8483 = vmatprep.subr.mxu1 %v9058_v1 }
0x11e6   :  { %v6658_v60 = vpop.permute.xlu1 %6657 }
0x11ea   :  { %v6580_v49 = vpop.permute.xlu1 %6579 }
0x11eb   :  { %8489 = vmatpush3.xpose.msk.msra.mxu0 %vm1078_vm4, %v6580_v49 }
0x11ec   :  { %v8890_v52 = vpop.eup %8889  ;;  %8498 = vmatprep.subr.mxu0 %v9058_v1 }
0x11ed   :  { %v6413_v55 = vsel %vm1535_vm5, %v8890_v52, 0.0 }
0x11ee   :  { %6414 = vadd.xlane.f32.xlu0 %v6413_v55  ;;  %v6578_v32 = vpop.permute.xlu1 %6577 }
0x11ef   :  { %8491 = vmatmul.mubr.msk.f32.vlgmr.msra.gmra.mxu0 %vm1078_vm4, %v6578_v32 }
0x11f0   :  { %v8892_v25 = vpop.eup %8891  ;;  %8500 = vmatprep.mubr.msk.f32.mxu0 %vm9059_vm0, %v9058_v1 }
0x11f1   :  { %v6416_v39 = vsel %vm1535_vm5, %v8892_v25, 0.0 }
0x11f2   :  { %6417 = vadd.xlane.f32.xlu0 %v6416_v39 }
0x1208   :  { %6501 = vrot.lane.b32.xlu0 %v9924_v45, %s9060_s7 }
0x120c   :  { %6655 = vrot.lane.b32.xlu0 %v9939_v17, %s9048_s30 }
0x1277   :  { %v6415_v40 = vpop.xlane.xlu0 %6414 }
0x1278   :  { %8893 = vrcp.f32 %v6415_v40 }
0x127b   :  { %v6418_v37 = vpop.xlane.xlu0 %6417 }
0x127c   :  { %8895 = vrcp.f32 %v6418_v37 }
0x127f   :  { %v6502_v42 = vpop.permute.xlu0 %6501 }
0x1283   :  { %v6656_v57 = vpop.permute.xlu0 %6655 }
0x1285   :  { %v8894_v6 = vpop.eup %8893 }
0x1286   :  { %v6421_v38 = vmul.f32 %v8894_v6, %v8890_v52 }
0x1288   :  { %8481 = vmatmul.mubr.msk.f32.vlgmr.msra.gmra.mxu1 %vm1535_vm5, %v6421_v38 }
0x1289   :  { %v8896_v62 = vpop.eup %8895  ;;  %8484 = vmatpush3.msra.mxu1 %v6502_v42  ;;  %8485 = vmatprep.mubr.msk.f32.mxu1 %vm9059_vm0, %v9058_v1 }
0x128a   :  { %8493 = vmatprep.subr.mxu1 %v9058_v1  ;;  %v6422_v8 = vmul.f32 %v8896_v62, %v8892_v25 }
0x128c   :  { %8486 = vmatmul.mubr.msk.f32.vlgmr.msra.gmra.mxu1 %vm1535_vm5, %v6422_v8 }
0x128d   :  { %8494 = vmatpush3.xpose.msk.msra.mxu1 %vm1078_vm4, %v6658_v60  ;;  %8495 = vmatprep.mubr.msk.f32.mxu1 %vm9059_vm0, %v9058_v1 }
0x128e   :  { %8503 = vmatprep.subr.mxu1 %v9058_v1 }
0x1290   :  { %8496 = vmatmul.mubr.msk.f32.vlgmr.msra.gmra.mxu1 %vm1078_vm4, %v6656_v57  ;;  %v8757_v57 = vld [vmem:[%s10143_s14 + $0x38] sm:$0xff]  }
0x1291   :  { %8505 = vmatprep.mubr.msk.f32.mxu1 %vm9059_vm0, %v9058_v1 }
0x12af   :  { %v6651_v61 = vpop.f32.mrf.mxu0 }
0x12b0   :  { %v6733_v58 = vsel %vm1535_vm5, %v6651_v61, -inf }
0x12b1   :  { %6734 = vmax.xlane.f32.xlu1 %v6733_v58  ;;  %v8492_v56 = vpop.f32.mrf.mxu0 }
0x12b2   :  { %v8759_v56 = vld [vmem:[%s10143_s14 + $0x28] sm:$0xff]  }
0x12c2   :  { %6831 = vrot.lane.b32.xlu1 %v9924_v45, %s9048_s30 }
0x12c6   :  { %6987 = vrot.lane.b32.xlu1 %v9931_v2, %s9061_s25 }
0x12ca   :  { %6909 = vrot.lane.b32.xlu1 %v9922_v43, %s9061_s25 }
0x12ce   :  { %6907 = vrot.lane.b32.xlu1 %v9928_v15, %s9061_s25 }
0x133a   :  { %v6735_v26 = vpop.xlane.xlu1 %6734 }
0x133b   :  { %v6739_v29 = vsub.f32 %v6651_v61, %v6735_v26  ;;  %v8758_v61 = vld [vmem:[%s10143_s14 + $0x30] sm:$0xff]  }
0x133d   :  { %v6741_v63 = vmul.f32 1.442695, %v6739_v29  ;;  %v8760_v29 = vld [vmem:[%s10143_s14 + $0x20] sm:$0xff]  }
0x133e   :  { %v6832_v31 = vpop.permute.xlu1 %6831 }
0x133f   :  { %8504 = vmatpush3.msra.mxu1 %v6832_v31  ;;  %8897 = vpow2.f32 %v6741_v63  ;;  %v8761_v31 = vld [vmem:[%s10143_s14 + $0x18] sm:$0xff]  }
0x1340   :  { %8513 = vmatprep.subr.mxu1 %v9058_v1 }
0x1342   :  { %v6988_v16 = vpop.permute.xlu1 %6987 }
0x1346   :  { %v6910_v30 = vpop.permute.xlu1 %6909 }
0x1348   :  { %v10028_v46 = vpop.f32.mrf.mxu1 }
0x134a   :  { %v8482_v4 = vpop.f32.mrf.mxu1 }
0x134b   :  { %v8762_v4 = vld [vmem:[%s10143_s14 + $0x10] sm:$0xff]  }
0x134c   :  { %v6573_v19 = vpop.f32.mrf.mxu1  ;;  %v8898_v43 = vpop.eup %8897 }
0x134d   :  { %v6745_v15 = vsel %vm1535_vm5, %v8898_v43, 0.0 }
0x134e   :  { %v8487_v51 = vpop.f32.mrf.mxu1 }
0x134f   :  { %v8764_v51 = vld [vmem:[%s10143_s14] sm:$0xff]  }
0x1350   :  { %v6729_v2 = vpop.f32.mrf.mxu1 }
0x1351   :  { %v6736_v20 = vsel %vm1535_vm5, %v6729_v2, -inf }
0x1352   :  { %6737 = vmax.xlane.f32.xlu0 %v6736_v20  ;;  %v8497_v24 = vpop.f32.mrf.mxu1  ;;  %v8766_v20 = vld [vmem:[#allocation9 + $0x30] sm:$0xff]  }
0x1356   :  { %6746 = vadd.xlane.f32.xlu0 %v6745_v15 }
0x13db   :  { %v6738_v23 = vpop.xlane.xlu0 %6737 }
0x13dc   :  { %v6740_v27 = vsub.f32 %v6729_v2, %v6738_v23  ;;  %v8765_v2 = vld [vmem:[#allocation9 + $0x38] sm:$0xff]  }
0x13de   :  { %v6743_v14 = vmul.f32 1.442695, %v6740_v27 }
0x13df   :  { %v6747_v9 = vpop.xlane.xlu0 %6746 }
0x13e0   :  { %8899 = vpow2.f32 %v6743_v14 }
0x13e1   :  { %8901 = vrcp.f32 %v6747_v9 }
0x13ed   :  { %v8900_v36 = vpop.eup %8899 }
0x13ee   :  { %v6748_v28 = vsel %vm1535_vm5, %v8900_v36, 0.0  ;;  %v8902_v22 = vpop.eup %8901 }
0x13ef   :  { %6749 = vadd.xlane.f32.xlu0 %v6748_v28  ;;  %v6753_v0 = vmul.f32 %v8902_v22, %v8898_v43  ;;  %v8767_v43 = vld [vmem:[#allocation9 + $0x28] sm:$0xff]  }
0x1405   :  { %6755 = vrot.lane.b32.xlu0 %v9942_v11, %s9048_s30 }
0x1409   :  { %6985 = vrot.lane.b32.xlu0 %v9939_v17, %s9061_s25  ;;  %v6908_v17 = vpop.permute.xlu1 %6907 }
0x1478   :  { %v6750_v21 = vpop.xlane.xlu0 %6749 }
0x1479   :  { %8903 = vrcp.f32 %v6750_v21 }
0x147c   :  { %v6756_v47 = vpop.permute.xlu0 %6755 }
0x147d   :  { %8499 = vmatpush3.msra.mxu0 %v6756_v47 }
0x147e   :  { %8501 = vmatmul.mubr.msk.f32.vlgmr.msra.gmra.mxu0 %vm1535_vm5, %v6753_v0  ;;  %8508 = vmatprep.subr.mxu0 %v9058_v1 }
0x147f   :  { %8509 = vmatpush3.xpose.msk.msra.mxu0 %vm1078_vm4, %v6910_v30  ;;  %8510 = vmatprep.mubr.msk.f32.mxu0 %vm9059_vm0, %v9058_v1 }
0x1480   :  { %8518 = vmatprep.subr.mxu0 %v9058_v1  ;;  %v6986_v12 = vpop.permute.xlu0 %6985 }
0x1482   :  { %8511 = vmatmul.mubr.msk.f32.vlgmr.msra.gmra.mxu0 %vm1078_vm4, %v6908_v17 }
0x1483   :  { %8520 = vmatprep.mubr.msk.f32.mxu0 %vm9059_vm0, %v9058_v1 }
0x1486   :  { %v8904_v53 = vpop.eup %8903 }
0x1487   :  { %v6754_v44 = vmul.f32 %v8904_v53, %v8900_v36 }
0x1489   :  { %8506 = vmatmul.mubr.msk.f32.vlgmr.msra.gmra.mxu1 %vm1535_vm5, %v6754_v44 }
0x148a   :  { %8514 = vmatpush3.xpose.msk.msra.mxu1 %vm1078_vm4, %v6988_v16  ;;  %8515 = vmatprep.mubr.msk.f32.mxu1 %vm9059_vm0, %v9058_v1 }
0x148b   :  { %8523 = vmatprep.subr.mxu1 %v9058_v1 }
0x148d   :  { %8516 = vmatmul.mubr.msk.f32.vlgmr.msra.gmra.mxu1 %vm1078_vm4, %v6986_v12 }
0x148e   :  { %8525 = vmatprep.mubr.msk.f32.mxu1 %vm9059_vm0, %v9058_v1 }
0x153e   :  { %v6827_v48 = vpop.f32.mrf.mxu0 }
0x1540   :  { %v8502_v10 = vpop.f32.mrf.mxu0 }
0x1542   :  { %v6981_v13 = vpop.f32.mrf.mxu0 }
0x1543   :  { %v7063_v59 = vsel %vm1535_vm5, %v6981_v13, -inf }
0x1544   :  { %7064 = vmax.xlane.f32.xlu1 %v7063_v59  ;;  %v8512_v3 = vpop.f32.mrf.mxu0  ;;  %v8770_v59 = vld [vmem:[#allocation9 + $0x10] sm:$0xff]  }
0x1545   :  { %v8771_v3 = vld [vmem:[#allocation9 + $0x8] sm:$0xff]  }
0x1549   :  { %v6903_v41 = vpop.f32.mrf.mxu1 }
0x154b   :  { %v8507_v35 = vpop.f32.mrf.mxu1 }
0x154c   :  { %v7765_v35 = vld [vmem:[%s10144_s15] ss:$0 sm:$0xff] }
0x154d   :  { %v7059_v33 = vpop.f32.mrf.mxu1 }
0x154e   :  { %v7066_v34 = vsel %vm1535_vm5, %v7059_v33, -inf }
0x154f   :  { %7067 = vmax.xlane.f32.xlu0 %v7066_v34  ;;  %v8517_v18 = vpop.f32.mrf.mxu1 }
0x1555   :  { %7161 = vrot.lane.b32.xlu1 %v9924_v45, %s9061_s25 }
0x1559   :  { %7241 = vrot.lane.b32.xlu1 %v6573_v19, %s9061_s25  ;;  %v8763_v19 = vld [vmem:[%s10143_s14 + $0x8] sm:$0xff]  }
0x155d   :  { %7249 = vrot.lane.b32.xlu1 %v6903_v41, %s9048_s30  ;;  %v8772_v41 = vld [vmem:[#allocation9] sm:$0xff]  }
0x15cd   :  { %v7065_v7 = vpop.xlane.xlu1 %7064 }
0x15ce   :  { %v7069_v54 = vsub.f32 %v6981_v13, %v7065_v7  ;;  %v8768_v13 = vld [vmem:[#allocation9 + $0x20] sm:$0xff]  }
0x15d0   :  { %v7071_v60 = vmul.f32 1.442695, %v7069_v54 }
0x15d1   :  { %v7162_v49 = vpop.permute.xlu1 %7161 }
0x15d2   :  { %8905 = vpow2.f32 %v7071_v60  ;;  %8524 = vmatpush3.msra.mxu1 %v7162_v49 }
0x15d3   :  { %8548 = vmatprep.subr.bf16.mxu1 %v9058_v1 }
0x15d5   :  { %v7242_v24 = vpop.permute.xlu1 %7241 }
0x15d6   :  { %v7262_v27 = vsel %vm1078_vm4, %v9982_v5, %v7242_v24 }
0x15d8   :  { %v7068_v52 = vpop.xlane.xlu0 %7067 }
0x15d9   :  { %v7070_v55 = vsub.f32 %v7059_v33, %v7068_v52  ;;  %v7250_v23 = vpop.permute.xlu1 %7249  ;;  %v7774_v52 = vld [vmem:[#allocation10] ss:$0 sm:$0xff] }
0x15da   :  { %v7264_v14 = vsel %vm187_vm3, %v7262_v27, %v7250_v23 }
0x15db   :  { %v7073_v32 = vmul.f32 1.442695, %v7070_v55 }
0x15dd   :  { %8907 = vpow2.f32 %v7073_v32 }
0x15df   :  { %v8906_v25 = vpop.eup %8905 }
0x15e0   :  { %v7075_v39 = vsel %vm1535_vm5, %v8906_v25, 0.0 }
0x15e1   :  { %7076 = vadd.xlane.f32.xlu0 %v7075_v39 }
0x15ea   :  { %v8908_v45 = vpop.eup %8907 }
0x15eb   :  { %v7078_v40 = vsel %vm1535_vm5, %v8908_v45, 0.0 }
0x15ec   :  { %7079 = vadd.xlane.f32.xlu0 %v7078_v40 }
0x1602   :  { %7085 = vrot.lane.b32.xlu0 %v9942_v11, %s9061_s25 }
0x1606   :  { %7239 = vrot.lane.b32.xlu0 %v10028_v46, %s9061_s25 }
0x160a   :  { %7247 = vrot.lane.b32.xlu0 %v6827_v48, %s9048_s30 }
0x166a   :  { %v7077_v37 = vpop.xlane.xlu0 %7076 }
0x166b   :  { %8909 = vrcp.f32 %v7077_v37 }
0x1675   :  { %v7080_v6 = vpop.xlane.xlu0 %7079 }
0x1676   :  { %8911 = vrcp.f32 %v7080_v6 }
0x1678   :  { %v8910_v38 = vpop.eup %8909 }
0x1679   :  { %v7086_v42 = vpop.permute.xlu0 %7085  ;;  %v7083_v62 = vmul.f32 %v8910_v38, %v8906_v25 }
0x167a   :  { %8519 = vmatpush3.msra.mxu0 %v7086_v42 }
0x167b   :  { %8521 = vmatmul.mubr.msk.f32.vlgmr.msra.gmra.mxu0 %vm1535_vm5, %v7083_v62  ;;  %8528 = vmatprep.subr.bf16.mxu0 %v9058_v1 }
0x167c   :  { %8544 = vmatprep.mubr.msk.bf16.mxu0 %vm9059_vm0, %v9058_v1  ;;  %8529 = vmatpush3.bf16.msra.mxu0 %v8757_v57 }
0x167d   :  { %8530 = vmatprep.subr.bf16.mxu0 %v9058_v1  ;;  %v7240_v15 = vpop.permute.xlu0 %7239 }
0x167e   :  { %v7261_v16 = vsel %vm1078_vm4, %v9980_v50, %v7240_v15  ;;  %v8769_v50 = vld [vmem:[#allocation9 + $0x18] sm:$0xff]  }
0x1680   :  { %8531 = vmatpush3.bf16.msra.mxu0 %v8758_v61 }
0x1681   :  { %8532 = vmatprep.subr.bf16.mxu0 %v9058_v1  ;;  %v7248_v28 = vpop.permute.xlu0 %7247 }
0x1682   :  { %v7263_v21 = vsel %vm187_vm3, %v7261_v16, %v7248_v28 }
0x1683   :  { %v8912_v11 = vpop.eup %8911 }
0x1684   :  { %v7084_v8 = vmul.f32 %v8912_v11, %v8908_v45  ;;  %8533 = vmatpush3.bf16.msra.mxu0 %v8759_v56 }
0x1685   :  { %8534 = vmatprep.subr.bf16.mxu0 %v9058_v1 }
0x1686   :  { %8526 = vmatmul.mubr.msk.f32.vlgmr.msra.gmra.mxu1 %vm1535_vm5, %v7084_v8 }
0x1687   :  { %8564 = vmatprep.mubr.msk.bf16.mxu1 %vm9059_vm0, %v9058_v1  ;;  %8549 = vmatpush3.bf16.msra.mxu1 %v8765_v2 }
0x1688   :  { %8535 = vmatpush3.bf16.msra.mxu0 %v8760_v29  ;;  %8550 = vmatprep.subr.bf16.mxu1 %v9058_v1 }
0x1689   :  { %8536 = vmatprep.subr.bf16.mxu0 %v9058_v1 }
0x168b   :  { %8551 = vmatpush3.bf16.msra.mxu1 %v8766_v20 }
0x168c   :  { %8537 = vmatpush3.bf16.msra.mxu0 %v8761_v31  ;;  %8552 = vmatprep.subr.bf16.mxu1 %v9058_v1 }
0x168d   :  { %8538 = vmatprep.subr.bf16.mxu0 %v9058_v1 }
0x168f   :  { %8553 = vmatpush3.bf16.msra.mxu1 %v8767_v43 }
0x1690   :  { %8539 = vmatpush3.bf16.msra.mxu0 %v8762_v4  ;;  %8554 = vmatprep.subr.bf16.mxu1 %v9058_v1 }
0x1691   :  { %8540 = vmatprep.subr.bf16.mxu0 %v9058_v1 }
0x1693   :  { %8555 = vmatpush3.bf16.msra.mxu1 %v8768_v13 }
0x1694   :  { %8541 = vmatpush3.bf16.msra.mxu0 %v8763_v19  ;;  %8556 = vmatprep.subr.bf16.mxu1 %v9058_v1 }
0x1695   :  { %8542 = vmatprep.subr.bf16.mxu0 %v9058_v1 }
0x1697   :  { %8557 = vmatpush3.bf16.msra.mxu1 %v8769_v50 }
0x1698   :  { %8543 = vmatpush3.bf16.msra.mxu0 %v8764_v51  ;;  %8558 = vmatprep.subr.bf16.mxu1 %v9058_v1 }
0x169b   :  { %8559 = vmatpush3.bf16.msra.mxu1 %v8770_v59 }
0x169c   :  { %8560 = vmatprep.subr.bf16.mxu1 %v9058_v1 }
0x169f   :  { %8561 = vmatpush3.bf16.msra.mxu1 %v8771_v3 }
0x16a0   :  { %8562 = vmatprep.subr.bf16.mxu1 %v9058_v1 }
0x16a3   :  { %8563 = vmatpush3.bf16.msra.mxu1 %v8772_v41 }
0x173b   :  { %v7157_v58 = vpop.f32.mrf.mxu0 }
0x173d   :  { %v8522_v26 = vpop.f32.mrf.mxu0 }
0x1746   :  { %v7233_v63 = vpop.f32.mrf.mxu1 }
0x1747   :  { %7257 = vrot.lane.b32.xlu1 %v7233_v63, %s9060_s7 }
0x1748   :  { %v8527_v46 = vpop.f32.mrf.mxu1 }
0x174b   :  { %7255 = vrot.lane.b32.xlu1 %v7157_v58, %s9060_s7 }
0x17b9   :  { %v7258_v36 = vpop.permute.xlu1 %7257 }
0x17ba   :  { %v7266_v9 = vsel %vm5100_vm6, %v7264_v14, %v7258_v36 }
0x17bb   :  { %8913 = vtanh.f32 %v7266_v9 }
0x17bd   :  { %v7256_v22 = vpop.permute.xlu1 %7255 }
0x17be   :  { %v7265_v30 = vsel %vm5100_vm6, %v7263_v21, %v7256_v22 }
0x17bf   :  { %8915 = vtanh.f32 %v7265_v30 }
0x17c8   :  { %v8914_v47 = vpop.eup %8913 }
0x17c9   :  { %v7270_v0 = vpack.c.bf16 %v8914_v47, %v8914_v47 }
0x17cb   :  { %v7297_v17 = vunpack.c.l.b16 %v7270_v0 }
0x17cc   :  { %v8916_v5 = vpop.eup %8915 }
0x17cd   :  { %v7269_v53 = vpack.c.bf16 %v8916_v5, %v8916_v5  ;;  %v7298_v44 = vrot.slane %v7297_v17, 7 }
0x17cf   :  { %v7296_v12 = vunpack.c.l.b16 %v7269_v53 }
0x17d1   :  { %v7300_v48 = vsel %vm7299_vm7, %v7298_v44, %v7296_v12 }
0x17d2   :  { %v7301_v10 = vpack.c.b16 %v7300_v48, %v7300_v48 }
0x17d4   :  { %8545 = vmatmul.mubr.bf16.vlgmr.msra.gmra.mxu0 %v7301_v10 }
0x1894   :  { %v7385_v33 = vpop.f32.mrf.mxu0 }
0x1895   :  { %v7386_v34 = vadd.f32 %v7765_v35, %v7385_v33 }
0x1896   :  { %v8546_v18 = vpop.f32.mrf.mxu0 }
0x1897   :  { %8917 = vtanh.f32 %v7386_v34 }
0x1898   :  { %v7388_v7 = vpop.f32.mrf.mxu0 }
0x189a   :  { %v8547_v54 = vpop.f32.mrf.mxu0 }
0x18a4   :  { %v8918_v60 = vpop.eup %8917 }
0x18a5   :  { %v7392_v49 = vpack.c.bf16 %v8918_v60, %v8918_v60 }
0x18a7   :  { %8565 = vmatmul.mubr.bf16.vlgmr.msra.gmra.mxu1 %v7392_v49 }
0x1967   :  { %v7498_v55 = vpop.f32.mrf.mxu1 }
0x1968   :  { %v7499_v32 = vadd.f32 %v7774_v52, %v7498_v55 }
0x1969   :  { %v8566_v25 = vpop.f32.mrf.mxu1 }
0x196a   :  { %v7506_v39 = vcombine.low %v8918_v60, %v7499_v32 }
0x196b   :  { %v7501_v1 = vpop.f32.mrf.mxu1 }
0x196c   :  { %7783 = vst.sshfl [vmem:[%s10147_s18] sm:$0x33 pattern:$0x76325410] %v7506_v39 }
0x196d   :  { %v8567_v45 = vpop.f32.mrf.mxu1 }
0x196e   :  { %7520 = vsyncpa [#allocation3], 1 }
0x196f   :  { %7521 = vsyncpa [#allocation5], 1 }
0x1970   :  { %7522 = vsyncpa [#allocation8], 1 }
0x1971   :  { %7523 = vsyncpa [#allocation11], 1 }

</bundles_post_ra>
